<compile_context>
chip_gen: v7x
topology: tpu7x:2x2x1
jax: 0.10.0
libtpu: 0.0.40
codegen_flags: <defaults>
</compile_context>

<pallas_src>
import functools

import jax
import jax.numpy as jnp
from jax import lax
from jax.experimental import pallas as pl
from jax.experimental.pallas import tpu as pltpu


def _im2col_3x3(zp, H, W, C):
    """zp: (H+2, W+2, C) zero-padded image -> (H*W, 9*C) patch matrix.

    Column ordering matches w.reshape(9*C, C) for HWIO weights:
        column index = (dh*3 + dw)*C + c_in.
    """
    # Shift along W (sublane axis): (H+2, W, 3C)
    cols = jnp.concatenate(
        [zp[:, 0:W, :], zp[:, 1:W + 1, :], zp[:, 2:W + 2, :]], axis=-1)
    # Shift along H (major axis, cheap): (H, W, 9C)
    rows = jnp.concatenate(
        [cols[0:H, :, :], cols[1:H + 1, :, :], cols[2:H + 2, :, :]], axis=-1)
    return rows.reshape(H * W, 9 * C)


def _resblock_kernel(xp_ref, w1_ref, b1_ref, w2_ref, b2_ref, o_ref, mid_ref,
                     *, H, W, C):
    # xp_ref : (1, H+2, W+2, C)  zero-padded NHWC input for this batch element
    # w*_ref : (9*C, C)          im2col-reshaped HWIO conv weights
    # b*_ref : (1, C)            f32 biases
    # o_ref  : (1, H, W, C)      NHWC output block
    # mid_ref: (H+2, W+2, C)     f32 VMEM scratch (zero-padded conv1 output)
    xp = xp_ref[0]                                        # (H+2, W+2, C), input dtype

    # ---- conv1: single MXU matmul, K = 9*C, f32 accumulation ----
    lhs1 = _im2col_3x3(xp, H, W, C)                       # (H*W, 9C)
    y1 = jnp.dot(lhs1, w1_ref[...], preferred_element_type=jnp.float32)
    y1 = y1 + b1_ref[...]                                 # (H*W, C) f32

    # Zero only the 1-pixel halo border (interior is fully overwritten below).
    zrow = jnp.zeros((1, W + 2, C), jnp.float32)
    zcol = jnp.zeros((H + 2, 1, C), jnp.float32)
    mid_ref[pl.ds(0, 1), :, :] = zrow
    mid_ref[pl.ds(H + 1, 1), :, :] = zrow
    mid_ref[:, pl.ds(0, 1), :] = zcol
    mid_ref[:, pl.ds(W + 1, 1), :] = zcol
    mid_ref[pl.ds(1, H), pl.ds(1, W), :] = y1.reshape(H, W, C)

    # ---- conv2: single MXU matmul over the padded conv1 result ----
    lhs2 = _im2col_3x3(mid_ref[...], H, W, C)             # (H*W, 9C)
    y2 = jnp.dot(lhs2, w2_ref[...], preferred_element_type=jnp.float32)
    y2 = y2 + b2_ref[...]

    # ---- ReLU (the 'R' in 'CCR') + residual add ----
    res = jnp.maximum(y2, 0.0)
    x_center = xp[1:H + 1, 1:W + 1, :].reshape(H * W, C).astype(jnp.float32)
    o_ref[0] = (x_center + res).reshape(H, W, C).astype(o_ref.dtype)


def resblock_resdnn_pallas(x, w1, b1, w2, b2):
    """x: (B, C, H, W) NCHW; w1/w2: (3, 3, C, C) HWIO; b1/b2: (C,).

    Returns x + relu(conv2(conv1(x))) with both convs 3x3 / stride 1 / pad 1.
    """
    B, C, H, W = x.shape
    assert w1.shape == (3, 3, C, C) and w2.shape == (3, 3, C, C)
    assert b1.shape == (C,) and b2.shape == (C,)

    # Layout plumbing in the wrapper: NCHW -> NHWC (channels on lanes), 1-pixel
    # zero halo, and im2col-friendly (9C, C) weight matrices.
    x_nhwc = jnp.transpose(x, (0, 2, 3, 1))
    xp = jnp.pad(x_nhwc, ((0, 0), (1, 1), (1, 1), (0, 0)))
    w1m = w1.reshape(9 * C, C)
    w2m = w2.reshape(9 * C, C)
    b1_2d = b1.reshape(1, C).astype(jnp.float32)
    b2_2d = b2.reshape(1, C).astype(jnp.float32)

    kernel = functools.partial(_resblock_kernel, H=H, W=W, C=C)

    out_nhwc = pl.pallas_call(
        kernel,
        out_shape=jax.ShapeDtypeStruct((B, H, W, C), x.dtype),
        grid=(B,),
        in_specs=[
            # Full padded image per batch element.
            pl.BlockSpec((1, H + 2, W + 2, C), lambda b: (b, 0, 0, 0)),
            # Weights / biases: constant block index -> stay resident in VMEM.
            pl.BlockSpec((9 * C, C), lambda b: (0, 0)),
            pl.BlockSpec((1, C), lambda b: (0, 0)),
            pl.BlockSpec((9 * C, C), lambda b: (0, 0)),
            pl.BlockSpec((1, C), lambda b: (0, 0)),
        ],
        out_specs=pl.BlockSpec((1, H, W, C), lambda b: (b, 0, 0, 0)),
        scratch_shapes=[pltpu.VMEM((H + 2, W + 2, C), jnp.float32)],
        compiler_params=pltpu.CompilerParams(
            dimension_semantics=("parallel",),
        ),
    )(xp, w1m, b1_2d, w2m, b2_2d)

    return jnp.transpose(out_nhwc, (0, 3, 1, 2))


def resblock_resdnn_ref(x, w1, b1, w2, b2):
    """Pure-JAX reference matching the PyTorch ResBlock_ResDNN (mode='CCR')."""
    dn = lax.conv_dimension_numbers(x.shape, w1.shape, ("NCHW", "HWIO", "NCHW"))
    y = lax.conv_general_dilated(x, w1, window_strides=(1, 1), padding="SAME",
                                 dimension_numbers=dn,
                                 precision=lax.Precision.HIGHEST)
    y = y + b1[None, :, None, None]
    y = lax.conv_general_dilated(y, w2, window_strides=(1, 1), padding="SAME",
                                 dimension_numbers=dn,
                                 precision=lax.Precision.HIGHEST)
    y = y + b2[None, :, None, None]
    y = jnp.maximum(y, 0.0)
    return x + y


class ResBlockResDNN:
    """Stateless mirror of the PyTorch module (mode='CCR', in==out channels)."""

    def __init__(self, w1, b1, w2, b2):
        self.w1, self.b1, self.w2, self.b2 = w1, b1, w2, b2

    def __call__(self, x):
        return resblock_resdnn_pallas(x, self.w1, self.b1, self.w2, self.b2)


if __name__ == "__main__":
    key = jax.random.PRNGKey(0)
    kx, kw1, kw2, kb1, kb2 = jax.random.split(key, 5)

    # C=64 matches the module's default channel count (channels sit on lanes).
    B, C, H, W = 2, 64, 16, 16
    x = jax.random.normal(kx, (B, C, H, W), dtype=jnp.float32)
    w1 = jax.random.normal(kw1, (3, 3, C, C), dtype=jnp.float32) * 0.05
    w2 = jax.random.normal(kw2, (3, 3, C, C), dtype=jnp.float32) * 0.05
    b1 = jax.random.normal(kb1, (C,), dtype=jnp.float32) * 0.1
    b2 = jax.random.normal(kb2, (C,), dtype=jnp.float32) * 0.1

    mod = ResBlockResDNN(w1, b1, w2, b2)
    out = jax.block_until_ready(mod(x))

    ref = resblock_resdnn_ref(x, w1, b1, w2, b2)
    assert out.shape == x.shape, out.shape
    assert out.dtype == x.dtype, out.dtype
    max_err = float(jnp.max(jnp.abs(out - ref)))
    assert jnp.allclose(out, ref, rtol=3e-3, atol=3e-3), f"max abs err {max_err}"

    print("KERNEL_OK")
</pallas_src>

<mosaic_0001>
module attributes {stable_mosaic.version = 11 : i64} {
  func.func @_resblock_kernel(%arg0: i32, %arg1: memref<1x18x18x64xf32, #tpu.memory_space<vmem>>, %arg2: memref<576x64xf32, #tpu.memory_space<vmem>>, %arg3: memref<1x64xf32, #tpu.memory_space<vmem>>, %arg4: memref<576x64xf32, #tpu.memory_space<vmem>>, %arg5: memref<1x64xf32, #tpu.memory_space<vmem>>, %arg6: memref<1x16x16x64xf32, #tpu.memory_space<vmem>>, %arg7: memref<18x18x64xf32, #tpu.memory_space<vmem>>) attributes {dimension_semantics = [#tpu.dimension_semantics<parallel>], iteration_bounds = array<i64: 2>, scalar_prefetch = 0 : i64, scratch_operands = 1 : i64, tpu.core_type = #tpu.core_type<tc>, window_params = [{transform_indices = @transform_0, window_bounds = array<i64: 1, 18, 18, 64>}, {pipeline_mode = #tpu.pipeline_mode<synchronous>, transform_indices = @transform_1, window_bounds = array<i64: 576, 64>}, {pipeline_mode = #tpu.pipeline_mode<synchronous>, transform_indices = @transform_2, window_bounds = array<i64: 1, 64>}, {pipeline_mode = #tpu.pipeline_mode<synchronous>, transform_indices = @transform_3, window_bounds = array<i64: 576, 64>}, {pipeline_mode = #tpu.pipeline_mode<synchronous>, transform_indices = @transform_4, window_bounds = array<i64: 1, 64>}, {transform_indices = @transform_5, window_bounds = array<i64: 1, 16, 16, 64>}]} {
    %c0 = arith.constant 0 : index
    %c0_0 = arith.constant 0 : index
    %c0_1 = arith.constant 0 : index
    %c0_2 = arith.constant 0 : index
    %0 = vector.load %arg1[%c0, %c0_0, %c0_1, %c0_2] : memref<1x18x18x64xf32, #tpu.memory_space<vmem>>, vector<1x18x18x64xf32>
    %1 = vector.shape_cast %0 : vector<1x18x18x64xf32> to vector<18x18x64xf32>
    %2 = vector.extract_strided_slice %1 {offsets = [0, 0, 0], sizes = [18, 16, 64], strides = [1, 1, 1]} : vector<18x18x64xf32> to vector<18x16x64xf32>
    %3 = vector.extract_strided_slice %1 {offsets = [0, 1, 0], sizes = [18, 16, 64], strides = [1, 1, 1]} : vector<18x18x64xf32> to vector<18x16x64xf32>
    %4 = vector.extract_strided_slice %1 {offsets = [0, 2, 0], sizes = [18, 16, 64], strides = [1, 1, 1]} : vector<18x18x64xf32> to vector<18x16x64xf32>
    %5 = tpu.concatenate %2, %3, %4 in 2 : vector<18x16x64xf32>, vector<18x16x64xf32>, vector<18x16x64xf32> -> vector<18x16x192xf32>
    %6 = vector.extract_strided_slice %5 {offsets = [0, 0, 0], sizes = [16, 16, 192], strides = [1, 1, 1]} : vector<18x16x192xf32> to vector<16x16x192xf32>
    %7 = vector.extract_strided_slice %5 {offsets = [1, 0, 0], sizes = [16, 16, 192], strides = [1, 1, 1]} : vector<18x16x192xf32> to vector<16x16x192xf32>
    %8 = vector.extract_strided_slice %5 {offsets = [2, 0, 0], sizes = [16, 16, 192], strides = [1, 1, 1]} : vector<18x16x192xf32> to vector<16x16x192xf32>
    %9 = tpu.concatenate %6, %7, %8 in 2 : vector<16x16x192xf32>, vector<16x16x192xf32>, vector<16x16x192xf32> -> vector<16x16x576xf32>
    %10 = vector.shape_cast %9 : vector<16x16x576xf32> to vector<256x576xf32>
    %c0_3 = arith.constant 0 : index
    %c0_4 = arith.constant 0 : index
    %11 = vector.load %arg2[%c0_3, %c0_4] : memref<576x64xf32, #tpu.memory_space<vmem>>, vector<576x64xf32>
    %cst = arith.constant dense<0.000000e+00> : vector<256x64xf32>
    %12 = tpu.matmul %10, %11, %cst {dimension_numbers = #tpu.dot_dimension_numbers<[1], [0], [0], [1], [0, 0, 1, 1], [], []>} : vector<256x576xf32>, vector<576x64xf32>, vector<256x64xf32> -> vector<256x64xf32>
    %c0_5 = arith.constant 0 : index
    %c0_6 = arith.constant 0 : index
    %13 = vector.load %arg3[%c0_5, %c0_6] : memref<1x64xf32, #tpu.memory_space<vmem>>, vector<1x64xf32>
    %14 = vector.broadcast %13 : vector<1x64xf32> to vector<256x64xf32>
    %15 = arith.addf %12, %14 : vector<256x64xf32>
    %cst_7 = arith.constant 0.000000e+00 : f32
    %16 = vector.broadcast %cst_7 : f32 to vector<1x18x64xf32>
    %cst_8 = arith.constant 0.000000e+00 : f32
    %17 = vector.broadcast %cst_8 : f32 to vector<18x1x64xf32>
    %c0_9 = arith.constant 0 : index
    %c0_10 = arith.constant 0 : index
    %c0_11 = arith.constant 0 : index
    %18 = vector.load %arg7[%c0_9, %c0_10, %c0_11] : memref<18x18x64xf32, #tpu.memory_space<vmem>>, vector<1x18x64xf32>
    tpu.vector_store %arg7[%c0_9, %c0_10, %c0_11], %16 {strides = array<i32>} : memref<18x18x64xf32, #tpu.memory_space<vmem>>, vector<1x18x64xf32>,
    %c17 = arith.constant 17 : index
    %c0_12 = arith.constant 0 : index
    %c0_13 = arith.constant 0 : index
    %19 = vector.load %arg7[%c17, %c0_12, %c0_13] : memref<18x18x64xf32, #tpu.memory_space<vmem>>, vector<1x18x64xf32>
    tpu.vector_store %arg7[%c17, %c0_12, %c0_13], %16 {strides = array<i32>} : memref<18x18x64xf32, #tpu.memory_space<vmem>>, vector<1x18x64xf32>,
    %c0_14 = arith.constant 0 : index
    %c0_15 = arith.constant 0 : index
    %c0_16 = arith.constant 0 : index
    %20 = vector.load %arg7[%c0_14, %c0_15, %c0_16] : memref<18x18x64xf32, #tpu.memory_space<vmem>>, vector<18x1x64xf32>
    tpu.vector_store %arg7[%c0_14, %c0_15, %c0_16], %17 {strides = array<i32>} : memref<18x18x64xf32, #tpu.memory_space<vmem>>, vector<18x1x64xf32>,
    %c0_17 = arith.constant 0 : index
    %c17_18 = arith.constant 17 : index
    %c0_19 = arith.constant 0 : index
    %21 = vector.load %arg7[%c0_17, %c17_18, %c0_19] : memref<18x18x64xf32, #tpu.memory_space<vmem>>, vector<18x1x64xf32>
    tpu.vector_store %arg7[%c0_17, %c17_18, %c0_19], %17 {strides = array<i32>} : memref<18x18x64xf32, #tpu.memory_space<vmem>>, vector<18x1x64xf32>,
    %22 = vector.shape_cast %15 : vector<256x64xf32> to vector<16x16x64xf32>
    %c1 = arith.constant 1 : index
    %c1_20 = arith.constant 1 : index
    %c0_21 = arith.constant 0 : index
    %23 = vector.load %arg7[%c1, %c1_20, %c0_21] : memref<18x18x64xf32, #tpu.memory_space<vmem>>, vector<16x16x64xf32>
    tpu.vector_store %arg7[%c1, %c1_20, %c0_21], %22 {strides = array<i32>} : memref<18x18x64xf32, #tpu.memory_space<vmem>>, vector<16x16x64xf32>,
    %c0_22 = arith.constant 0 : index
    %c0_23 = arith.constant 0 : index
    %c0_24 = arith.constant 0 : index
    %24 = vector.load %arg7[%c0_22, %c0_23, %c0_24] : memref<18x18x64xf32, #tpu.memory_space<vmem>>, vector<18x18x64xf32>
    %25 = vector.extract_strided_slice %24 {offsets = [0, 0, 0], sizes = [18, 16, 64], strides = [1, 1, 1]} : vector<18x18x64xf32> to vector<18x16x64xf32>
    %26 = vector.extract_strided_slice %24 {offsets = [0, 1, 0], sizes = [18, 16, 64], strides = [1, 1, 1]} : vector<18x18x64xf32> to vector<18x16x64xf32>
    %27 = vector.extract_strided_slice %24 {offsets = [0, 2, 0], sizes = [18, 16, 64], strides = [1, 1, 1]} : vector<18x18x64xf32> to vector<18x16x64xf32>
    %28 = tpu.concatenate %25, %26, %27 in 2 : vector<18x16x64xf32>, vector<18x16x64xf32>, vector<18x16x64xf32> -> vector<18x16x192xf32>
    %29 = vector.extract_strided_slice %28 {offsets = [0, 0, 0], sizes = [16, 16, 192], strides = [1, 1, 1]} : vector<18x16x192xf32> to vector<16x16x192xf32>
    %30 = vector.extract_strided_slice %28 {offsets = [1, 0, 0], sizes = [16, 16, 192], strides = [1, 1, 1]} : vector<18x16x192xf32> to vector<16x16x192xf32>
    %31 = vector.extract_strided_slice %28 {offsets = [2, 0, 0], sizes = [16, 16, 192], strides = [1, 1, 1]} : vector<18x16x192xf32> to vector<16x16x192xf32>
    %32 = tpu.concatenate %29, %30, %31 in 2 : vector<16x16x192xf32>, vector<16x16x192xf32>, vector<16x16x192xf32> -> vector<16x16x576xf32>
    %33 = vector.shape_cast %32 : vector<16x16x576xf32> to vector<256x576xf32>
    %c0_25 = arith.constant 0 : index
    %c0_26 = arith.constant 0 : index
    %34 = vector.load %arg4[%c0_25, %c0_26] : memref<576x64xf32, #tpu.memory_space<vmem>>, vector<576x64xf32>
    %cst_27 = arith.constant dense<0.000000e+00> : vector<256x64xf32>
    %35 = tpu.matmul %33, %34, %cst_27 {dimension_numbers = #tpu.dot_dimension_numbers<[1], [0], [0], [1], [0, 0, 1, 1], [], []>} : vector<256x576xf32>, vector<576x64xf32>, vector<256x64xf32> -> vector<256x64xf32>
    %c0_28 = arith.constant 0 : index
    %c0_29 = arith.constant 0 : index
    %36 = vector.load %arg5[%c0_28, %c0_29] : memref<1x64xf32, #tpu.memory_space<vmem>>, vector<1x64xf32>
    %37 = vector.broadcast %36 : vector<1x64xf32> to vector<256x64xf32>
    %38 = arith.addf %35, %37 : vector<256x64xf32>
    %cst_30 = arith.constant 0.000000e+00 : f32
    %39 = vector.broadcast %cst_30 : f32 to vector<256x64xf32>
    %40 = arith.maximumf %38, %39 : vector<256x64xf32>
    %41 = vector.extract_strided_slice %1 {offsets = [1, 1, 0], sizes = [16, 16, 64], strides = [1, 1, 1]} : vector<18x18x64xf32> to vector<16x16x64xf32>
    %42 = vector.shape_cast %41 : vector<16x16x64xf32> to vector<256x64xf32>
    %43 = arith.addf %42, %40 : vector<256x64xf32>
    %44 = vector.shape_cast %43 : vector<256x64xf32> to vector<16x16x64xf32>
    %c0_31 = arith.constant 0 : index
    %c0_32 = arith.constant 0 : index
    %c0_33 = arith.constant 0 : index
    %c0_34 = arith.constant 0 : index
    %45 = vector.load %arg6[%c0_31, %c0_32, %c0_33, %c0_34] : memref<1x16x16x64xf32, #tpu.memory_space<vmem>>, vector<1x16x16x64xf32>
    %46 = vector.shape_cast %45 : vector<1x16x16x64xf32> to vector<16x16x64xf32>
    %47 = vector.shape_cast %44 : vector<16x16x64xf32> to vector<1x16x16x64xf32>
    tpu.vector_store %arg6[%c0_31, %c0_32, %c0_33, %c0_34], %47 {strides = array<i32>} : memref<1x16x16x64xf32, #tpu.memory_space<vmem>>, vector<1x16x16x64xf32>,
    return
  }
  func.func @transform_0(%arg0: i32) -> (i32, i32, i32, i32) {
    %c0_i32 = arith.constant 0 : i32
    %c0_i32_0 = arith.constant 0 : i32
    %c0_i32_1 = arith.constant 0 : i32
    %c0_i32_2 = arith.constant 0 : i32
    return %arg0, %c0_i32, %c0_i32_0, %c0_i32_1 : i32, i32, i32, i32
  }
  func.func @transform_1(%arg0: i32) -> (i32, i32) {
    %c0_i32 = arith.constant 0 : i32
    %c0_i32_0 = arith.constant 0 : i32
    %c0_i32_1 = arith.constant 0 : i32
    return %c0_i32, %c0_i32_0 : i32, i32
  }
  func.func @transform_2(%arg0: i32) -> (i32, i32) {
    %c0_i32 = arith.constant 0 : i32
    %c0_i32_0 = arith.constant 0 : i32
    %c0_i32_1 = arith.constant 0 : i32
    return %c0_i32, %c0_i32_0 : i32, i32
  }
  func.func @transform_3(%arg0: i32) -> (i32, i32) {
    %c0_i32 = arith.constant 0 : i32
    %c0_i32_0 = arith.constant 0 : i32
    %c0_i32_1 = arith.constant 0 : i32
    return %c0_i32, %c0_i32_0 : i32, i32
  }
  func.func @transform_4(%arg0: i32) -> (i32, i32) {
    %c0_i32 = arith.constant 0 : i32
    %c0_i32_0 = arith.constant 0 : i32
    %c0_i32_1 = arith.constant 0 : i32
    return %c0_i32, %c0_i32_0 : i32, i32
  }
  func.func @transform_5(%arg0: i32) -> (i32, i32, i32, i32) {
    %c0_i32 = arith.constant 0 : i32
    %c0_i32_0 = arith.constant 0 : i32
    %c0_i32_1 = arith.constant 0 : i32
    %c0_i32_2 = arith.constant 0 : i32
    return %arg0, %c0_i32, %c0_i32_0, %c0_i32_1 : i32, i32, i32, i32
  }
}

</mosaic_0001>

<bundles_post_ra>
// kernel: tpu_custom_call.1
= control target key start
LH: loop header
LB: loop body
LE: loop exit
PB: predicated region body
PF: predicated region fallthrough
CT: control target
= control target key end

     0   :  { %10 = vsyncpa [#allocation4], 0  ;;  %s7939_s0 = inlined_call_operand.vmem [shape: f32[2,18,18,64], index: 0, kind: input, shape index: {}]   ;;  %s7940_s1 = inlined_call_operand.vmem [shape: f32[576,64], index: 1, kind: input, shape index: {}]   ;;  %s7941_s2 = inlined_call_operand.vmem [shape: f32[1,64], index: 2, kind: input, shape index: {}]   ;;  %s7942_s3 = inlined_call_operand.vmem [shape: f32[576,64], index: 3, kind: input, shape index: {}]   ;;  %s7943_s4 = inlined_call_operand.vmem [shape: f32[1,64], index: 4, kind: input, shape index: {}]   ;;  %s7944_s5 = inlined_call_operand.hbm [shape: f32[2,16,16,64], index: 5, kind: output, shape index: {}]  }
   0x1   :  { %12 = vsyncpa [#allocation4 + $0x1], 0  ;;  %s4716_s18 = smov 0   ;;  %s4718_s19 = smov 0  }
   0x2   :  { %s4720_s20 = smov 0   ;;  %s4722_s21 = smov 0  }
   0x3 LB: > { %s4737_s22 = sadd.s32 4294967295, %s4678_s21   ;;  %s3648_s23 = sadd.s32 4294967294, %s4678_s21   ;;  %s4678_s21 = sphi %s4722_s21, %s8434_s21   ;;  %s4674_s20 = sphi %s4720_s20, %s8433_s20   ;;  %s4670_s19 = sphi %s4718_s19, %s8432_s19   ;;  %s4666_s18 = sphi %s4716_s18, %s8431_s18  }
   0x4   : > { %s4741_s24 = sadd.s32 1, %s4678_s21   ;;  %s135_s25 = sadd.s32 1, %s4674_s20 }
   0x5   : > { %s132_s26 = ssub.s32 %s4678_s21, %s4741_s24  ;;  %p145_p0 = scmp.ne.s32.totalorder %s4674_s20, %s4670_s19 }
   0x6   : > { %p133_p1 = scmp.eq.s32.totalorder %s132_s26, 0  ;;  %p146_p2 = scmp.eq.s32.totalorder %s4737_s22, 1 }
   0x7   : > { %p151_p3 = scmp.ne.s32.totalorder %s4670_s19, %s4666_s18  ;;  %p152_p4 = scmp.eq.s32.totalorder %s3648_s23, 1 }
   0x8   : > { %s4752_s27 = scalar_select %p133_p1, %s4674_s20, %s135_s25  }
   0x9   : > { %p4754_p5 = por %p146_p2, %p145_p0  ;;  %p4758_p6 = por %p152_p4, %p151_p3 }
   0xa   : > { %p3651_p7 = scmp.ge.s32.totalorder %s4678_s21, 1  ;;  %p190_p8 = scmp.lt.s32.totalorder %s4678_s21, 3 }
   0xc   : > { %p191_p9 = pnand %p3651_p7, %p190_p8 }
   0xe   : > { %194 = sbr.rel (%p191_p9) target bundleno = 1611 (0x64b), region = 40 }
  0x15   : > { %p218_p10 = scmp.lt.s32.totalorder %s4737_s22, 1  ;;  %vm331_vm0 = vcmask 1046528   ;;  %s4680_s10 = smov 64   ;;  %v978_v60 = vld [vmem:[%s7940_s1] sm:$0xff]  ;;  %v7945_v61 = vmov 0.0|0.0   ;;  %v979_v62 = vld [vmem:[%s7940_s1 + $0x8] sm:$0xff] }
  0x16   : > { %3934 = vmatprep.subr.bf16.mxu0 %v7945_v61  ;;  %v3935_v63 = vpack.c.bf16 %v979_v62, %v978_v60  ;;  %v994_v62 = vld [vmem:[%s7940_s1 + $0x80] sm:$0xff]  ;;  %vm653_vm1 = vcmask 523264   ;;  %vm530_vm2 = vcmask 1045504   ;;  %vm1804_vm3 = vcmask 516096   ;;  %s215_s12 = sand.u32 1, %s4670_s19   ;;  %s4683_s26 = smov [#allocation3]  }
  0x17   : > { %s219_s30 = scalar_select %p218_p10, %s4737_s22, 1  ;;  %vm1798_vm4 = vcmask 517120  }
  0x18   : > { %3936 = vmatpush1.bf16.msra.mxu0 %v3935_v63  ;;  %v995_v63 = vld [vmem:[%s7940_s1 + $0x88] sm:$0xff]  ;;  %s3652_s13 = sshll.u32 %s215_s12, 8 }
  0x19   : > { %s4358_s6 = smul.u32 432, %s219_s30  ;;  %3937 = vmatprep.subr.bf16.mxu0 %v7945_v61  ;;  %s7742_s14 = scalar_lea.vmem [#allocation3], %s3652_s13 }
  0x1a   : > { %s3586_s15 = sshll.u32 %s7742_s14, 4  ;;  %s4620_s30 = sshll.u32 %s4683_s26, 4  ;;  %s7889_s15 = int_to_ptr.vmem [resolvable:$true] %s3586_s15  ;;  %s4621_s30 = int_to_ptr.vmem [resolvable:$false] %s4620_s30 }
  0x1b   : > { %s4769_s9 = scalar_lea.vmem %s7939_s0, %s4358_s6  ;;  %s4616_s25 = scalar_lea.vmem %s7889_s15, 4096 }
  0x1c   : > { %v4772_v0 = vld [vmem:[%s4769_s9 + $0x18] sm:$0xff]  ;;  %v4775_v1 = vld [vmem:[%s4769_s9 + $0x20] sm:$0xff]  ;;  %v4778_v2 = vld [vmem:[%s4769_s9 + $0x28] sm:$0x3]  ;;  %p4617_p11 = scmp.ne.s32.totalorder %s7889_s15, %s4616_s25  ;;  %s4622_s6 = scalar_lea.vmem %s4621_s30, 8192 }
  0x1d   : > { %v337_v3 = vrot.slane %v4772_v0, 1  ;;  %v338_v4 = vrot.slane %v4775_v1, 1  ;;  %v340_v5 = vrot.slane %v4778_v2, 1  ;;  %v4784_v6 = vld [vmem:[%s4769_s9 + $0x30] sm:$0xff]  ;;  %v4787_v7 = vld [vmem:[%s4769_s9 + $0x38] sm:$0xff]  ;;  %v4795_v11 = vld [vmem:[%s4769_s9 + $0x48] sm:$0xff]  ;;  %p4623_p0 = scmp.lt.s32.totalorder %s7889_s15, %s4621_s30  ;;  %p4624_p1 = scmp.lt.s32.totalorder %s4622_s6, %s4616_s25 }
  0x1e   : > { %v342_v8 = vrot.slane %v4784_v6, 1  ;;  %v343_v9 = vrot.slane %v4787_v7, 1  ;;  %v4792_v10 = vld [vmem:[%s4769_s9 + $0x40] sm:$0x3]  ;;  %v4798_v12 = vld [vmem:[%s4769_s9 + $0x50] sm:$0xff]  ;;  %v347_v18 = vrot.slane %v4795_v11, 1  ;;  %p4618_p12 = pnand %p4617_p11, %p4754_p5 }
  0x1f   : > { %v4801_v13 = vsel %vm331_vm0, %v337_v3, %v338_v4  ;;  %v345_v14 = vrot.slane %v4792_v10, 1  ;;  %v4805_v15 = vld [vmem:[%s4769_s9 + $0x58] sm:$0x3]  ;;  %v4813_v17 = vsel %vm331_vm0, %v338_v4, %v340_v5  ;;  %v348_v19 = vrot.slane %v4798_v12, 1  ;;  %v4824_v22 = vld [vmem:[%s4769_s9 + $0x60] sm:$0xff]  ;;  %v4827_v23 = vld [vmem:[%s4769_s9 + $0x68] sm:$0xff]  ;;  %p4625_p2 = por %p4624_p1, %p4623_p0 }
  0x20   : > { %8115 = vst [vmem:[#allocation6_spill] sm:$0xff] %v4801_v13  ;;  %426 = vrot.lane.b32.xlu0 %v4801_v13, %s4680_s10  ;;  %v4810_v16 = vsel %vm331_vm0, %v342_v8, %v343_v9  ;;  %8117 = vst [vmem:[#allocation8_spill] sm:$0xff] %v4813_v17  ;;  %v350_v21 = vrot.slane %v4805_v15, 1  ;;  %v4830_v24 = vld [vmem:[%s4769_s9 + $0x70] sm:$0x3]  ;;  %v352_v26 = vrot.slane %v4824_v22, 1  ;;  %p4619_p13 = pneg %p4618_p12 }
  0x21   : > { %8116 = vst [vmem:[#allocation7_spill] sm:$0xff] %v4810_v16  ;;  %430 = vrot.lane.b32.xlu1 %v4810_v16, %s4680_s10  ;;  %v4820_v20 = vsel %vm331_vm0, %v343_v9, %v345_v14  ;;  %v4837_v25 = vsel %vm331_vm0, %v347_v18, %v348_v19  ;;  %v353_v27 = vrot.slane %v4827_v23, 1  ;;  %v355_v29 = vrot.slane %v4830_v24, 1  ;;  %v4846_v30 = vld [vmem:[%s4769_s9 + $0x78] sm:$0xff]  ;;  %v4849_v31 = vld [vmem:[%s4769_s9 + $0x80] sm:$0xff]  ;;  %v4865_v37 = vld [vmem:[%s4769_s9 + $0x90] sm:$0xff] }
  0x22   : > { %8118 = vst [vmem:[#allocation9_spill] sm:$0xff] %v4820_v20  ;;  %8119 = vst [vmem:[#allocation10_spill] sm:$0xff] %v4837_v25  ;;  %v4842_v28 = vsel %vm331_vm0, %v348_v19, %v350_v21  ;;  %v4852_v32 = vld [vmem:[%s4769_s9 + $0x88] sm:$0x3]  ;;  %v357_v34 = vrot.slane %v4846_v30, 1  ;;  %v358_v35 = vrot.slane %v4849_v31, 1  ;;  %p4626_p3 = pnand %p4625_p2, %p4619_p13 }
  0x23   : > { %8120 = vst [vmem:[#allocation11_spill] sm:$0xff] %v4842_v28  ;;  %v4859_v33 = vsel %vm331_vm0, %v352_v26, %v353_v27  ;;  %v360_v36 = vrot.slane %v4852_v32, 1  ;;  %v4868_v38 = vsel %vm331_vm0, %v353_v27, %v355_v29  ;;  %v4871_v39 = vld [vmem:[%s4769_s9 + $0x98] sm:$0xff]  ;;  %v4874_v40 = vld [vmem:[%s4769_s9 + $0xa0] sm:$0x3]  ;;  %v4877_v41 = vld [vmem:[%s4769_s9 + $0xb0] sm:$0xff] }
  0x24   : > { %428 = vrot.lane.b32.xlu0 %v4813_v17, %s4680_s10  ;;  %8121 = vst [vmem:[#allocation12_spill] sm:$0xff] %v4859_v33  ;;  %8122 = vst [vmem:[#allocation13_spill] sm:$0xff] %v4868_v38  ;;  %v4880_v42 = vld [vmem:[%s4769_s9 + $0xb8] sm:$0x3]  ;;  %v4883_v43 = vld [vmem:[%s4769_s9 + $0xc0] sm:$0xff]  ;;  %v362_v45 = vrot.slane %v4865_v37, 1  ;;  %v4894_v46 = vsel %vm331_vm0, %v357_v34, %v358_v35 }
  0x25   : > { %432 = vrot.lane.b32.xlu1 %v4820_v20, %s4680_s10  ;;  %8123 = vst [vmem:[#allocation14_spill] sm:$0xff] %v4880_v42  ;;  %8124 = vst [vmem:[#allocation15_spill] sm:$0xff] %v4883_v43  ;;  %v4886_v44 = vld [vmem:[%s4769_s9 + $0xc8] sm:$0xff]  ;;  %v4897_v47 = vsel %vm331_vm0, %v358_v35, %v360_v36  ;;  %v363_v48 = vrot.slane %v4871_v39, 1  ;;  %v365_v49 = vrot.slane %v4874_v40, 1  ;;  %v368_v51 = vrot.slane %v4877_v41, 1 }
  0x26   : > { %8125 = vst [vmem:[#allocation16_spill] sm:$0xff] %v4894_v46  ;;  %8126 = vst [vmem:[#allocation17_spill] sm:$0xff] %v4897_v47  ;;  %v4902_v50 = vld [vmem:[%s4769_s9 + $0xa8] sm:$0xff]  ;;  %v370_v52 = vrot.slane %v4880_v42, 1  ;;  %v372_v53 = vrot.slane %v4883_v43, 1  ;;  %v373_v54 = vrot.slane %v4886_v44, 1 }
  0x27   : > { %v4913_v55 = vsel %vm331_vm0, %v362_v45, %v363_v48  ;;  %v367_v56 = vrot.slane %v4902_v50, 1  ;;  %v4917_v57 = vsel %vm331_vm0, %v363_v48, %v365_v49  ;;  %v980_v5 = vld [vmem:[%s7940_s1 + $0x10] sm:$0xff]  ;;  %v981_v8 = vld [vmem:[%s7940_s1 + $0x18] sm:$0xff]  ;;  %v982_v14 = vld [vmem:[%s7940_s1 + $0x20] sm:$0xff] }
  0x28   : > { %434 = vrot.lane.b32.xlu0 %v4837_v25, %s4680_s10  ;;  %8127 = vst [vmem:[#allocation18_spill] sm:$0xff] %v4913_v55  ;;  %8128 = vst [vmem:[#allocation19_spill] sm:$0xff] %v4917_v57  ;;  %v4920_v58 = vsel %vm331_vm0, %v368_v51, %v370_v52  ;;  %v4925_v59 = vsel %vm331_vm0, %v372_v53, %v373_v54  ;;  %v3938_v9 = vpack.c.bf16 %v981_v8, %v980_v5  ;;  %v983_v18 = vld [vmem:[%s7940_s1 + $0x28] sm:$0xff]  ;;  %v984_v21 = vld [vmem:[%s7940_s1 + $0x30] sm:$0xff] }
  0x29   : > { %436 = vrot.lane.b32.xlu1 %v4842_v28, %s4680_s10  ;;  %8129 = vst [vmem:[#allocation20_spill] sm:$0xff] %v4920_v58  ;;  %8130 = vst [vmem:[#allocation21_spill] sm:$0xff] %v4925_v59  ;;  %v4939_v3 = vsel %vm331_vm0, %v367_v56, %v368_v51  ;;  %v4403_v4 = vpack.i.bf16 %v4925_v59, %v4920_v58  ;;  %v3941_v19 = vpack.c.bf16 %v983_v18, %v982_v14  ;;  %v985_v26 = vld [vmem:[%s7940_s1 + $0x38] sm:$0xff]  ;;  %v986_v29 = vld [vmem:[%s7940_s1 + $0x40] sm:$0xff] }
  0x2a   : > { %8131 = vst [vmem:[#allocation22_spill] sm:$0xff] %v4939_v3  ;;  %3939 = vmatpush1.bf16.msra.mxu0 %v3938_v9  ;;  %v3944_v27 = vpack.c.bf16 %v985_v26, %v984_v21  ;;  %v987_v34 = vld [vmem:[%s7940_s1 + $0x48] sm:$0xff]  ;;  %v988_v36 = vld [vmem:[%s7940_s1 + $0x50] sm:$0xff]  ;;  %v989_v45 = vld [vmem:[%s7940_s1 + $0x58] sm:$0xff] }
  0x2b   : > { %3940 = vmatprep.subr.bf16.mxu0 %v7945_v61  ;;  %v3947_v35 = vpack.c.bf16 %v987_v34, %v986_v29  ;;  %v3950_v48 = vpack.c.bf16 %v989_v45, %v988_v36  ;;  %v990_v49 = vld [vmem:[%s7940_s1 + $0x60] sm:$0xff]  ;;  %v991_v51 = vld [vmem:[%s7940_s1 + $0x68] sm:$0xff]  ;;  %v992_v53 = vld [vmem:[%s7940_s1 + $0x70] sm:$0xff] }
  0x2c   : > { %438 = vrot.lane.b32.xlu0 %v4859_v33, %s4680_s10  ;;  %v3953_v52 = vpack.c.bf16 %v991_v51, %v990_v49  ;;  %v993_v56 = vld [vmem:[%s7940_s1 + $0x78] sm:$0xff]  ;;  %v996_v5 = vld [vmem:[%s7940_s1 + $0x90] sm:$0xff]  ;;  %v998_v14 = vld [vmem:[%s7940_s1 + $0xa0] sm:$0xff] }
  0x2d   : > { %440 = vrot.lane.b32.xlu1 %v4868_v38, %s4680_s10  ;;  %v3956_v60 = vpack.c.bf16 %v993_v56, %v992_v53  ;;  %v997_v8 = vld [vmem:[%s7940_s1 + $0x98] sm:$0xff]  ;;  %v999_v18 = vld [vmem:[%s7940_s1 + $0xa8] sm:$0xff]  ;;  %v1000_v21 = vld [vmem:[%s7940_s1 + $0xb0] sm:$0xff] }
  0x2e   : > { %3942 = vmatpush1.bf16.msra.mxu0 %v3941_v19  ;;  %v3962_v9 = vpack.c.bf16 %v997_v8, %v996_v5  ;;  %v3965_v19 = vpack.c.bf16 %v999_v18, %v998_v14  ;;  %v1001_v26 = vld [vmem:[%s7940_s1 + $0xb8] sm:$0xff]  ;;  %v1002_v29 = vld [vmem:[%s7940_s1 + $0xc0] sm:$0xff]  ;;  %v1003_v34 = vld [vmem:[%s7940_s1 + $0xc8] sm:$0xff] }
  0x2f   : > { %3943 = vmatprep.subr.bf16.mxu0 %v7945_v61  ;;  %v1004_v36 = vld [vmem:[%s7940_s1 + $0xd0] sm:$0xff]  ;;  %v1005_v45 = vld [vmem:[%s7940_s1 + $0xd8] sm:$0xff]  ;;  %v1006_v49 = vld [vmem:[%s7940_s1 + $0xe0] sm:$0xff] }
  0x30   : > { %442 = vrot.lane.b32.xlu0 %v4894_v46, %s4680_s10  ;;  %v1007_v51 = vld [vmem:[%s7940_s1 + $0xe8] sm:$0xff]  ;;  %v1008_v53 = vld [vmem:[%s7940_s1 + $0xf0] sm:$0xff]  ;;  %v1009_v56 = vld [vmem:[%s7940_s1 + $0xf8] sm:$0xff] }
  0x31   : > { %444 = vrot.lane.b32.xlu1 %v4897_v47, %s4680_s10  ;;  %v5062_v5 = vld [vmem:[%s4769_s9 + $0xd8] sm:$0xff]  ;;  %v5065_v8 = vld [vmem:[%s4769_s9 + $0xe0] sm:$0xff]  ;;  %v5070_v18 = vld [vmem:[%s4769_s9 + $0xd0] sm:$0x3]  ;;  %v542_v47 = vrot.slane %v4787_v7, 2 }
  0x32   : > { %3945 = vmatpush1.bf16.msra.mxu0 %v3944_v27  ;;  %v3968_v27 = vpack.c.bf16 %v1001_v26, %v1000_v21  ;;  %8132 = vst [vmem:[#allocation23_spill] sm:$0xff] %v5070_v18  ;;  %v377_v21 = vrot.slane %v5062_v5, 1  ;;  %v378_v26 = vrot.slane %v5065_v8, 1  ;;  %v5172_v28 = vld [vmem:[%s4769_s9 + $0x130] sm:$0x3] }
  0x33   : > { %3946 = vmatprep.subr.bf16.mxu0 %v7945_v61  ;;  %8145 = vst [vmem:[#allocation36_spill] sm:$0xff] %v5172_v28  ;;  %v5209_v16 = vld [vmem:[%s4769_s9 + $0x148] sm:$0x3]  ;;  %v5216_v17 = vld [vmem:[%s4769_s9 + $0x150] sm:$0xff] }
  0x34   : > { %446 = vrot.lane.b32.xlu0 %v4913_v55, %s4680_s10  ;;  %8148 = vst [vmem:[#allocation39_spill] sm:$0xff] %v5209_v16  ;;  %v400_v13 = vrot.slane %v5209_v16, 1  ;;  %v5251_v16 = vld [vmem:[%s4769_s9 + $0x170] sm:$0xff] }
  0x35   : > { %448 = vrot.lane.b32.xlu1 %v4917_v57, %s4680_s10  ;;  %v5120_v57 = vld [vmem:[%s4769_s9 + $0x118] sm:$0x3] }
  0x36   : > { %3948 = vmatpush1.bf16.msra.mxu0 %v3947_v35  ;;  %v3971_v35 = vpack.c.bf16 %v1003_v34, %v1002_v29  ;;  %v5079_v29 = vld [vmem:[%s4769_s9 + $0xf0] sm:$0xff]  ;;  %v5082_v34 = vld [vmem:[%s4769_s9 + $0xf8] sm:$0xff]  ;;  %8138 = vst [vmem:[#allocation29_spill] sm:$0xff] %v5120_v57  ;;  %v390_v46 = vrot.slane %v5120_v57, 1 }
  0x37   : > { %3949 = vmatprep.subr.bf16.mxu0 %v7945_v61 }
  0x38   : > { %450 = vrot.lane.b32.xlu0 %v4939_v3, %s4680_s10 }
  0x39   : > { %4404 = vrot.lane.b32.xlu1 %v4403_v4, %s4680_s10  ;;  %v3959_v4 = vpack.c.bf16 %v995_v63, %v994_v62  ;;  %v5052_v62 = vld [vmem:[%s4769_s9] sm:$0xff]  ;;  %v5055_v63 = vld [vmem:[%s4769_s9 + $0x8] sm:$0xff] }
  0x3a   : > { %3951 = vmatpush1.bf16.msra.mxu0 %v3950_v48  ;;  %v3974_v48 = vpack.c.bf16 %v1005_v45, %v1004_v36  ;;  %v333_v14 = vrot.slane %v5055_v63, 1  ;;  %v375_v36 = vrot.slane %v5070_v18, 1 }
  0x3b   : > { %3952 = vmatprep.subr.bf16.mxu0 %v7945_v61 }
  0x3e   : > { %3954 = vmatpush1.bf16.msra.mxu0 %v3953_v52  ;;  %v3977_v52 = vpack.c.bf16 %v1007_v51, %v1006_v49 }
  0x3f   : > { %3955 = vmatprep.subr.bf16.mxu0 %v7945_v61 }
  0x42   : > { %3957 = vmatpush1.bf16.msra.mxu0 %v3956_v60  ;;  %v3980_v60 = vpack.c.bf16 %v1009_v56, %v1008_v53  ;;  %v5093_v53 = vsel %vm331_vm0, %v377_v21, %v378_v26  ;;  %v382_v56 = vrot.slane %v5079_v29, 1 }
  0x43   : > { %3958 = vmatprep.subr.bf16.mxu0 %v7945_v61  ;;  %8134 = vst [vmem:[#allocation25_spill] sm:$0xff] %v5093_v53 }
  0x46   : > { %3960 = vmatpush1.bf16.msra.mxu0 %v3959_v4  ;;  %v5058_v4 = vld [vmem:[%s4769_s9 + $0x10] sm:$0x3] }
  0x47   : > { %3961 = vmatprep.subr.bf16.mxu0 %v7945_v61 }
  0x4a   : > { %3963 = vmatpush1.bf16.msra.mxu0 %v3962_v9  ;;  %v332_v9 = vrot.slane %v5052_v62, 1 }
  0x4b   : > { %3964 = vmatprep.subr.bf16.mxu0 %v7945_v61 }
  0x4e   : > { %3966 = vmatpush1.bf16.msra.mxu0 %v3965_v19  ;;  %v335_v19 = vrot.slane %v5058_v4, 1 }
  0x4f   : > { %3967 = vmatprep.subr.bf16.mxu0 %v7945_v61 }
  0x52   : > { %3969 = vmatpush1.bf16.msra.mxu0 %v3968_v27  ;;  %v5076_v27 = vld [vmem:[%s4769_s9 + $0xe8] sm:$0x3] }
  0x53   : > { %3970 = vmatprep.subr.bf16.mxu0 %v7945_v61  ;;  %8133 = vst [vmem:[#allocation24_spill] sm:$0xff] %v5076_v27  ;;  %v380_v49 = vrot.slane %v5076_v27, 1 }
  0x55   : > { %v5115_v58 = vsel %vm331_vm0, %v378_v26, %v380_v49  ;;  %v5135_v49 = vld [vmem:[%s4769_s9 + $0x120] sm:$0xff] }
  0x56   : > { %3972 = vmatpush1.bf16.msra.mxu0 %v3971_v35  ;;  %v334_v35 = vsel %vm331_vm0, %v332_v9, %v333_v14  ;;  %v5098_v9 = vld [vmem:[%s4769_s9 + $0x100] sm:$0x3]  ;;  %8137 = vst [vmem:[#allocation28_spill] sm:$0xff] %v5115_v58 }
  0x57   : > { %3973 = vmatprep.subr.bf16.mxu0 %v7945_v61  ;;  %8135 = vst [vmem:[#allocation26_spill] sm:$0xff] %v5098_v9  ;;  %v385_v3 = vrot.slane %v5098_v9, 1 }
  0x5a   : > { %3975 = vmatpush1.bf16.msra.mxu0 %v3974_v48  ;;  %v336_v48 = vsel %vm331_vm0, %v333_v14, %v335_v19  ;;  %v5105_v19 = vld [vmem:[%s4769_s9 + $0x110] sm:$0xff] }
  0x5b   : > { %3976 = vmatprep.subr.bf16.mxu0 %v7945_v61  ;;  %v4418_v59 = vpack.i.bf16 %v5093_v53, %v336_v48  ;;  %v388_v26 = vrot.slane %v5105_v19, 1 }
  0x5e   : > { %3978 = vmatpush1.bf16.msra.mxu0 %v3977_v52 }
  0x5f   : > { %3979 = vmatprep.subr.bf16.mxu0 %v7945_v61 }
  0x62   : > { %3981 = vmatpush1.bf16.msra.mxu0 %v3980_v60  ;;  %v383_v60 = vrot.slane %v5082_v34, 1 }
  0x63   : > { %3982 = vmatprep.subr.bf16.mxu0 %v7945_v61  ;;  %v5101_v61 = vld [vmem:[%s4769_s9 + $0x108] sm:$0xff] }
  0x64   : > { %v5131_v48 = vsel %vm331_vm0, %v382_v56, %v383_v60  ;;  %v544_v56 = vrot.slane %v4792_v10, 2  ;;  %v5165_v33 = vsel %vm331_vm0, %v383_v60, %v385_v3 }
  0x65   : > { %8140 = vst [vmem:[#allocation31_spill] sm:$0xff] %v5131_v48  ;;  %8143 = vst [vmem:[#allocation34_spill] sm:$0xff] %v5165_v33 }
  0x66   : > { %v5187_v3 = vsel %vm530_vm2, %v542_v47, %v544_v56 }
  0x92   : > { %v427_v45 = vpop.permute.xlu0 %426 }
  0x93   : > { %v5090_v51 = vsel %vm653_vm1, %v4772_v0, %v427_v45  ;;  %v431_v52 = vpop.permute.xlu1 %430  ;;  %v5110_v45 = vsel %vm331_vm0, %v373_v54, %v375_v36 }
  0x94   : > { %v4408_v14 = vpack.i.bf16 %v334_v35, %v5090_v51  ;;  %8136 = vst [vmem:[#allocation27_spill] sm:$0xff] %v5110_v45  ;;  %v387_v35 = vrot.slane %v5101_v61, 1  ;;  %v5128_v54 = vsel %vm653_vm1, %v4784_v6, %v431_v52  ;;  %v541_v52 = vrot.slane %v4784_v6, 2 }
  0x95   : > { %8139 = vst [vmem:[#allocation30_spill] sm:$0xff] %v5128_v54 }
  0x96   : > { %v429_v21 = vpop.permute.xlu0 %428  ;;  %4409 = vrot.lane.b32.xlu0 %v4408_v14, %s4680_s10  ;;  %v5158_v10 = vsel %vm530_vm2, %v541_v52, %v542_v47  ;;  %v5184_v52 = vld [vmem:[%s4769_s9 + $0x140] sm:$0xff] }
  0x97   : > { %v5124_v55 = vsel %vm653_vm1, %v4775_v1, %v429_v21  ;;  %v433_v36 = vpop.permute.xlu1 %432  ;;  %v5144_v21 = vld [vmem:[%s4769_s9 + $0x128] sm:$0xff]  ;;  %3822 = vmatprep.mubr.msk.f32.mxu1 %vm653_vm1, %v5158_v10 }
  0x98   : > { %v4413_v14 = vpack.i.bf16 %v5124_v55, %v5110_v45  ;;  %v5141_v53 = vsel %vm653_vm1, %v4787_v7, %v433_v36  ;;  %v4423_v36 = vpack.i.bf16 %v5115_v58, %v5128_v54  ;;  %v392_v7 = vrot.slane %v5135_v49, 1 }
  0x99   : > { %8141 = vst [vmem:[#allocation32_spill] sm:$0xff] %v5141_v53  ;;  %v4428_v6 = vpack.i.bf16 %v5131_v48, %v5141_v53  ;;  %v393_v58 = vrot.slane %v5144_v21, 1  ;;  %v5175_v48 = vld [vmem:[%s4769_s9 + $0x138] sm:$0xff] }
  0x9a   : > { %4414 = vrot.lane.b32.xlu1 %v4413_v14, %s4680_s10  ;;  %4419 = vrot.lane.b32.xlu0 %v4418_v59, %s4680_s10  ;;  %v435_v45 = vpop.permute.xlu0 %434  ;;  %v5168_v59 = vsel %vm331_vm0, %v387_v35, %v388_v26  ;;  %v397_v20 = vrot.slane %v5175_v48, 1 }
  0x9b   : > { %v5162_v38 = vsel %vm653_vm1, %v4795_v11, %v435_v45  ;;  %v437_v14 = vpop.permute.xlu1 %436  ;;  %8144 = vst [vmem:[#allocation35_spill] sm:$0xff] %v5168_v59 }
  0x9c   : > { %8142 = vst [vmem:[#allocation33_spill] sm:$0xff] %v5162_v38  ;;  %v5181_v45 = vsel %vm653_vm1, %v4798_v12, %v437_v14  ;;  %v4433_v60 = vpack.i.bf16 %v5165_v33, %v5162_v38  ;;  %v395_v14 = vrot.slane %v5172_v28, 1  ;;  %v398_v33 = vrot.slane %v5184_v52, 1 }
  0x9d   : > { %v4438_v25 = vpack.i.bf16 %v5168_v59, %v5181_v45 }
  0x9e   : > { %4424 = vrot.lane.b32.xlu1 %v4423_v36, %s4680_s10  ;;  %4429 = vrot.lane.b32.xlu0 %v4428_v6, %s4680_s10  ;;  %v439_v35 = vpop.permute.xlu0 %438  ;;  %v5202_v36 = vsel %vm331_vm0, %v388_v26, %v390_v46  ;;  %v5205_v6 = vsel %vm331_vm0, %v392_v7, %v393_v58  ;;  %v5264_v18 = vsel %vm331_vm0, %v398_v33, %v400_v13 }
  0x9f   : > { %v5199_v47 = vsel %vm653_vm1, %v4824_v22, %v439_v35  ;;  %v441_v56 = vpop.permute.xlu1 %440  ;;  %8146 = vst [vmem:[#allocation37_spill] sm:$0xff] %v5202_v36  ;;  %8147 = vst [vmem:[#allocation38_spill] sm:$0xff] %v5205_v6  ;;  %v5219_v35 = vld [vmem:[%s4769_s9 + $0x158] sm:$0xff] }
  0xa0   : > { %v5213_v59 = vsel %vm653_vm1, %v4827_v23, %v441_v56  ;;  %v4443_v46 = vpack.i.bf16 %v5202_v36, %v5199_v47  ;;  %v5228_v56 = vsel %vm331_vm0, %v393_v58, %v395_v14  ;;  %v403_v36 = vrot.slane %v5219_v35, 1  ;;  %v5245_v58 = vld [vmem:[%s4769_s9 + $0x160] sm:$0x3]  ;;  %v5248_v14 = vld [vmem:[%s4769_s9 + $0x168] sm:$0xff]  ;;  %8155 = vst [vmem:[#allocation46_spill] sm:$0xff] %v5264_v18 }
  0xa1   : > { %v4448_v7 = vpack.i.bf16 %v5205_v6, %v5213_v59  ;;  %8149 = vst [vmem:[#allocation40_spill] sm:$0xff] %v5228_v56  ;;  %8153 = vst [vmem:[#allocation44_spill] sm:$0xff] %v5245_v58 }
  0xa2   : > { %4434 = vrot.lane.b32.xlu1 %v4433_v60, %s4680_s10  ;;  %4439 = vrot.lane.b32.xlu0 %v4438_v25, %s4680_s10  ;;  %v443_v26 = vpop.permute.xlu0 %442  ;;  %v5236_v60 = vsel %vm331_vm0, %v397_v20, %v398_v33  ;;  %v402_v25 = vrot.slane %v5216_v17, 1 }
  0xa3   : > { %v5233_v28 = vsel %vm653_vm1, %v4846_v30, %v443_v26  ;;  %v445_v57 = vpop.permute.xlu1 %444  ;;  %8151 = vst [vmem:[#allocation42_spill] sm:$0xff] %v5236_v60 }
  0xa4   : > { %8150 = vst [vmem:[#allocation41_spill] sm:$0xff] %v5233_v28  ;;  %v5242_v6 = vsel %vm653_vm1, %v4849_v31, %v445_v57  ;;  %v4453_v20 = vpack.i.bf16 %v5228_v56, %v5233_v28  ;;  %v5267_v42 = vsel %vm331_vm0, %v402_v25, %v403_v36  ;;  %v407_v56 = vrot.slane %v5248_v14, 1 }
  0xa5   : > { %8152 = vst [vmem:[#allocation43_spill] sm:$0xff] %v5242_v6  ;;  %v4458_v9 = vpack.i.bf16 %v5236_v60, %v5242_v6  ;;  %8156 = vst [vmem:[#allocation47_spill] sm:$0xff] %v5267_v42  ;;  %v408_v60 = vrot.slane %v5251_v16, 1  ;;  %v5277_v6 = vld [vmem:[%s4769_s9 + $0x178] sm:$0x3] }
  0xa6   : > { %4444 = vrot.lane.b32.xlu1 %v4443_v46, %s4680_s10  ;;  %4449 = vrot.lane.b32.xlu0 %v4448_v7, %s4680_s10  ;;  %v447_v26 = vpop.permute.xlu0 %446  ;;  %v405_v46 = vrot.slane %v5245_v58, 1  ;;  %8158 = vst [vmem:[#allocation49_spill] sm:$0xff] %v5277_v6  ;;  %v410_v28 = vrot.slane %v5277_v6, 1 }
  0xa7   : > { %v5261_v57 = vsel %vm653_vm1, %v4865_v37, %v447_v26  ;;  %v449_v27 = vpop.permute.xlu1 %448 }
  0xa8   : > { %8154 = vst [vmem:[#allocation45_spill] sm:$0xff] %v5261_v57  ;;  %v5272_v7 = vsel %vm653_vm1, %v4871_v39, %v449_v27  ;;  %v4463_v13 = vpack.i.bf16 %v5264_v18, %v5261_v57  ;;  %v5290_v58 = vsel %vm331_vm0, %v403_v36, %v405_v46  ;;  %v5294_v18 = vsel %vm331_vm0, %v407_v56, %v408_v60 }
  0xa9   : > { %8157 = vst [vmem:[#allocation48_spill] sm:$0xff] %v5272_v7  ;;  %v4468_v25 = vpack.i.bf16 %v5267_v42, %v5272_v7  ;;  %8160 = vst [vmem:[#allocation51_spill] sm:$0xff] %v5290_v58 }
  0xaa   : > { %4454 = vrot.lane.b32.xlu1 %v4453_v20, %s4680_s10  ;;  %4459 = vrot.lane.b32.xlu0 %v4458_v9, %s4680_s10  ;;  %v451_v33 = vpop.permute.xlu0 %450  ;;  %8161 = vst [vmem:[#allocation52_spill] sm:$0xff] %v5294_v18 }
  0xab   : > { %v5287_v27 = vsel %vm653_vm1, %v4902_v50, %v451_v33  ;;  %v4405_v26 = vpop.permute.xlu1 %4404 }
  0xac   : > { %8159 = vst [vmem:[#allocation50_spill] sm:$0xff] %v5287_v27  ;;  %v4407_v20 = vunpack.i.h.bf16 %v4405_v26  ;;  %v4406_v9 = vunpack.i.l.bf16 %v4405_v26  ;;  %v4473_v33 = vpack.i.bf16 %v5290_v58, %v5287_v27  ;;  %v5307_v26 = vsel %vm331_vm0, %v408_v60, %v410_v28  ;;  %v5324_v28 = vld [vmem:[%s4769_s9 + $0x188] sm:$0xff]  ;;  %v5327_v60 = vld [vmem:[%s4769_s9 + $0x190] sm:$0x3] }
  0xad   : > { %8163 = vst [vmem:[#allocation54_spill] sm:$0xff] %v5307_v26  ;;  %8166 = vst [vmem:[#allocation57_spill] sm:$0xff] %v5324_v28  ;;  %v413_v58 = vrot.slane %v5324_v28, 1  ;;  %v415_v6 = vrot.slane %v5327_v60, 1  ;;  %v539_v28 = vrot.slane %v4778_v2, 2 }
  0xae   : > { %4464 = vrot.lane.b32.xlu1 %v4463_v13, %s4680_s10  ;;  %4469 = vrot.lane.b32.xlu0 %v4468_v25, %s4680_s10  ;;  %v5302_v36 = vsel %vm653_vm1, %v4877_v41, %v4406_v9  ;;  %v5311_v56 = vsel %vm653_vm1, %v4883_v43, %v4407_v20  ;;  %v531_v25 = vrot.slane %v5052_v62, 2  ;;  %v532_v9 = vrot.slane %v5055_v63, 2  ;;  %8167 = vst [vmem:[#allocation58_spill] sm:$0xff] %v5327_v60 }
  0xaf   : > { %8162 = vst [vmem:[#allocation53_spill] sm:$0xff] %v5302_v36  ;;  %v4478_v46 = vpack.i.bf16 %v5294_v18, %v5302_v36  ;;  %8164 = vst [vmem:[#allocation55_spill] sm:$0xff] %v5311_v56  ;;  %v4483_v13 = vpack.i.bf16 %v5307_v26, %v5311_v56  ;;  %v5321_v18 = vld [vmem:[%s4769_s9 + $0x180] sm:$0xff]  ;;  %v534_v26 = vrot.slane %v5058_v4, 2  ;;  %v536_v36 = vrot.slane %v4772_v0, 2 }
  0xb0   : > { %8165 = vst [vmem:[#allocation56_spill] sm:$0xff] %v5321_v18  ;;  %v533_v20 = vsel %vm530_vm2, %v531_v25, %v532_v9  ;;  %v412_v42 = vrot.slane %v5321_v18, 1  ;;  %v537_v43 = vrot.slane %v4775_v1, 2  ;;  %v5359_v1 = vsel %vm331_vm0, %v413_v58, %v415_v6 }
  0xb1   : > { %v535_v57 = vsel %vm530_vm2, %v532_v9, %v534_v26  ;;  %8171 = vst [vmem:[#allocation62_spill] sm:$0xff] %v5359_v1  ;;  %v8172_v26 = vmov 0.0|0.0  }
  0xb2   : > { %4474 = vrot.lane.b32.xlu1 %v4473_v33, %s4680_s10  ;;  %4479 = vrot.lane.b32.xlu0 %v4478_v46, %s4680_s10  ;;  %v1010_v33 = vld [vmem:[%s7940_s1 + $0x100] sm:$0xff]  ;;  %v1011_v46 = vld [vmem:[%s7940_s1 + $0x108] sm:$0xff]  ;;  %v5356_v0 = vsel %vm331_vm0, %v412_v42, %v413_v58  ;;  %v5364_v2 = vsel %vm530_vm2, %v536_v36, %v537_v43 }
  0xb3   : > { %v3983_v27 = vpack.c.bf16 %v1011_v46, %v1010_v33  ;;  %8170 = vst [vmem:[#allocation61_spill] sm:$0xff] %v5356_v0  ;;  %v1013_v42 = vld [vmem:[%s7940_s1 + $0x118] sm:$0xff] }
  0xb6   : > { %4484 = vrot.lane.b32.xlu1 %v4483_v13, %s4680_s10 }
 0x108   : > { %v5336_v13 = vpop.permute.xlu0 %4409 }
 0x109   : > { %8168 = vst [vmem:[#allocation59_spill] sm:$0xff] %v5336_v13  ;;  %v4412_v25 = vunpack.i.h.bf16 %v5336_v13  ;;  %v8009_v56 = vunpack.i.l.bf16 %v5336_v13 }
 0x10b   : > { %v946_v7 = vsel %vm653_vm1, %v533_v20, %v8009_v56  ;;  %v654_v4 = vsel %vm653_vm1, %v5052_v62, %v4412_v25  ;;  %v5395_v25 = vsel %vm530_vm2, %v537_v43, %v539_v28  ;;  %v546_v56 = vrot.slane %v4795_v11, 2 }
 0x10c   : > { %v5352_v18 = vpop.permute.xlu1 %4414  ;;  %v4420_v60 = vpop.permute.xlu0 %4419  ;;  %1185 = vmatprep.mubr.f32.mxu0 %v946_v7  ;;  %v1012_v7 = vld [vmem:[%s7940_s1 + $0x110] sm:$0xff] }
 0x10d   : > { %8169 = vst [vmem:[#allocation60_spill] sm:$0xff] %v5352_v18  ;;  %v8008_v33 = vunpack.i.h.bf16 %v5352_v18  ;;  %v4416_v20 = vunpack.i.l.bf16 %v5352_v18  ;;  %v4422_v46 = vunpack.i.h.bf16 %v4420_v60  ;;  %v4421_v62 = vunpack.i.l.bf16 %v4420_v60  ;;  %1186 = vmatmul.mubr.f32.vlgmr.msra.gmra.mrb[0].mxu0 %v654_v4 }
 0x10e   : > { %3984 = vmatpush1.bf16.msra.mxu0 %v3983_v27  ;;  %v3986_v4 = vpack.c.bf16 %v1013_v42, %v1012_v7  ;;  %v552_v18 = vrot.slane %v4827_v23, 2 }
 0x10f   : > { %v947_v6 = vsel %vm653_vm1, %v535_v57, %v8008_v33  ;;  %v655_v58 = vsel %vm653_vm1, %v5055_v63, %v4421_v62  ;;  %v5379_v36 = vsel %vm653_vm1, %v4886_v44, %v4416_v20  ;;  %v5383_v27 = vsel %vm653_vm1, %v5062_v5, %v4422_v46  ;;  %3985 = vmatprep.subr.bf16.mxu0 %v8172_v26 }
 0x110   : > { %v5386_v9 = vpop.permute.xlu1 %4424  ;;  %1190 = vmatprep.mubr.f32.mxu0 %v947_v6  ;;  %v4488_v60 = vpack.i.bf16 %v5356_v0, %v5379_v36  ;;  %v4493_v57 = vpack.i.bf16 %v5359_v1, %v5383_v27  ;;  %v5392_v63 = vpop.permute.xlu0 %4429 }
 0x111   : > { %8173 = vst [vmem:[#allocation63_spill] sm:$0xff] %v5386_v9  ;;  %8174 = vst [vmem:[#allocation64_spill] sm:$0xff] %v5392_v63  ;;  %v4427_v20 = vunpack.i.h.bf16 %v5386_v9  ;;  %v8007_v46 = vunpack.i.l.bf16 %v5386_v9  ;;  %1191 = vmatmul.mubr.f32.gmra.mrb[2].mxu0 %v655_v58  ;;  %v4432_v62 = vunpack.i.h.bf16 %v5392_v63  ;;  %v8006_v6 = vunpack.i.l.bf16 %v5392_v63 }
 0x112   : > { %4489 = vrot.lane.b32.xlu0 %v4488_v60, %s4680_s10  ;;  %4494 = vrot.lane.b32.xlu1 %v4493_v57, %s4680_s10  ;;  %v551_v9 = vrot.slane %v4824_v22, 2  ;;  %v554_v22 = vrot.slane %v4830_v24, 2 }
 0x113   : > { %v948_v43 = vsel %vm653_vm1, %v5364_v2, %v8007_v46  ;;  %v949_v28 = vsel %vm653_vm1, %v5395_v25, %v8006_v6  ;;  %v5413_v7 = vsel %vm653_vm1, %v5065_v8, %v4427_v20  ;;  %3987 = vmatpush1.bf16.msra.mxu0 %v3986_v4  ;;  %v5421_v60 = vsel %vm653_vm1, %v5079_v29, %v4432_v62  ;;  %v1014_v4 = vld [vmem:[%s7940_s1 + $0x120] sm:$0xff]  ;;  %v1015_v62 = vld [vmem:[%s7940_s1 + $0x128] sm:$0xff] }
 0x114   : > { %1195 = vmatprep.mubr.f32.mxu0 %v948_v43  ;;  %v5415_v42 = vpop.permute.xlu1 %4434  ;;  %v5417_v58 = vpop.permute.xlu0 %4439  ;;  %3988 = vmatprep.subr.bf16.mxu0 %v8172_v26 }
 0x115   : > { %8175 = vst [vmem:[#allocation65_spill] sm:$0xff] %v5415_v42  ;;  %8176 = vst [vmem:[#allocation66_spill] sm:$0xff] %v5417_v58  ;;  %1196 = vmatmul.mubr.f32.gmra.mrb[4].mxu0 %v5090_v51  ;;  %v4437_v57 = vunpack.i.h.bf16 %v5415_v42  ;;  %v8011_v6 = vunpack.i.l.bf16 %v5415_v42  ;;  %v4442_v20 = vunpack.i.h.bf16 %v5417_v58  ;;  %v547_v51 = vrot.slane %v4798_v12, 2 }
 0x116   : > { %1200 = vmatprep.mubr.f32.mxu0 %v949_v28  ;;  %790 = vrot.lane.b32.xlu0 %v5413_v7, %s4680_s10  ;;  %v549_v42 = vrot.slane %v4805_v15, 2  ;;  %v8179_v12 = vunpack.i.l.bf16 %v5417_v58 }
 0x117   : > { %v950_v43 = vsel %vm653_vm1, %v5158_v10, %v8011_v6  ;;  %794 = vrot.lane.b32.xlu1 %v5421_v60, %s4680_s10  ;;  %v5445_v28 = vsel %vm653_vm1, %v5082_v34, %v4437_v57  ;;  %v5455_v0 = vsel %vm653_vm1, %v5101_v61, %v4442_v20  ;;  %v3989_v6 = vpack.c.bf16 %v1015_v62, %v1014_v4 }
 0x118   : > { %v5447_v46 = vpop.permute.xlu1 %4444  ;;  %v5449_v33 = vpop.permute.xlu0 %4449  ;;  %v951_v20 = vsel %vm653_vm1, %v5187_v3, %v8179_v12  ;;  %v5475_v4 = vsel %vm530_vm2, %v546_v56, %v547_v51  ;;  %v1016_v56 = vld [vmem:[%s7940_s1 + $0x130] sm:$0xff] }
 0x119   : > { %8177 = vst [vmem:[#allocation67_spill] sm:$0xff] %v5447_v46  ;;  %8178 = vst [vmem:[#allocation68_spill] sm:$0xff] %v5449_v33  ;;  %1201 = vmatmul.mubr.f32.gmra.mrb[6].mxu0 %v5124_v55  ;;  %v4447_v1 = vunpack.i.h.bf16 %v5447_v46  ;;  %v4452_v57 = vunpack.i.h.bf16 %v5449_v33  ;;  %v8185_v13 = vunpack.i.l.bf16 %v5449_v33 }
 0x11a   : > { %1205 = vmatprep.mubr.f32.mxu0 %v950_v43  ;;  %798 = vrot.lane.b32.xlu0 %v5445_v28, %s4680_s10 }
 0x11b   : > { %802 = vrot.lane.b32.xlu1 %v5455_v0, %s4680_s10  ;;  %v5472_v55 = vsel %vm653_vm1, %v5105_v19, %v4447_v1  ;;  %v5483_v43 = vsel %vm653_vm1, %v5135_v49, %v4452_v57  ;;  %3990 = vmatpush1.bf16.msra.mxu0 %v3989_v6  ;;  %v1017_v1 = vld [vmem:[%s7940_s1 + $0x138] sm:$0xff]  ;;  %v8182_v57 = vunpack.i.l.bf16 %v5447_v46 }
 0x11c   : > { %v5477_v62 = vpop.permute.xlu1 %4454  ;;  %v5479_v15 = vpop.permute.xlu0 %4459  ;;  %3991 = vmatprep.subr.bf16.mxu0 %v8172_v26 }
 0x11d   : > { %8180 = vst [vmem:[#allocation69_spill] sm:$0xff] %v5477_v62  ;;  %8181 = vst [vmem:[#allocation70_spill] sm:$0xff] %v5479_v15  ;;  %1206 = vmatmul.mubr.f32.gmra.mrb[8].mxu0 %v5128_v54  ;;  %v4457_v12 = vunpack.i.h.bf16 %v5477_v62  ;;  %v4462_v11 = vunpack.i.h.bf16 %v5479_v15  ;;  %v952_v58 = vsel %vm653_vm1, %v5475_v4, %v8182_v57  ;;  %v556_v54 = vrot.slane %v4846_v30, 2 }
 0x11e   : > { %1210 = vmatprep.mubr.f32.mxu0 %v951_v20  ;;  %806 = vrot.lane.b32.xlu0 %v5472_v55, %s4680_s10  ;;  %v5503_v20 = vsel %vm530_vm2, %v547_v51, %v549_v42  ;;  %v3992_v42 = vpack.c.bf16 %v1017_v1, %v1016_v56  ;;  %v8191_v30 = vunpack.i.l.bf16 %v5479_v15 }
 0x11f   : > { %810 = vrot.lane.b32.xlu1 %v5483_v43, %s4680_s10  ;;  %v5509_v63 = vsel %vm653_vm1, %v5144_v21, %v4457_v12  ;;  %v5519_v57 = vsel %vm653_vm1, %v5175_v48, %v4462_v11  ;;  %v953_v11 = vsel %vm653_vm1, %v5503_v20, %v8185_v13 }
 0x120   : > { %v5513_v6 = vpop.permute.xlu1 %4464  ;;  %v5515_v46 = vpop.permute.xlu0 %4469  ;;  %3993 = vmatpush1.bf16.msra.mxu0 %v3992_v42  ;;  %v1019_v42 = vld [vmem:[%s7940_s1 + $0x148] sm:$0xff] }
 0x121   : > { %8183 = vst [vmem:[#allocation71_spill] sm:$0xff] %v5513_v6  ;;  %8184 = vst [vmem:[#allocation72_spill] sm:$0xff] %v5515_v46  ;;  %1211 = vmatmul.mubr.f32.gmra.mrb[10].mxu0 %v5141_v53  ;;  %v4467_v51 = vunpack.i.h.bf16 %v5513_v6  ;;  %v4472_v12 = vunpack.i.h.bf16 %v5515_v46  ;;  %3994 = vmatprep.subr.bf16.mxu0 %v8172_v26 }
 0x122   : > { %1215 = vmatprep.mubr.f32.mxu0 %v952_v58  ;;  %814 = vrot.lane.b32.xlu0 %v5509_v63, %s4680_s10  ;;  %v5539_v58 = vsel %vm530_vm2, %v551_v9, %v552_v18  ;;  %v1018_v9 = vld [vmem:[%s7940_s1 + $0x140] sm:$0xff] }
 0x123   : > { %818 = vrot.lane.b32.xlu1 %v5519_v57, %s4680_s10  ;;  %v5536_v56 = vsel %vm653_vm1, %v5184_v52, %v4467_v51  ;;  %v5547_v23 = vsel %vm653_vm1, %v5216_v17, %v4472_v12  ;;  %v8189_v12 = vunpack.i.l.bf16 %v5477_v62 }
 0x124   : > { %8186 = vst [vmem:[#allocation73_spill] sm:$0xff] %v5536_v56  ;;  %v5541_v1 = vpop.permute.xlu1 %4474  ;;  %v5543_v24 = vpop.permute.xlu0 %4479 }
 0x125   : > { %8187 = vst [vmem:[#allocation74_spill] sm:$0xff] %v5541_v1  ;;  %8188 = vst [vmem:[#allocation75_spill] sm:$0xff] %v5543_v24  ;;  %1216 = vmatmul.mubr.f32.gmra.mrb[12].mxu0 %v5162_v38  ;;  %v4477_v13 = vunpack.i.h.bf16 %v5541_v1  ;;  %v4482_v33 = vunpack.i.h.bf16 %v5543_v24  ;;  %v954_v38 = vsel %vm653_vm1, %v5539_v58, %v8189_v12  ;;  %v3995_v12 = vpack.c.bf16 %v1019_v42, %v1018_v9  ;;  %v1020_v9 = vld [vmem:[%s7940_s1 + $0x150] sm:$0xff]  ;;  %v1021_v42 = vld [vmem:[%s7940_s1 + $0x158] sm:$0xff] }
 0x126   : > { %1220 = vmatprep.mubr.f32.mxu0 %v953_v11  ;;  %822 = vrot.lane.b32.xlu0 %v5536_v56, %s4680_s10  ;;  %v5567_v11 = vsel %vm530_vm2, %v552_v18, %v554_v22  ;;  %v557_v56 = vrot.slane %v4849_v31, 2  ;;  %v8030_v22 = vunpack.i.l.bf16 %v5513_v6  ;;  %v8033_v15 = vunpack.i.l.bf16 %v5541_v1 }
 0x127   : > { %826 = vrot.lane.b32.xlu1 %v5547_v23, %s4680_s10  ;;  %v5573_v53 = vsel %vm653_vm1, %v5219_v35, %v4477_v13  ;;  %v5581_v62 = vsel %vm653_vm1, %v5248_v14, %v4482_v33  ;;  %v955_v31 = vsel %vm653_vm1, %v5567_v11, %v8191_v30  ;;  %3996 = vmatpush1.bf16.msra.mxu0 %v3995_v12  ;;  %v561_v30 = vrot.slane %v4865_v37, 2  ;;  %v8192_v37 = vld [vmem:[#allocation41_spill] sm:$0xff] }
 0x128   : > { %v5577_v51 = vpop.permute.xlu1 %4484  ;;  %v5600_v13 = vsel %vm530_vm2, %v556_v54, %v557_v56  ;;  %3997 = vmatprep.subr.bf16.mxu0 %v8172_v26  ;;  %v3998_v12 = vpack.c.bf16 %v1021_v42, %v1020_v9  ;;  %v1023_v9 = vld [vmem:[%s7940_s1 + $0x168] sm:$0xff]  ;;  %v8032_v42 = vunpack.i.l.bf16 %v5543_v24  ;;  %v1034_v24 = vld [vmem:[%s7940_s1 + $0x1c0] sm:$0xff] }
 0x129   : > { %8190 = vst [vmem:[#allocation76_spill] sm:$0xff] %v5577_v51  ;;  %1221 = vmatmul.mubr.f32.gmra.mrb[14].mxu0 %v5181_v45  ;;  %v4487_v18 = vunpack.i.h.bf16 %v5577_v51  ;;  %v956_v54 = vsel %vm653_vm1, %v5600_v13, %v8030_v22  ;;  %v8034_v22 = vunpack.i.l.bf16 %v5577_v51 }
 0x12a   : > { %1225 = vmatprep.mubr.f32.mxu0 %v954_v38  ;;  %830 = vrot.lane.b32.xlu0 %v5573_v53, %s4680_s10  ;;  %v559_v38 = vrot.slane %v4852_v32, 2  ;;  %v8029_v32 = vunpack.i.l.bf16 %v5515_v46  ;;  %v1035_v46 = vld [vmem:[%s7940_s1 + $0x1c8] sm:$0xff] }
 0x12b   : > { %834 = vrot.lane.b32.xlu1 %v5581_v62, %s4680_s10  ;;  %v5596_v33 = vsel %vm653_vm1, %v5251_v16, %v4487_v18  ;;  %3999 = vmatpush1.bf16.msra.mxu0 %v3998_v12 }
 0x12c   : > { %v5618_v18 = vsel %vm530_vm2, %v557_v56, %v559_v38  ;;  %4000 = vmatprep.subr.bf16.mxu0 %v8172_v26  ;;  %v564_v56 = vrot.slane %v4874_v40, 2 }
 0x12d   : > { %1226 = vmatmul.mubr.f32.gmra.mrb[16].mxu0 %v5199_v47  ;;  %v957_v6 = vsel %vm653_vm1, %v5618_v18, %v8029_v32  ;;  %v8193_v32 = vld [vmem:[#allocation43_spill] sm:$0xff] }
 0x12e   : > { %1230 = vmatprep.mubr.f32.mxu0 %v955_v31  ;;  %838 = vrot.lane.b32.xlu0 %v5596_v33, %s4680_s10  ;;  %v562_v31 = vrot.slane %v4871_v39, 2  ;;  %v1022_v39 = vld [vmem:[%s7940_s1 + $0x160] sm:$0xff] }
 0x130   : > { %v5631_v38 = vsel %vm530_vm2, %v561_v30, %v562_v31  ;;  %v5646_v12 = vsel %vm530_vm2, %v562_v31, %v564_v56  ;;  %v8035_v30 = vrot.slane %v4877_v41, 2  ;;  %v1024_v56 = vld [vmem:[%s7940_s1 + $0x170] sm:$0xff] }
 0x131   : > { %1231 = vmatmul.mubr.f32.gmra.mrb[18].mxu0 %v5213_v59  ;;  %v958_v40 = vsel %vm653_vm1, %v5631_v38, %v8033_v15  ;;  %v959_v1 = vsel %vm653_vm1, %v5646_v12, %v8032_v42  ;;  %v8196_v42 = vld [vmem:[#allocation50_spill] sm:$0xff] }
 0x132   : > { %1235 = vmatprep.mubr.f32.mxu0 %v956_v54  ;;  %v4001_v54 = vpack.c.bf16 %v1023_v9, %v1022_v39  ;;  %v1025_v39 = vld [vmem:[%s7940_s1 + $0x178] sm:$0xff] }
 0x134   : > { %4002 = vmatpush1.bf16.msra.mxu0 %v4001_v54  ;;  %v8195_v54 = vld [vmem:[#allocation48_spill] sm:$0xff] }
 0x135   : > { %1236 = vmatmul.mubr.f32.gmra.mrb[20].mxu0 %v8192_v37  ;;  %4003 = vmatprep.subr.bf16.mxu0 %v8172_v26 }
 0x136   : > { %1240 = vmatprep.mubr.f32.mxu0 %v957_v6  ;;  %v566_v6 = vrot.slane %v4902_v50, 2  ;;  %v8194_v50 = vld [vmem:[#allocation45_spill] sm:$0xff] }
 0x138   : > { %v5660_v31 = vsel %vm530_vm2, %v566_v6, %v8035_v30  ;;  %v1027_v6 = vld [vmem:[%s7940_s1 + $0x188] sm:$0xff] }
 0x139   : > { %1241 = vmatmul.mubr.f32.gmra.mrb[22].mxu0 %v8193_v32  ;;  %v960_v9 = vsel %vm653_vm1, %v5660_v31, %v8034_v22  ;;  %v1033_v22 = vld [vmem:[%s7940_s1 + $0x1b8] sm:$0xff] }
 0x13a   : > { %1245 = vmatprep.mubr.f32.mxu0 %v958_v40  ;;  %v4004_v40 = vpack.c.bf16 %v1025_v39, %v1024_v56  ;;  %v1028_v56 = vld [vmem:[%s7940_s1 + $0x190] sm:$0xff]  ;;  %v1029_v39 = vld [vmem:[%s7940_s1 + $0x198] sm:$0xff] }
 0x13c   : > { %4005 = vmatpush1.bf16.msra.mxu0 %v4004_v40  ;;  %v4010_v40 = vpack.c.bf16 %v1029_v39, %v1028_v56  ;;  %v1042_v56 = vld [vmem:[%s7940_s1 + $0x200] sm:$0xff]  ;;  %v1043_v39 = vld [vmem:[%s7940_s1 + $0x208] sm:$0xff] }
 0x13d   : > { %1246 = vmatmul.mubr.f32.gmra.mrb[24].mxu0 %v8194_v50  ;;  %4006 = vmatprep.subr.bf16.mxu0 %v8172_v26 }
 0x13e   : > { %1250 = vmatprep.mubr.f32.mxu0 %v959_v1  ;;  %v1026_v1 = vld [vmem:[%s7940_s1 + $0x180] sm:$0xff] }
 0x13f   : > { %v4007_v15 = vpack.c.bf16 %v1027_v6, %v1026_v1  ;;  %v1031_v1 = vld [vmem:[%s7940_s1 + $0x1a8] sm:$0xff]  ;;  %v1032_v6 = vld [vmem:[%s7940_s1 + $0x1b0] sm:$0xff] }
 0x140   : > { %v4016_v51 = vpack.c.bf16 %v1033_v22, %v1032_v6  ;;  %v1036_v22 = vld [vmem:[%s7940_s1 + $0x1d0] sm:$0xff] }
 0x141   : > { %1251 = vmatmul.mubr.f32.gmra.mrb[26].mxu0 %v8195_v54 }
 0x142   : > { %1255 = vmatprep.mubr.f32.mxu0 %v960_v9  ;;  %4008 = vmatpush1.bf16.msra.mxu0 %v4007_v15  ;;  %v1030_v9 = vld [vmem:[%s7940_s1 + $0x1a0] sm:$0xff] }
 0x143   : > { %4009 = vmatprep.subr.bf16.mxu0 %v8172_v26  ;;  %v4013_v15 = vpack.c.bf16 %v1031_v1, %v1030_v9  ;;  %v1044_v9 = vld [vmem:[%s7940_s1 + $0x210] sm:$0xff]  ;;  %v1045_v1 = vld [vmem:[%s7940_s1 + $0x218] sm:$0xff] }
 0x144   : > { %v4034_v30 = vpack.c.bf16 %v1045_v1, %v1044_v9  ;;  %v1040_v9 = vld [vmem:[%s7940_s1 + $0x1f0] sm:$0xff] }
 0x145   : > { %1256 = vmatmul.mubr.f32.gmra.mrb[28].mxu0 %v8196_v42  ;;  %v1049_v42 = vld [vmem:[%s7940_s1 + $0x238] sm:$0xff] }
 0x146   : > { %4011 = vmatpush1.bf16.msra.mxu0 %v4010_v40  ;;  %v4030_v40 = vpack.c.bf16 %v1043_v39, %v1042_v56  ;;  %v4019_v56 = vpack.c.bf16 %v1035_v46, %v1034_v24  ;;  %v1039_v46 = vld [vmem:[%s7940_s1 + $0x1e8] sm:$0xff] }
 0x147   : > { %4012 = vmatprep.subr.bf16.mxu0 %v8172_v26  ;;  %v1047_v39 = vld [vmem:[%s7940_s1 + $0x228] sm:$0xff] }
 0x148   : > { %4031 = vmatprep.subr.bf16.mxu1 %v4030_v40 }
 0x149   : > { %4033 = vmatpush3.bf16.msra.mxu1 %v4030_v40  ;;  %v1041_v40 = vld [vmem:[%s7940_s1 + $0x1f8] sm:$0xff] }
 0x14a   : > { %4014 = vmatpush1.bf16.msra.mxu0 %v4013_v15  ;;  %4035 = vmatprep.subr.bf16.mxu1 %v4034_v30  ;;  %v1037_v15 = vld [vmem:[%s7940_s1 + $0x1d8] sm:$0xff] }
 0x14b   : > { %4015 = vmatprep.subr.bf16.mxu0 %v8172_v26  ;;  %v4022_v6 = vpack.c.bf16 %v1037_v15, %v1036_v22  ;;  %v8197_v22 = vld [vmem:[#allocation14_spill] sm:$0xff] }
 0x14c   : > { %v569_v15 = vrot.slane %v8197_v22, 2 }
 0x14d   : > { %4037 = vmatpush3.bf16.msra.mxu1 %v4034_v30  ;;  %v1046_v30 = vld [vmem:[%s7940_s1 + $0x220] sm:$0xff] }
 0x14e   : > { %4017 = vmatpush1.bf16.msra.mxu0 %v4016_v51  ;;  %v1038_v51 = vld [vmem:[%s7940_s1 + $0x1e0] sm:$0xff]  ;;  %v4038_v1 = vpack.c.bf16 %v1047_v39, %v1046_v30 }
 0x14f   : > { %4018 = vmatprep.subr.bf16.mxu0 %v8172_v26  ;;  %v4025_v24 = vpack.c.bf16 %v1039_v46, %v1038_v51  ;;  %v572_v46 = vrot.slane %v4886_v44, 2 }
 0x150   : > { %4039 = vmatprep.subr.bf16.mxu1 %v4038_v1 }
 0x151   : > { %4041 = vmatpush3.bf16.msra.mxu1 %v4038_v1  ;;  %v8200_v1 = vld [vmem:[#allocation23_spill] sm:$0xff] }
 0x152   : > { %4020 = vmatpush1.bf16.msra.mxu0 %v4019_v56  ;;  %v4028_v56 = vpack.c.bf16 %v1041_v40, %v1040_v9  ;;  %v8199_v9 = vrot.slane %v4877_v41, 2  ;;  %v8201_v41 = vld [vmem:[#allocation56_spill] sm:$0xff] }
 0x153   : > { %4021 = vmatprep.subr.bf16.mxu0 %v8172_v26 }
 0x154   : > { %v5765_v44 = vsel %vm530_vm2, %v8199_v9, %v569_v15  ;;  %v8203_v9 = vld [vmem:[#allocation57_spill] sm:$0xff] }
 0x156   : > { %4023 = vmatpush1.bf16.msra.mxu0 %v4022_v6  ;;  %v8198_v6 = vld [vmem:[#allocation15_spill] sm:$0xff] }
 0x157   : > { %4024 = vmatprep.subr.bf16.mxu0 %v8172_v26  ;;  %v571_v51 = vrot.slane %v8198_v6, 2 }
 0x159   : > { %v5768_v40 = vsel %vm530_vm2, %v571_v51, %v572_v46 }
 0x15a   : > { %4026 = vmatpush1.bf16.msra.mxu0 %v4025_v24  ;;  %v1048_v24 = vld [vmem:[%s7940_s1 + $0x230] sm:$0xff] }
 0x15b   : > { %4027 = vmatprep.subr.bf16.mxu0 %v8172_v26  ;;  %v4042_v54 = vpack.c.bf16 %v1049_v42, %v1048_v24 }
 0x15d   : > { %4043 = vmatprep.subr.bf16.mxu1 %v4042_v54 }
 0x15e   : > { %4029 = vmatpush1.bf16.msra.mxu0 %v4028_v56  ;;  %v574_v56 = vrot.slane %v8200_v1, 2  ;;  %4045 = vmatpush3.bf16.msra.mxu1 %v4042_v54 }
 0x15f   : > { %4046 = vmatprep.subr.bf16.mxu1 %v8172_v26  ;;  %v577_v26 = vrot.slane %v5065_v8, 2 }
 0x161   : > { %3823 = vmatmul.mubr.msk.f32.vlgmr.msra.gmra.mrb[0].mxu1 %vm653_vm1, %v5187_v3 }
 0x162   : > { %3825 = vmatprep.mubr.msk.f32.mxu1 %vm653_vm1, %v5475_v4 }
 0x165   : > { %3826 = vmatmul.mubr.msk.f32.gmra.mrb[2].mxu1 %vm653_vm1, %v5503_v20 }
 0x166   : > { %3828 = vmatprep.mubr.msk.f32.mxu1 %vm653_vm1, %v5539_v58 }
 0x169   : > { %3829 = vmatmul.mubr.msk.f32.gmra.mrb[4].mxu1 %vm653_vm1, %v5567_v11 }
 0x16a   : > { %3831 = vmatprep.mubr.msk.f32.mxu1 %vm653_vm1, %v5600_v13 }
 0x16d   : > { %3832 = vmatmul.mubr.msk.f32.gmra.mrb[6].mxu1 %vm653_vm1, %v5618_v18 }
 0x16e   : > { %3834 = vmatprep.mubr.msk.f32.mxu1 %vm653_vm1, %v5631_v38 }
 0x171   : > { %3835 = vmatmul.mubr.msk.f32.gmra.mrb[8].mxu1 %vm653_vm1, %v5646_v12 }
 0x172   : > { %3837 = vmatprep.mubr.msk.f32.mxu1 %vm653_vm1, %v5660_v31 }
 0x175   : > { %3838 = vmatmul.mubr.msk.f32.gmra.mrb[10].mxu1 %vm653_vm1, %v5765_v44 }
 0x176   : > { %3840 = vmatprep.mubr.msk.f32.mxu1 %vm653_vm1, %v5768_v40 }
 0x184   : > { %v5758_v30 = vpop.permute.xlu0 %4489  ;;  %v5760_v39 = vpop.permute.xlu1 %4494 }
 0x185   : > { %v4492_v22 = vunpack.i.h.bf16 %v5758_v30  ;;  %v8039_v42 = vunpack.i.l.bf16 %v5758_v30  ;;  %v4497_v6 = vunpack.i.h.bf16 %v5760_v39  ;;  %v4496_v24 = vunpack.i.l.bf16 %v5760_v39 }
 0x187   : > { %v5778_v15 = vsel %vm653_vm1, %v8201_v41, %v4492_v22  ;;  %v5782_v51 = vsel %vm653_vm1, %v8203_v9, %v4497_v6  ;;  %v961_v54 = vsel %vm653_vm1, %v5765_v44, %v8039_v42  ;;  %v962_v1 = vsel %vm653_vm1, %v5768_v40, %v4496_v24 }
 0x188   : > { %8202 = vst [vmem:[#allocation41_spill] sm:$0xff] %v5778_v15  ;;  %842 = vrot.lane.b32.xlu1 %v5778_v15, %s4680_s10  ;;  %846 = vrot.lane.b32.xlu0 %v5782_v51, %s4680_s10  ;;  %v5798_v22 = vpop.permute.xlu0 %790  ;;  %v5801_v6 = vsel %vm530_vm2, %v572_v46, %v574_v56  ;;  %v576_v42 = vrot.slane %v5062_v5, 2  ;;  %v8204_v15 = vld [vmem:[#allocation53_spill] sm:$0xff]  ;;  %v8205_v56 = vld [vmem:[#allocation24_spill] sm:$0xff] }
 0x189   : > { %1260 = vmatprep.mubr.f32.mxu0 %v961_v54  ;;  %v963_v5 = vsel %vm653_vm1, %v5801_v6, %v5798_v22  ;;  %v5817_v8 = vpop.permute.xlu1 %794  ;;  %v579_v54 = vrot.slane %v8205_v56, 2  ;;  %v582_v56 = vrot.slane %v5082_v34, 2  ;;  %3841 = vmatmul.mubr.msk.f32.gmra.mrb[12].mxu1 %vm653_vm1, %v5801_v6 }
 0x18a   : > { %1261 = vmatmul.mubr.f32.gmra.mrb[30].mxu0 %v8204_v15  ;;  %v5820_v46 = vsel %vm530_vm2, %v576_v42, %v577_v26 }
 0x18b   : > { %1265 = vmatprep.mubr.f32.mxu0 %v962_v1  ;;  %v8206_v1 = vld [vmem:[#allocation55_spill] sm:$0xff]  ;;  %v5838_v42 = vsel %vm530_vm2, %v577_v26, %v579_v54  ;;  %3843 = vmatprep.mubr.msk.f32.mxu1 %vm653_vm1, %v5820_v46 }
 0x18c   : > { %724 = vrot.lane.b32.xlu1 %v5364_v2, %s4680_s10  ;;  %728 = vrot.lane.b32.xlu0 %v5395_v25, %s4680_s10  ;;  %v964_v2 = vsel %vm653_vm1, %v5820_v46, %v5817_v8  ;;  %v5835_v25 = vpop.permute.xlu0 %798 }
 0x18d   : > { %v5854_v34 = vpop.permute.xlu1 %802  ;;  %3844 = vmatmul.mubr.msk.f32.gmra.mrb[14].mxu1 %vm653_vm1, %v5838_v42 }
 0x18e   : > { %1266 = vmatmul.mubr.f32.gmra.mrb[32].mxu0 %v8206_v1 }
 0x18f   : > { %1270 = vmatprep.mubr.f32.mxu0 %v963_v5  ;;  %v581_v5 = vrot.slane %v5079_v29, 2  ;;  %v965_v29 = vsel %vm653_vm1, %v5838_v42, %v5835_v25 }
 0x190   : > { %732 = vrot.lane.b32.xlu1 %v5158_v10, %s4680_s10  ;;  %736 = vrot.lane.b32.xlu0 %v5187_v3, %s4680_s10  ;;  %v8207_v3 = vld [vmem:[#allocation26_spill] sm:$0xff] }
 0x191   : > { %v5857_v10 = vsel %vm530_vm2, %v581_v5, %v582_v56  ;;  %v584_v26 = vrot.slane %v8207_v3, 2  ;;  %v587_v5 = vrot.slane %v5105_v19, 2  ;;  %v591_v3 = vrot.slane %v5135_v49, 2 }
 0x192   : > { %1271 = vmatmul.mubr.f32.gmra.mrb[34].mxu0 %v5379_v36  ;;  %3846 = vmatprep.mubr.msk.f32.mxu1 %vm653_vm1, %v5857_v10 }
 0x193   : > { %1275 = vmatprep.mubr.f32.mxu0 %v964_v2  ;;  %v585_v54 = vsel %vm530_vm2, %v582_v56, %v584_v26  ;;  %v586_v2 = vrot.slane %v5101_v61, 2  ;;  %v592_v26 = vrot.slane %v5144_v21, 2 }
 0x194   : > { %740 = vrot.lane.b32.xlu1 %v5475_v4, %s4680_s10  ;;  %744 = vrot.lane.b32.xlu0 %v5503_v20, %s4680_s10  ;;  %v966_v4 = vsel %vm653_vm1, %v5857_v10, %v5854_v34  ;;  %v5872_v20 = vpop.permute.xlu0 %806 }
 0x195   : > { %v967_v61 = vsel %vm653_vm1, %v585_v54, %v5872_v20  ;;  %v588_v19 = vsel %vm530_vm2, %v586_v2, %v587_v5  ;;  %v593_v21 = vsel %vm530_vm2, %v591_v3, %v592_v26  ;;  %3847 = vmatmul.mubr.msk.f32.gmra.mrb[16].mxu1 %vm653_vm1, %v585_v54 }
 0x196   : > { %1276 = vmatmul.mubr.f32.gmra.mrb[36].mxu0 %v5383_v27  ;;  %3849 = vmatprep.mubr.msk.f32.mxu1 %vm653_vm1, %v588_v19 }
 0x197   : > { %1280 = vmatprep.mubr.f32.mxu0 %v965_v29 }
 0x198   : > { %748 = vrot.lane.b32.xlu1 %v5539_v58, %s4680_s10  ;;  %752 = vrot.lane.b32.xlu0 %v5567_v11, %s4680_s10  ;;  %v5888_v58 = vpop.permute.xlu1 %810  ;;  %v8208_v11 = vld [vmem:[#allocation29_spill] sm:$0xff] }
 0x199   : > { %v589_v56 = vrot.slane %v8208_v11, 2 }
 0x19a   : > { %1281 = vmatmul.mubr.f32.gmra.mrb[38].mxu0 %v5413_v7 }
 0x19b   : > { %1285 = vmatprep.mubr.f32.mxu0 %v966_v4  ;;  %v590_v29 = vsel %vm530_vm2, %v587_v5, %v589_v56  ;;  %v596_v5 = vrot.slane %v5175_v48, 2  ;;  %v602_v56 = vrot.slane %v5219_v35, 2 }
 0x19c   : > { %756 = vrot.lane.b32.xlu1 %v5600_v13, %s4680_s10  ;;  %760 = vrot.lane.b32.xlu0 %v5618_v18, %s4680_s10  ;;  %v968_v13 = vsel %vm653_vm1, %v588_v19, %v5888_v58  ;;  %v5903_v18 = vpop.permute.xlu0 %814 }
 0x19d   : > { %v969_v49 = vsel %vm653_vm1, %v590_v29, %v5903_v18  ;;  %3850 = vmatmul.mubr.msk.f32.gmra.mrb[18].mxu1 %vm653_vm1, %v590_v29 }
 0x19e   : > { %1286 = vmatmul.mubr.f32.gmra.mrb[40].mxu0 %v5421_v60  ;;  %3852 = vmatprep.mubr.msk.f32.mxu1 %vm653_vm1, %v593_v21 }
 0x19f   : > { %1290 = vmatprep.mubr.f32.mxu0 %v967_v61  ;;  %v597_v61 = vrot.slane %v5184_v52, 2  ;;  %v8210_v52 = vld [vmem:[#allocation39_spill] sm:$0xff] }
 0x1a0   : > { %764 = vrot.lane.b32.xlu1 %v5631_v38, %s4680_s10  ;;  %768 = vrot.lane.b32.xlu0 %v5646_v12, %s4680_s10  ;;  %v5919_v38 = vpop.permute.xlu1 %818  ;;  %v8209_v12 = vld [vmem:[#allocation36_spill] sm:$0xff]  ;;  %v599_v11 = vrot.slane %v8210_v52, 2 }
 0x1a1   : > { %v594_v4 = vrot.slane %v8209_v12, 2  ;;  %v598_v48 = vsel %vm530_vm2, %v596_v5, %v597_v61  ;;  %v612_v5 = vrot.slane %v8203_v9, 2 }
 0x1a2   : > { %1291 = vmatmul.mubr.f32.gmra.mrb[42].mxu0 %v5445_v28  ;;  %v600_v3 = vsel %vm530_vm2, %v597_v61, %v599_v11  ;;  %v276_v11 = vld [vmem:[%s4769_s9 + $0x1a8] sm:$0x3] }
 0x1a3   : > { %1295 = vmatprep.mubr.f32.mxu0 %v968_v13  ;;  %v595_v2 = vsel %vm530_vm2, %v592_v26, %v594_v4  ;;  %v8211_v26 = vld [vmem:[#allocation44_spill] sm:$0xff] }
 0x1a4   : > { %772 = vrot.lane.b32.xlu1 %v5660_v31, %s4680_s10  ;;  %776 = vrot.lane.b32.xlu0 %v5765_v44, %s4680_s10  ;;  %v970_v31 = vsel %vm653_vm1, %v593_v21, %v5919_v38  ;;  %v5933_v44 = vpop.permute.xlu0 %822 }
 0x1a5   : > { %3853 = vmatmul.mubr.msk.f32.gmra.mrb[20].mxu1 %vm653_vm1, %v595_v2 }
 0x1a6   : > { %1296 = vmatmul.mubr.f32.gmra.mrb[44].mxu0 %v5455_v0  ;;  %3855 = vmatprep.mubr.msk.f32.mxu1 %vm653_vm1, %v598_v48 }
 0x1a7   : > { %1300 = vmatprep.mubr.f32.mxu0 %v969_v49  ;;  %v604_v49 = vrot.slane %v8211_v26, 2 }
 0x1a8   : > { %780 = vrot.lane.b32.xlu1 %v5768_v40, %s4680_s10  ;;  %784 = vrot.lane.b32.xlu0 %v5801_v6, %s4680_s10  ;;  %v971_v40 = vsel %vm653_vm1, %v595_v2, %v5933_v44  ;;  %v5947_v6 = vpop.permute.xlu1 %826  ;;  %v5961_v13 = vpop.permute.xlu0 %830 }
 0x1a9   : > { %3856 = vmatmul.mubr.msk.f32.gmra.mrb[22].mxu1 %vm653_vm1, %v600_v3 }
 0x1aa   : > { %1301 = vmatmul.mubr.f32.gmra.mrb[46].mxu0 %v5472_v55 }
 0x1ab   : > { %1305 = vmatprep.mubr.f32.mxu0 %v970_v31  ;;  %v611_v31 = vrot.slane %v8201_v41, 2 }
 0x1ac   : > { %788 = vrot.lane.b32.xlu1 %v5820_v46, %s4680_s10  ;;  %792 = vrot.lane.b32.xlu0 %v5838_v42, %s4680_s10  ;;  %v972_v46 = vsel %vm653_vm1, %v598_v48, %v5947_v6  ;;  %v601_v42 = vrot.slane %v5216_v17, 2  ;;  %v973_v17 = vsel %vm653_vm1, %v600_v3, %v5961_v13  ;;  %v5975_v12 = vpop.permute.xlu1 %834  ;;  %v5989_v61 = vpop.permute.xlu0 %838 }
 0x1ad   : > { %v613_v9 = vsel %vm530_vm2, %v611_v31, %v612_v5 }
 0x1ae   : > { %1306 = vmatmul.mubr.f32.gmra.mrb[48].mxu0 %v5483_v43  ;;  %v603_v35 = vsel %vm530_vm2, %v601_v42, %v602_v56 }
 0x1af   : > { %1310 = vmatprep.mubr.f32.mxu0 %v971_v40  ;;  %3858 = vmatprep.mubr.msk.f32.mxu1 %vm653_vm1, %v603_v35  ;;  %v8213_v40 = vld [vmem:[#allocation73_spill] sm:$0xff] }
 0x1b0   : > { %796 = vrot.lane.b32.xlu1 %v5857_v10, %s4680_s10  ;;  %800 = vrot.lane.b32.xlu0 %v585_v54, %s4680_s10  ;;  %v606_v10 = vrot.slane %v5248_v14, 2  ;;  %v607_v54 = vrot.slane %v5251_v16, 2  ;;  %v974_v16 = vsel %vm653_vm1, %v603_v35, %v5975_v12 }
 0x1b2   : > { %1311 = vmatmul.mubr.f32.gmra.mrb[50].mxu0 %v5509_v63  ;;  %v608_v14 = vsel %vm530_vm2, %v606_v10, %v607_v54 }
 0x1b3   : > { %1315 = vmatprep.mubr.f32.mxu0 %v972_v46  ;;  %v8214_v46 = vld [vmem:[#allocation58_spill] sm:$0xff] }
 0x1b4   : > { %804 = vrot.lane.b32.xlu1 %v588_v19, %s4680_s10  ;;  %808 = vrot.lane.b32.xlu0 %v590_v29, %s4680_s10  ;;  %v605_v19 = vsel %vm530_vm2, %v602_v56, %v604_v49  ;;  %v8212_v29 = vld [vmem:[#allocation49_spill] sm:$0xff]  ;;  %v614_v42 = vrot.slane %v8214_v46, 2  ;;  %v420_v49 = vrot.slane %v276_v11, 1 }
 0x1b5   : > { %v609_v4 = vrot.slane %v8212_v29, 2  ;;  %3859 = vmatmul.mubr.msk.f32.gmra.mrb[24].mxu1 %vm653_vm1, %v605_v19  ;;  %v975_v41 = vsel %vm653_vm1, %v605_v19, %v5989_v61 }
 0x1b6   : > { %1316 = vmatmul.mubr.f32.gmra.mrb[52].mxu0 %v5519_v57  ;;  %3861 = vmatprep.mubr.msk.f32.mxu1 %vm653_vm1, %v608_v14 }
 0x1b7   : > { %1320 = vmatprep.mubr.f32.mxu0 %v973_v17  ;;  %v610_v52 = vsel %vm530_vm2, %v607_v54, %v609_v4  ;;  %v615_v17 = vsel %vm530_vm2, %v612_v5, %v614_v42  ;;  %v619_v5 = vrot.slane %v276_v11, 2 }
 0x1b8   : > { %812 = vrot.lane.b32.xlu1 %v593_v21, %s4680_s10  ;;  %816 = vrot.lane.b32.xlu0 %v595_v2, %s4680_s10  ;;  %v5995_v21 = vld [vmem:[%s4769_s9 + $0x198] sm:$0xff]  ;;  %v5998_v2 = vld [vmem:[%s4769_s9 + $0x1a0] sm:$0xff]  ;;  %s3725_s9 = sshll.u32 %s4737_s22, 12  ;;  %s7898_s22 = scalar_lea.sflag [#allocation4], %s215_s12 }
 0x1b9   : > { %3862 = vmatmul.mubr.msk.f32.gmra.mrb[26].mxu1 %vm653_vm1, %v610_v52  ;;  %v417_v56 = vrot.slane %v5995_v21, 1  ;;  %v418_v26 = vrot.slane %v5998_v2, 1  ;;  %v617_v31 = vrot.slane %v5998_v2, 2  ;;  %s7887_s23 = scalar_lea.hbm %s7944_s5, %s3725_s9 }
 0x1ba   : > { %1321 = vmatmul.mubr.f32.gmra.mrb[54].mxu0 %v8213_v40  ;;  %3864 = vmatprep.mubr.msk.f32.mxu1 %vm653_vm1, %v613_v9 }
 0x1bb   : > { %1325 = vmatprep.mubr.f32.mxu0 %v974_v16  ;;  %v616_v16 = vrot.slane %v5995_v21, 2  ;;  %v620_v42 = vsel %vm530_vm2, %v617_v31, %v619_v5 }
 0x1bc   : > { %820 = vrot.lane.b32.xlu1 %v598_v48, %s4680_s10  ;;  %824 = vrot.lane.b32.xlu0 %v600_v3, %s4680_s10  ;;  %v419_v48 = vsel %vm331_vm0, %v417_v56, %v418_v26  ;;  %v421_v3 = vsel %vm331_vm0, %v418_v26, %v420_v49  ;;  %v8218_v26 = vld [vmem:[#allocation32_spill] sm:$0xff] }
 0x1bd   : > { %3865 = vmatmul.mubr.msk.f32.gmra.mrb[28].mxu1 %vm653_vm1, %v615_v17  ;;  %v4498_v10 = vpack.i.bf16 %v613_v9, %v419_v48  ;;  %v4503_v54 = vpack.i.bf16 %v615_v17, %v421_v3  ;;  %v618_v46 = vsel %vm530_vm2, %v616_v16, %v617_v31  ;;  %v8219_v49 = vld [vmem:[#allocation60_spill] sm:$0xff] }
 0x1be   : > { %1326 = vmatmul.mubr.f32.gmra.mrb[56].mxu0 %v5547_v23  ;;  %3867 = vmatprep.mubr.msk.f32.mxu1 %vm653_vm1, %v618_v46  ;;  %v8220_v17 = vunpack.i.h.bf16 %v8219_v49  ;;  %v8224_v31 = vld [vmem:[#allocation64_spill] sm:$0xff]  ;;  %v8230_v49 = vld [vmem:[#allocation67_spill] sm:$0xff] }
 0x1bf   : > { %1330 = vmatprep.mubr.f32.mxu0 %v975_v41  ;;  %v8216_v41 = vld [vmem:[#allocation59_spill] sm:$0xff]  ;;  %v8225_v5 = vunpack.i.l.bf16 %v8224_v31  ;;  %v8236_v31 = vld [vmem:[#allocation48_spill] sm:$0xff] }
 0x1c0   : > { %828 = vrot.lane.b32.xlu1 %v603_v35, %s4680_s10  ;;  %832 = vrot.lane.b32.xlu0 %v605_v19, %s4680_s10  ;;  %v8217_v9 = vunpack.i.l.bf16 %v8216_v41 }
 0x1c1   : > { %3868 = vmatmul.mubr.msk.f32.gmra.mrb[30].mxu1 %vm653_vm1, %v620_v42 }
 0x1c2   : > { %1331 = vmatmul.mubr.f32.gmra.mrb[58].mxu0 %v5573_v53 }
 0x1c4   : > { %836 = vrot.lane.b32.xlu1 %v608_v14, %s4680_s10  ;;  %840 = vrot.lane.b32.xlu0 %v610_v52, %s4680_s10 }
 0x1c8   : > { %4499 = vrot.lane.b32.xlu1 %v4498_v10, %s4680_s10  ;;  %4504 = vrot.lane.b32.xlu0 %v4503_v54, %s4680_s10  ;;  %v8221_v10 = vld [vmem:[#allocation33_spill] sm:$0xff]  ;;  %v8222_v54 = vld [vmem:[#allocation63_spill] sm:$0xff] }
 0x1fa   : > { %v6023_v29 = vpop.permute.xlu1 %842  ;;  %v6025_v35 = vpop.permute.xlu0 %846 }
 0x1fb   : > { %v976_v19 = vsel %vm653_vm1, %v608_v14, %v6023_v29  ;;  %v977_v4 = vsel %vm653_vm1, %v610_v52, %v6025_v35  ;;  %v8215_v52 = vld [vmem:[#allocation30_spill] sm:$0xff] }
 0x1fc   : > { %1335 = vmatprep.mubr.f32.mxu0 %v976_v19  ;;  %v8223_v19 = vunpack.i.l.bf16 %v8222_v54 }
 0x1fd   : > { %1336 = vmatmul.mubr.f32.gmra.mrb[60].mxu0 %v5581_v62 }
 0x1fe   : > { %1340 = vmatprep.mubr.f32.mxu0 %v977_v4  ;;  %v725_v14 = vpop.permute.xlu1 %724  ;;  %v729_v56 = vpop.permute.xlu0 %728 }
 0x1ff   : > { %v850_v11 = vsel %vm653_vm1, %v8217_v9, %v725_v14  ;;  %v851_v48 = vsel %vm653_vm1, %v8220_v17, %v729_v56  ;;  %v8226_v14 = vld [vmem:[#allocation65_spill] sm:$0xff]  ;;  %v8231_v17 = vunpack.i.l.bf16 %v8230_v49  ;;  %v8244_v49 = vld [vmem:[#allocation74_spill] sm:$0xff] }
 0x201   : > { %1341 = vmatmul.mubr.f32.gmra.mrb[62].mxu0 %v5596_v33 }
 0x202   : > { %1410 = vmatprep.mubr.f32.mxu0 %v8215_v52  ;;  %v733_v3 = vpop.permute.xlu1 %732  ;;  %v737_v16 = vpop.permute.xlu0 %736  ;;  %v8227_v52 = vunpack.i.l.bf16 %v8226_v14  ;;  %v8239_v14 = vld [vmem:[#allocation50_spill] sm:$0xff] }
 0x203   : > { %v852_v4 = vsel %vm653_vm1, %v8223_v19, %v733_v3  ;;  %v853_v46 = vsel %vm653_vm1, %v8225_v5, %v737_v16  ;;  %v8232_v3 = vld [vmem:[#allocation68_spill] sm:$0xff]  ;;  %v8234_v19 = vld [vmem:[#allocation69_spill] sm:$0xff]  ;;  %v8237_v5 = vld [vmem:[#allocation70_spill] sm:$0xff] }
 0x205   : > { %1411 = vmatmul.mubr.f32.vlgmr.msra.gmra.mrb[0].mxu0 %v850_v11  ;;  %v8228_v11 = vld [vmem:[#allocation66_spill] sm:$0xff] }
 0x206   : > { %1415 = vmatprep.mubr.f32.mxu0 %v8218_v26  ;;  %v741_v42 = vpop.permute.xlu1 %740  ;;  %v745_v9 = vpop.permute.xlu0 %744  ;;  %v8229_v56 = vunpack.i.l.bf16 %v8228_v11  ;;  %v8242_v11 = vld [vmem:[#allocation72_spill] sm:$0xff] }
 0x207   : > { %v854_v41 = vsel %vm653_vm1, %v8227_v52, %v741_v42  ;;  %v8240_v52 = vld [vmem:[#allocation71_spill] sm:$0xff] }
 0x209   : > { %1416 = vmatmul.mubr.f32.gmra.mrb[2].mxu0 %v851_v48 }
 0x20a   : > { %1420 = vmatprep.mubr.f32.mxu0 %v8221_v10  ;;  %v749_v26 = vpop.permute.xlu1 %748  ;;  %v753_v48 = vpop.permute.xlu0 %752  ;;  %v8233_v10 = vunpack.i.l.bf16 %v8232_v3  ;;  %v8246_v3 = vld [vmem:[#allocation75_spill] sm:$0xff] }
 0x20d   : > { %1421 = vmatmul.mubr.f32.gmra.mrb[4].mxu0 %v852_v4  ;;  %v8235_v4 = vunpack.i.l.bf16 %v8234_v19 }
 0x20e   : > { %1425 = vmatprep.mubr.f32.mxu0 %v5181_v45  ;;  %v855_v45 = vsel %vm653_vm1, %v8229_v56, %v745_v9  ;;  %v757_v54 = vpop.permute.xlu1 %756  ;;  %v761_v16 = vpop.permute.xlu0 %760  ;;  %v8243_v56 = vunpack.i.l.bf16 %v8242_v11 }
 0x211   : > { %1426 = vmatmul.mubr.f32.gmra.mrb[6].mxu0 %v853_v46  ;;  %v8238_v46 = vunpack.i.l.bf16 %v8237_v5 }
 0x212   : > { %1430 = vmatprep.mubr.f32.mxu0 %v5199_v47  ;;  %v856_v47 = vsel %vm653_vm1, %v8231_v17, %v749_v26  ;;  %v765_v42 = vpop.permute.xlu1 %764  ;;  %v769_v9 = vpop.permute.xlu0 %768  ;;  %v8245_v17 = vunpack.i.l.bf16 %v8244_v49 }
 0x215   : > { %1431 = vmatmul.mubr.f32.gmra.mrb[8].mxu0 %v854_v41  ;;  %v8241_v41 = vunpack.i.l.bf16 %v8240_v52 }
 0x216   : > { %1435 = vmatprep.mubr.f32.mxu0 %v5213_v59  ;;  %v857_v59 = vsel %vm653_vm1, %v8233_v10, %v753_v48  ;;  %v773_v26 = vpop.permute.xlu1 %772  ;;  %v777_v48 = vpop.permute.xlu0 %776  ;;  %v8247_v10 = vunpack.i.l.bf16 %v8246_v3 }
 0x219   : > { %1436 = vmatmul.mubr.f32.gmra.mrb[10].mxu0 %v855_v45  ;;  %v861_v45 = vsel %vm653_vm1, %v8243_v56, %v769_v9  ;;  %v2694_v56 = vld [vmem:[%s7942_s3 + $0x220] sm:$0xff] }
 0x21a   : > { %1440 = vmatprep.mubr.f32.mxu0 %v8192_v37  ;;  %v858_v37 = vsel %vm653_vm1, %v8235_v4, %v757_v54  ;;  %v8248_v54 = vld [vmem:[#allocation76_spill] sm:$0xff]  ;;  %v785_v4 = vpop.permute.xlu0 %784 }
 0x21b   : > { %v8249_v19 = vunpack.i.l.bf16 %v8248_v54 }
 0x21d   : > { %1441 = vmatmul.mubr.f32.gmra.mrb[12].mxu0 %v856_v47  ;;  %v862_v47 = vsel %vm653_vm1, %v8245_v17, %v773_v26  ;;  %v2697_v17 = vld [vmem:[%s7942_s3 + $0x238] sm:$0xff] }
 0x21e   : > { %1445 = vmatprep.mubr.f32.mxu0 %v8193_v32  ;;  %v859_v32 = vsel %vm653_vm1, %v8238_v46, %v761_v16 }
 0x221   : > { %1446 = vmatmul.mubr.f32.gmra.mrb[14].mxu0 %v857_v59  ;;  %v781_v59 = vpop.permute.xlu1 %780 }
 0x222   : > { %1450 = vmatprep.mubr.f32.mxu0 %v8194_v50  ;;  %v860_v50 = vsel %vm653_vm1, %v8241_v41, %v765_v42  ;;  %v2693_v41 = vld [vmem:[%s7942_s3 + $0x218] sm:$0xff] }
 0x225   : > { %1451 = vmatmul.mubr.f32.gmra.mrb[16].mxu0 %v858_v37  ;;  %v8250_v37 = vunpack.i.l.bf16 %v5758_v30  ;;  %v789_v16 = vpop.permute.xlu1 %788 }
 0x226   : > { %1455 = vmatprep.mubr.f32.mxu0 %v8236_v31  ;;  %v793_v31 = vpop.permute.xlu0 %792 }
 0x227   : > { %v867_v5 = vsel %vm653_vm1, %v5798_v22, %v793_v31 }
 0x229   : > { %1456 = vmatmul.mubr.f32.gmra.mrb[18].mxu0 %v859_v32  ;;  %v2691_v32 = vld [vmem:[%s7942_s3 + $0x208] sm:$0xff] }
 0x22a   : > { %1460 = vmatprep.mubr.f32.mxu0 %v8239_v14  ;;  %v801_v46 = vpop.permute.xlu0 %800 }
 0x22d   : > { %1461 = vmatmul.mubr.f32.gmra.mrb[20].mxu0 %v860_v50 }
 0x22e   : > { %1465 = vmatprep.mubr.f32.mxu0 %v8204_v15  ;;  %v863_v15 = vsel %vm653_vm1, %v8247_v10, %v777_v48  ;;  %v8255_v10 = vld [vmem:[#allocation41_spill] sm:$0xff] }
 0x231   : > { %1466 = vmatmul.mubr.f32.gmra.mrb[22].mxu0 %v861_v45 }
 0x232   : > { %1470 = vmatprep.mubr.f32.mxu0 %v8206_v1  ;;  %v864_v1 = vsel %vm653_vm1, %v8249_v19, %v781_v59 }
 0x235   : > { %1471 = vmatmul.mubr.f32.gmra.mrb[24].mxu0 %v862_v47 }
 0x236   : > { %1475 = vmatprep.mubr.f32.mxu0 %v5379_v36  ;;  %v865_v36 = vsel %vm653_vm1, %v8250_v37, %v785_v4 }
 0x239   : > { %1476 = vmatmul.mubr.f32.gmra.mrb[26].mxu0 %v863_v15 }
 0x23a   : > { %1480 = vmatprep.mubr.f32.mxu0 %v5383_v27  ;;  %v866_v27 = vsel %vm653_vm1, %v4496_v24, %v789_v16  ;;  %v809_v24 = vpop.permute.xlu0 %808 }
 0x23d   : > { %1481 = vmatmul.mubr.f32.gmra.mrb[28].mxu0 %v864_v1 }
 0x23e   : > { %1485 = vmatprep.mubr.f32.mxu0 %v5413_v7  ;;  %v797_v7 = vpop.permute.xlu1 %796 }
 0x23f   : > { %v868_v30 = vsel %vm653_vm1, %v5817_v8, %v797_v7 }
 0x241   : > { %1486 = vmatmul.mubr.f32.gmra.mrb[30].mxu0 %v865_v36 }
 0x242   : > { %1490 = vmatprep.mubr.f32.mxu0 %v5421_v60  ;;  %v869_v60 = vsel %vm653_vm1, %v5835_v25, %v801_v46  ;;  %v805_v39 = vpop.permute.xlu1 %804  ;;  %v817_v25 = vpop.permute.xlu0 %816 }
 0x245   : > { %1491 = vmatmul.mubr.f32.gmra.mrb[32].mxu0 %v866_v27 }
 0x246   : > { %1495 = vmatprep.mubr.f32.mxu0 %v5445_v28  ;;  %v870_v28 = vsel %vm653_vm1, %v5854_v34, %v805_v39  ;;  %v813_v22 = vpop.permute.xlu1 %812  ;;  %v873_v34 = vsel %vm653_vm1, %v5903_v18, %v817_v25  ;;  %v825_v42 = vpop.permute.xlu0 %824 }
 0x249   : > { %1496 = vmatmul.mubr.f32.gmra.mrb[34].mxu0 %v867_v5 }
 0x24a   : > { %1500 = vmatprep.mubr.f32.mxu0 %v5455_v0  ;;  %v871_v0 = vsel %vm653_vm1, %v5872_v20, %v809_v24 }
 0x24d   : > { %1501 = vmatmul.mubr.f32.gmra.mrb[36].mxu0 %v868_v30 }
 0x24e   : > { %1505 = vmatprep.mubr.f32.mxu0 %v5472_v55  ;;  %v6123_v55 = vpop.f32.mrb[0].mxu1 }
 0x24f   : > { %v6125_v8 = vpop.f32.mrb[1].mxu1 }
 0x250   : > { %v6208_v20 = vpop.f32.mrb[2].mxu1 }
 0x251   : > { %1506 = vmatmul.mubr.f32.gmra.mrb[38].mxu0 %v869_v60 }
 0x252   : > { %1510 = vmatprep.mubr.f32.mxu0 %v5483_v43  ;;  %v872_v43 = vsel %vm653_vm1, %v5888_v58, %v813_v22  ;;  %v6211_v58 = vpop.f32.mrb[3].mxu1 }
 0x253   : > { %v6236_v9 = vpop.f32.mrb[4].mxu1 }
 0x254   : > { %v6240_v11 = vpop.f32.mrb[5].mxu1 }
 0x255   : > { %1511 = vmatmul.mubr.f32.gmra.mrb[40].mxu0 %v870_v28 }
 0x256   : > { %1515 = vmatprep.mubr.f32.mxu0 %v5509_v63  ;;  %v4682_v63 = vmov 0.0  }
 0x257   : > { %1824 = vst.msk [vmem:[#allocation2 + $0x29] sm:$0x1] %vm1804_vm3, %v4682_v63  ;;  %1806 = vst.msk [vmem:[#allocation2 + $0x18] sm:$0x1] %vm1804_vm3, %v4682_v63 }
 0x258   : > { %1796 = vst.msk [vmem:[#allocation2] sm:$0xff] %vm653_vm1, %v4682_v63  ;;  %1797 = vst.msk [vmem:[#allocation2 + $0x8] sm:$0xff] %vm653_vm1, %v4682_v63 }
 0x259   : > { %1516 = vmatmul.mubr.f32.gmra.mrb[42].mxu0 %v871_v0  ;;  %1801 = vst.msk [vmem:[#allocation2 + $0x198] sm:$0xff] %vm653_vm1, %v4682_v63  ;;  %1802 = vst.msk [vmem:[#allocation2 + $0x1a0] sm:$0xff] %vm653_vm1, %v4682_v63 }
 0x25a   : > { %1520 = vmatprep.mubr.f32.mxu0 %v5519_v57  ;;  %1807 = vst.msk [vmem:[#allocation2 + $0x30] sm:$0x1] %vm1804_vm3, %v4682_v63  ;;  %1808 = vst.msk [vmem:[#allocation2 + $0x48] sm:$0x1] %vm1804_vm3, %v4682_v63  ;;  %v821_v57 = vpop.permute.xlu1 %820 }
 0x25b   : > { %1809 = vst.msk [vmem:[#allocation2 + $0x60] sm:$0x1] %vm1804_vm3, %v4682_v63  ;;  %1810 = vst.msk [vmem:[#allocation2 + $0x78] sm:$0x1] %vm1804_vm3, %v4682_v63  ;;  %v874_v14 = vsel %vm653_vm1, %v5919_v38, %v821_v57  ;;  %v875_v38 = vsel %vm653_vm1, %v5933_v44, %v825_v42  ;;  %v2695_v44 = vld [vmem:[%s7942_s3 + $0x228] sm:$0xff] }
 0x25c   : > { %1811 = vst.msk [vmem:[#allocation2 + $0x90] sm:$0x1] %vm1804_vm3, %v4682_v63  ;;  %1812 = vst.msk [vmem:[#allocation2 + $0xa8] sm:$0x1] %vm1804_vm3, %v4682_v63  ;;  %v6251_v49 = vpack.c.bf16 %v2695_v44, %v2694_v56  ;;  %v6343_v42 = vld [vmem:[%s7941_s2] ss:$0 sm:$0xff] }
 0x25d   : > { %1521 = vmatmul.mubr.f32.gmra.mrb[44].mxu0 %v872_v43  ;;  %1813 = vst.msk [vmem:[#allocation2 + $0xc0] sm:$0x1] %vm1804_vm3, %v4682_v63  ;;  %1814 = vst.msk [vmem:[#allocation2 + $0xd8] sm:$0x1] %vm1804_vm3, %v4682_v63 }
 0x25e   : > { %1525 = vmatprep.mubr.f32.mxu0 %v8213_v40  ;;  %1815 = vst.msk [vmem:[#allocation2 + $0xf0] sm:$0x1] %vm1804_vm3, %v4682_v63  ;;  %1816 = vst.msk [vmem:[#allocation2 + $0x108] sm:$0x1] %vm1804_vm3, %v4682_v63  ;;  %v2690_v40 = vld [vmem:[%s7942_s3 + $0x200] sm:$0xff]  ;;  %v829_v52 = vpop.permute.xlu1 %828 }
 0x25f   : > { %1817 = vst.msk [vmem:[#allocation2 + $0x120] sm:$0x1] %vm1804_vm3, %v4682_v63  ;;  %1818 = vst.msk [vmem:[#allocation2 + $0x138] sm:$0x1] %vm1804_vm3, %v4682_v63  ;;  %v6221_v18 = vpack.c.bf16 %v2691_v32, %v2690_v40  ;;  %v876_v26 = vsel %vm653_vm1, %v5947_v6, %v829_v52 }
 0x260   : > { %1819 = vst.msk [vmem:[#allocation2 + $0x150] sm:$0x1] %vm1804_vm3, %v4682_v63  ;;  %1820 = vst.msk [vmem:[#allocation2 + $0x168] sm:$0x1] %vm1804_vm3, %v4682_v63 }
 0x261   : > { %1821 = vst.msk [vmem:[#allocation2 + $0x180] sm:$0x1] %vm1804_vm3, %v4682_v63  ;;  %1825 = vst.msk [vmem:[#allocation2 + $0x41] sm:$0x1] %vm1804_vm3, %v4682_v63  ;;  %1526 = vmatmul.mubr.f32.gmra.mrb[46].mxu0 %v873_v34  ;;  %4143 = vmatprep.subr.bf16.mxu0 %v6221_v18 }
 0x262   : > { %1826 = vst.msk [vmem:[#allocation2 + $0x59] sm:$0x1] %vm1804_vm3, %v4682_v63  ;;  %1827 = vst.msk [vmem:[#allocation2 + $0x71] sm:$0x1] %vm1804_vm3, %v4682_v63  ;;  %1530 = vmatprep.mubr.f32.mxu0 %v5547_v23  ;;  %4145 = vmatpush3.bf16.msra.mxu0 %v6221_v18  ;;  %v2692_v23 = vld [vmem:[%s7942_s3 + $0x210] sm:$0xff]  ;;  %v837_v45 = vpop.permute.xlu1 %836 }
 0x263   : > { %1828 = vst.msk [vmem:[#allocation2 + $0x89] sm:$0x1] %vm1804_vm3, %v4682_v63  ;;  %1829 = vst.msk [vmem:[#allocation2 + $0xa1] sm:$0x1] %vm1804_vm3, %v4682_v63  ;;  %v6234_v50 = vpack.c.bf16 %v2693_v41, %v2692_v23  ;;  %v878_v54 = vsel %vm653_vm1, %v5975_v12, %v837_v45 }
 0x264   : > { %1830 = vst.msk [vmem:[#allocation2 + $0xb9] sm:$0x1] %vm1804_vm3, %v4682_v63  ;;  %1831 = vst.msk [vmem:[#allocation2 + $0xd1] sm:$0x1] %vm1804_vm3, %v4682_v63 }
 0x265   : > { %1832 = vst.msk [vmem:[#allocation2 + $0xe9] sm:$0x1] %vm1804_vm3, %v4682_v63  ;;  %1833 = vst.msk [vmem:[#allocation2 + $0x101] sm:$0x1] %vm1804_vm3, %v4682_v63  ;;  %1531 = vmatmul.mubr.f32.gmra.mrb[48].mxu0 %v874_v14  ;;  %4147 = vmatprep.subr.bf16.mxu0 %v6234_v50 }
 0x266   : > { %1834 = vst.msk [vmem:[#allocation2 + $0x119] sm:$0x1] %vm1804_vm3, %v4682_v63  ;;  %1835 = vst.msk [vmem:[#allocation2 + $0x131] sm:$0x1] %vm1804_vm3, %v4682_v63  ;;  %1535 = vmatprep.mubr.f32.mxu0 %v5573_v53  ;;  %v833_v53 = vpop.permute.xlu0 %832  ;;  %4149 = vmatpush3.bf16.msra.mxu0 %v6234_v50  ;;  %v4500_v3 = vpop.permute.xlu1 %4499 }
 0x267   : > { %1836 = vst.msk [vmem:[#allocation2 + $0x149] sm:$0x1] %vm1804_vm3, %v4682_v63  ;;  %1837 = vst.msk [vmem:[#allocation2 + $0x161] sm:$0x1] %vm1804_vm3, %v4682_v63  ;;  %4151 = vmatprep.subr.bf16.mxu0 %v6251_v49  ;;  %v877_v6 = vsel %vm653_vm1, %v5961_v13, %v833_v53  ;;  %v4501_v59 = vunpack.i.l.bf16 %v4500_v3  ;;  %v4502_v4 = vunpack.i.h.bf16 %v4500_v3 }
 0x268   : > { %1838 = vst.msk [vmem:[#allocation2 + $0x179] sm:$0x1] %vm1804_vm3, %v4682_v63  ;;  %1839 = vst.msk [vmem:[#allocation2 + $0x191] sm:$0x1] %vm1804_vm3, %v4682_v63 }
 0x269   : > { %1805 = vst.msk [vmem:[#allocation2] sm:$0x1] %vm1804_vm3, %v4682_v63  ;;  %1822 = vst.msk [vmem:[#allocation2 + $0x198] sm:$0x1] %vm1804_vm3, %v4682_v63  ;;  %1536 = vmatmul.mubr.f32.gmra.mrb[50].mxu0 %v875_v38  ;;  %v688_v1 = vsel %vm653_vm1, %v5995_v21, %v4501_v59 }
 0x26a   : > { %8251 = vst [vmem:[#allocation43_spill] sm:$0xff] %v6221_v18  ;;  %8252 = vst [vmem:[#allocation45_spill] sm:$0xff] %v6234_v50  ;;  %1540 = vmatprep.mubr.f32.mxu0 %v5581_v62  ;;  %4153 = vmatpush3.bf16.msra.mxu0 %v6251_v49  ;;  %v2696_v62 = vld [vmem:[%s7942_s3 + $0x230] sm:$0xff]  ;;  %v841_v47 = vpop.permute.xlu0 %840 }
 0x26b   : > { %8253 = vst [vmem:[#allocation14_spill] sm:$0xff] %v6251_v49  ;;  %v6264_v48 = vpack.c.bf16 %v2697_v17, %v2696_v62  ;;  %v879_v37 = vsel %vm653_vm1, %v5989_v61, %v841_v47  ;;  %1799 = vst.msk [vmem:[#allocation2 + $0x10] sm:$0x3] %vm1798_vm4, %v4682_v63 }
 0x26c   : > { %1803 = vst.msk [vmem:[#allocation2 + $0x1a8] sm:$0x3] %vm1798_vm4, %v4682_v63 }
 0x26d   : > { %1541 = vmatmul.mubr.f32.gmra.mrb[52].mxu0 %v876_v26  ;;  %8254 = vst [vmem:[#allocation15_spill] sm:$0xff] %v6264_v48  ;;  %4155 = vmatprep.subr.bf16.mxu0 %v6264_v48  ;;  %1823 = vst.msk [vmem:[#allocation2 + $0x11] sm:$0x1] %vm1804_vm3, %v4682_v63 }
 0x26e   : > { %1545 = vmatprep.mubr.f32.mxu0 %v5596_v33  ;;  %v6266_v33 = vpop.f32.mrb[6].mxu1  ;;  %4157 = vmatpush3.bf16.msra.mxu0 %v6264_v48  ;;  %v4505_v13 = vpop.permute.xlu0 %4504  ;;  %1840 = vst.msk [vmem:[#allocation2 + $0x1a9] sm:$0x1] %vm1804_vm3, %v4682_v63 }
 0x26f   : > { %v6270_v15 = vpop.f32.mrb[7].mxu1  ;;  %v4506_v19 = vunpack.i.l.bf16 %v4505_v13  ;;  %v4507_v27 = vunpack.i.h.bf16 %v4505_v13 }
 0x270   : > { %v6280_v36 = vpop.f32.mrb[8].mxu1 }
 0x271   : > { %1546 = vmatmul.mubr.f32.gmra.mrb[54].mxu0 %v877_v6  ;;  %v6282_v16 = vpop.f32.mrb[9].mxu1  ;;  %v689_v12 = vsel %vm653_vm1, %v5998_v2, %v4506_v19  ;;  %v881_v21 = vsel %vm653_vm1, %v6025_v35, %v4507_v27 }
 0x272   : > { %1550 = vmatprep.mubr.f32.mxu0 %v8255_v10  ;;  %v6290_v61 = vpop.f32.mrb[10].mxu1 }
 0x273   : > { %v6292_v31 = vpop.f32.mrb[11].mxu1 }
 0x274   : > { %v6294_v5 = vpop.f32.mrb[12].mxu1 }
 0x275   : > { %1551 = vmatmul.mubr.f32.gmra.mrb[56].mxu0 %v878_v54  ;;  %v6296_v7 = vpop.f32.mrb[13].mxu1 }
 0x276   : > { %1555 = vmatprep.mubr.f32.mxu0 %v5782_v51  ;;  %v880_v51 = vsel %vm653_vm1, %v6023_v29, %v4502_v4  ;;  %v6298_v30 = vpop.f32.mrb[14].mxu1 }
 0x277   : > { %v6300_v2 = vpop.f32.mrb[15].mxu1 }
 0x278   : > { %v6302_v46 = vpop.f32.mrb[16].mxu1 }
 0x279   : > { %1556 = vmatmul.mubr.f32.gmra.mrb[58].mxu0 %v879_v37  ;;  %v6304_v29 = vpop.f32.mrb[17].mxu1 }
 0x27a   : > { %1560 = vmatprep.mubr.f32.mxu0 %v688_v1  ;;  %v6306_v60 = vpop.f32.mrb[18].mxu1 }
 0x27b   : > { %v6310_v35 = vpop.f32.mrb[19].mxu1 }
 0x27c   : > { %v6316_v39 = vpop.f32.mrb[20].mxu1 }
 0x27d   : > { %1561 = vmatmul.mubr.f32.gmra.mrb[60].mxu0 %v880_v51  ;;  %v6318_v28 = vpop.f32.mrb[21].mxu1 }
 0x27e   : > { %1565 = vmatprep.mubr.f32.mxu0 %v689_v12  ;;  %v6320_v24 = vpop.f32.mrb[22].mxu1 }
 0x27f   : > { %v6322_v0 = vpop.f32.mrb[23].mxu1 }
 0x281   : > { %1566 = vmatmul.mubr.f32.gmra.mrb[62].mxu0 %v881_v21 }
 0x288   : > { %v6324_v22 = vpop.f32.mrb[24].mxu1 }
 0x289   : > { %v6326_v43 = vpop.f32.mrb[25].mxu1 }
 0x28c   : > { %v6328_v25 = vpop.f32.mrb[26].mxu1 }
 0x28d   : > { %v6330_v57 = vpop.f32.mrb[27].mxu1 }
 0x290   : > { %v6332_v34 = vpop.f32.mrb[28].mxu1 }
 0x291   : > { %v6334_v40 = vpop.f32.mrb[29].mxu1 }
 0x294   : > { %v6336_v63 = vpop.f32.mrb[30].mxu1 }
 0x295   : > { %v6338_v32 = vpop.f32.mrb[31].mxu1 }
 0x2d8   : > { %v1412_v14 = vpop.f32.mrb[0].mxu0 }
 0x2d9   : > { %v4166_v52 = vadd.f32 %v6343_v42, %v1412_v14  ;;  %v1414_v23 = vpop.f32.mrb[1].mxu0 }
 0x2db   : > { %v1638_v41 = vadd.f32 %v4166_v52, %v6125_v8 }
 0x2dc   : > { %v1417_v38 = vpop.f32.mrb[2].mxu0 }
 0x2dd   : > { %1842 = vst.msk [vmem:[#allocation2 + $0x19] sm:$0xff] %vm653_vm1, %v1638_v41  ;;  %v4167_v53 = vadd.f32 %v6343_v42, %v1417_v38  ;;  %v1419_v56 = vpop.f32.mrb[3].mxu0 }
 0x2df   : > { %v1643_v44 = vadd.f32 %v4167_v53, %v6123_v55 }
 0x2e0   : > { %v1422_v45 = vpop.f32.mrb[4].mxu0 }
 0x2e1   : > { %1843 = vst.msk [vmem:[#allocation2 + $0x21] sm:$0xff] %vm653_vm1, %v1643_v44  ;;  %v4168_v26 = vadd.f32 %v6343_v42, %v1422_v45  ;;  %v1424_v62 = vpop.f32.mrb[5].mxu0 }
 0x2e3   : > { %v1648_v17 = vadd.f32 %v4168_v26, %v6211_v58 }
 0x2e4   : > { %v1427_v47 = vpop.f32.mrb[6].mxu0  ;;  %v6355_v3 = vld [vmem:[#allocation2 + $0x18] sm:$0xff] }
 0x2e5   : > { %1844 = vst.msk [vmem:[#allocation2 + $0x31] sm:$0xff] %vm653_vm1, %v1648_v17  ;;  %v4169_v8 = vadd.f32 %v6343_v42, %v1427_v47  ;;  %v1429_v6 = vpop.f32.mrb[7].mxu0  ;;  %v1987_v4 = vrot.slane %v6355_v3, 1 }
 0x2e7   : > { %v1653_v10 = vadd.f32 %v4169_v8, %v6208_v20 }
 0x2e8   : > { %v1432_v59 = vpop.f32.mrb[8].mxu0  ;;  %v6358_v55 = vld [vmem:[#allocation2 + $0x20] sm:$0xff]  ;;  %v1879_v54 = vld [vmem:[#allocation2 + $0x28] sm:$0x3] }
 0x2e9   : > { %1845 = vst.msk [vmem:[#allocation2 + $0x39] sm:$0xff] %vm653_vm1, %v1653_v10  ;;  %v4170_v13 = vadd.f32 %v6343_v42, %v1432_v59  ;;  %v1434_v19 = vpop.f32.mrb[9].mxu0  ;;  %v1988_v58 = vrot.slane %v6358_v55, 1  ;;  %v1990_v1 = vrot.slane %v1879_v54, 1 }
 0x2eb   : > { %v1658_v37 = vadd.f32 %v4170_v13, %v6240_v11  ;;  %v1991_v12 = vsel %vm331_vm0, %v1988_v58, %v1990_v1  ;;  %v1989_v20 = vsel %vm331_vm0, %v1987_v4, %v1988_v58 }
 0x2ec   : > { %v1437_v27 = vpop.f32.mrb[10].mxu0  ;;  %2078 = vrot.lane.b32.xlu0 %v1991_v12, %s4680_s10  ;;  %2076 = vrot.lane.b32.xlu1 %v1989_v20, %s4680_s10  ;;  %v6371_v14 = vld [vmem:[#allocation2 + $0x30] sm:$0xff] }
 0x2ed   : > { %1846 = vst.msk [vmem:[#allocation2 + $0x49] sm:$0xff] %vm653_vm1, %v1658_v37  ;;  %v4171_v51 = vadd.f32 %v6343_v42, %v1437_v27  ;;  %v1439_v21 = vpop.f32.mrb[11].mxu0  ;;  %v2190_v41 = vrot.slane %v6371_v14, 2  ;;  %v1992_v53 = vrot.slane %v6371_v14, 1 }
 0x2ef   : > { %v1663_v52 = vadd.f32 %v4171_v51, %v6236_v9 }
 0x2f0   : > { %v1442_v23 = vpop.f32.mrb[12].mxu0  ;;  %v6374_v11 = vld [vmem:[#allocation2 + $0x38] sm:$0xff]  ;;  %v1882_v38 = vld [vmem:[#allocation2 + $0x40] sm:$0x3] }
 0x2f1   : > { %1847 = vst.msk [vmem:[#allocation2 + $0x51] sm:$0xff] %vm653_vm1, %v1663_v52  ;;  %v4172_v56 = vadd.f32 %v6343_v42, %v1442_v23  ;;  %v1444_v44 = vpop.f32.mrb[13].mxu0  ;;  %v2191_v45 = vrot.slane %v6374_v11, 2  ;;  %v1993_v26 = vrot.slane %v6374_v11, 1  ;;  %v1995_v62 = vrot.slane %v1882_v38, 1 }
 0x2f2   : > { %v2193_v17 = vrot.slane %v1882_v38, 2 }
 0x2f3   : > { %v1668_v9 = vadd.f32 %v4172_v56, %v6270_v15  ;;  %v6384_v47 = vsel %vm530_vm2, %v2190_v41, %v2191_v45  ;;  %v1996_v8 = vsel %vm331_vm0, %v1993_v26, %v1995_v62  ;;  %v1994_v6 = vsel %vm331_vm0, %v1992_v53, %v1993_v26 }
 0x2f4   : > { %v1447_v10 = vpop.f32.mrb[14].mxu0  ;;  %3886 = vmatprep.mubr.msk.f32.mxu0 %vm653_vm1, %v6384_v47  ;;  %2082 = vrot.lane.b32.xlu0 %v1996_v8, %s4680_s10  ;;  %v6392_v59 = vsel %vm530_vm2, %v2191_v45, %v2193_v17  ;;  %v6399_v13 = vld [vmem:[#allocation2 + $0x48] sm:$0xff] }
 0x2f5   : > { %1848 = vst.msk [vmem:[#allocation2 + $0x61] sm:$0xff] %vm653_vm1, %v1668_v9  ;;  %v4173_v15 = vadd.f32 %v6343_v42, %v1447_v10  ;;  %2080 = vrot.lane.b32.xlu1 %v1994_v6, %s4680_s10  ;;  %v1449_v54 = vpop.f32.mrb[15].mxu0  ;;  %3887 = vmatmul.mubr.msk.f32.vlgmr.msra.gmra.mrb[64].mxu0 %vm653_vm1, %v6392_v59  ;;  %v2195_v4 = vrot.slane %v6399_v13, 2  ;;  %v1997_v12 = vrot.slane %v6399_v13, 1 }
 0x2f7   : > { %v1673_v19 = vadd.f32 %v4173_v15, %v6266_v33 }
 0x2f8   : > { %v1452_v58 = vpop.f32.mrb[16].mxu0  ;;  %v6402_v1 = vld [vmem:[#allocation2 + $0x50] sm:$0xff]  ;;  %v1885_v37 = vld [vmem:[#allocation2 + $0x58] sm:$0x3] }
 0x2f9   : > { %1849 = vst.msk [vmem:[#allocation2 + $0x69] sm:$0xff] %vm653_vm1, %v1673_v19  ;;  %v4174_v20 = vadd.f32 %v6343_v42, %v1452_v58  ;;  %v1454_v27 = vpop.f32.mrb[17].mxu0  ;;  %v2196_v51 = vrot.slane %v6402_v1, 2  ;;  %v1998_v21 = vrot.slane %v6402_v1, 1  ;;  %v2000_v52 = vrot.slane %v1885_v37, 1 }
 0x2fa   : > { %v2198_v23 = vrot.slane %v1885_v37, 2 }
 0x2fb   : > { %v1678_v33 = vadd.f32 %v4174_v20, %v6282_v16  ;;  %v6412_v41 = vsel %vm530_vm2, %v2195_v4, %v2196_v51  ;;  %v2001_v38 = vsel %vm331_vm0, %v1998_v21, %v2000_v52  ;;  %v1999_v53 = vsel %vm331_vm0, %v1997_v12, %v1998_v21 }
 0x2fc   : > { %v1457_v56 = vpop.f32.mrb[18].mxu0  ;;  %3889 = vmatprep.mubr.msk.f32.mxu0 %vm653_vm1, %v6412_v41  ;;  %2086 = vrot.lane.b32.xlu0 %v2001_v38, %s4680_s10  ;;  %v6420_v44 = vsel %vm530_vm2, %v2196_v51, %v2198_v23  ;;  %v6427_v26 = vld [vmem:[#allocation2 + $0x60] sm:$0xff] }
 0x2fd   : > { %1850 = vst.msk [vmem:[#allocation2 + $0x79] sm:$0xff] %vm653_vm1, %v1678_v33  ;;  %v4175_v16 = vadd.f32 %v6343_v42, %v1457_v56  ;;  %2084 = vrot.lane.b32.xlu1 %v1999_v53, %s4680_s10  ;;  %v1459_v45 = vpop.f32.mrb[19].mxu0  ;;  %3890 = vmatmul.mubr.msk.f32.gmra.mrb[66].mxu0 %vm653_vm1, %v6420_v44  ;;  %v2200_v8 = vrot.slane %v6427_v26, 2  ;;  %v2002_v10 = vrot.slane %v6427_v26, 1 }
 0x2ff   : > { %v1683_v62 = vadd.f32 %v4175_v16, %v6280_v36 }
 0x300   : > { %v1462_v17 = vpop.f32.mrb[20].mxu0  ;;  %v6430_v9 = vld [vmem:[#allocation2 + $0x68] sm:$0xff]  ;;  %v1888_v6 = vld [vmem:[#allocation2 + $0x70] sm:$0x3] }
 0x301   : > { %1851 = vst.msk [vmem:[#allocation2 + $0x81] sm:$0xff] %vm653_vm1, %v1683_v62  ;;  %v4176_v15 = vadd.f32 %v6343_v42, %v1462_v17  ;;  %v1464_v54 = vpop.f32.mrb[21].mxu0  ;;  %v2201_v19 = vrot.slane %v6430_v9, 2  ;;  %v2003_v58 = vrot.slane %v6430_v9, 1  ;;  %v2005_v4 = vrot.slane %v1888_v6, 1 }
 0x302   : > { %v2203_v37 = vrot.slane %v1888_v6, 2 }
 0x303   : > { %v1688_v36 = vadd.f32 %v4176_v15, %v6292_v31  ;;  %v6440_v12 = vsel %vm530_vm2, %v2200_v8, %v2201_v19  ;;  %v2006_v20 = vsel %vm331_vm0, %v2003_v58, %v2005_v4  ;;  %v2004_v27 = vsel %vm331_vm0, %v2002_v10, %v2003_v58 }
 0x304   : > { %v1467_v51 = vpop.f32.mrb[22].mxu0  ;;  %3892 = vmatprep.mubr.msk.f32.mxu0 %vm653_vm1, %v6440_v12  ;;  %2090 = vrot.lane.b32.xlu0 %v2006_v20, %s4680_s10  ;;  %v6448_v21 = vsel %vm530_vm2, %v2201_v19, %v2203_v37  ;;  %v6455_v23 = vld [vmem:[#allocation2 + $0x78] sm:$0xff] }
 0x305   : > { %1852 = vst.msk [vmem:[#allocation2 + $0x91] sm:$0xff] %vm653_vm1, %v1688_v36  ;;  %v4177_v31 = vadd.f32 %v6343_v42, %v1467_v51  ;;  %2088 = vrot.lane.b32.xlu1 %v2004_v27, %s4680_s10  ;;  %v1469_v52 = vpop.f32.mrb[23].mxu0  ;;  %3893 = vmatmul.mubr.msk.f32.gmra.mrb[68].mxu0 %vm653_vm1, %v6448_v21  ;;  %v2205_v56 = vrot.slane %v6455_v23, 2  ;;  %v2007_v45 = vrot.slane %v6455_v23, 1 }
 0x307   : > { %v1693_v33 = vadd.f32 %v4177_v31, %v6290_v61 }
 0x308   : > { %v1472_v38 = vpop.f32.mrb[24].mxu0  ;;  %v6458_v53 = vld [vmem:[#allocation2 + $0x80] sm:$0xff]  ;;  %v1891_v16 = vld [vmem:[#allocation2 + $0x88] sm:$0x3] }
 0x309   : > { %1853 = vst.msk [vmem:[#allocation2 + $0x99] sm:$0xff] %vm653_vm1, %v1693_v33  ;;  %v4178_v62 = vadd.f32 %v6343_v42, %v1472_v38  ;;  %v1474_v17 = vpop.f32.mrb[25].mxu0  ;;  %v2206_v8 = vrot.slane %v6458_v53, 2  ;;  %v2008_v6 = vrot.slane %v6458_v53, 1  ;;  %v2010_v10 = vrot.slane %v1891_v16, 1 }
 0x30a   : > { %v2208_v15 = vrot.slane %v1891_v16, 2 }
 0x30b   : > { %v1698_v61 = vadd.f32 %v4178_v62, %v6296_v7  ;;  %v6468_v54 = vsel %vm530_vm2, %v2205_v56, %v2206_v8  ;;  %v2011_v19 = vsel %vm331_vm0, %v2008_v6, %v2010_v10  ;;  %v2009_v58 = vsel %vm331_vm0, %v2007_v45, %v2008_v6 }
 0x30c   : > { %v1477_v4 = vpop.f32.mrb[26].mxu0  ;;  %3895 = vmatprep.mubr.msk.f32.mxu0 %vm653_vm1, %v6468_v54  ;;  %2094 = vrot.lane.b32.xlu0 %v2011_v19, %s4680_s10  ;;  %v6476_v37 = vsel %vm530_vm2, %v2206_v8, %v2208_v15  ;;  %v6483_v20 = vld [vmem:[#allocation2 + $0x90] sm:$0xff] }
 0x30d   : > { %1854 = vst.msk [vmem:[#allocation2 + $0xa9] sm:$0xff] %vm653_vm1, %v1698_v61  ;;  %v4179_v7 = vadd.f32 %v6343_v42, %v1477_v4  ;;  %2092 = vrot.lane.b32.xlu1 %v2009_v58, %s4680_s10  ;;  %v1479_v36 = vpop.f32.mrb[27].mxu0  ;;  %3896 = vmatmul.mubr.msk.f32.gmra.mrb[70].mxu0 %vm653_vm1, %v6476_v37  ;;  %v2210_v52 = vrot.slane %v6483_v20, 2  ;;  %v2012_v38 = vrot.slane %v6483_v20, 1 }
 0x30f   : > { %v1703_v27 = vadd.f32 %v4179_v7, %v6294_v5 }
 0x310   : > { %v1482_v51 = vpop.f32.mrb[28].mxu0  ;;  %v6486_v31 = vld [vmem:[#allocation2 + $0x98] sm:$0xff]  ;;  %v1894_v33 = vld [vmem:[#allocation2 + $0xa0] sm:$0x3] }
 0x311   : > { %1855 = vst.msk [vmem:[#allocation2 + $0xb1] sm:$0xff] %vm653_vm1, %v1703_v27  ;;  %v4180_v56 = vadd.f32 %v6343_v42, %v1482_v51  ;;  %v1484_v16 = vpop.f32.mrb[29].mxu0  ;;  %v2211_v45 = vrot.slane %v6486_v31, 2  ;;  %v2013_v62 = vrot.slane %v6486_v31, 1  ;;  %v2015_v17 = vrot.slane %v1894_v33, 1 }
 0x312   : > { %v2213_v8 = vrot.slane %v1894_v33, 2 }
 0x313   : > { %v1708_v5 = vadd.f32 %v4180_v56, %v6300_v2  ;;  %v6496_v6 = vsel %vm530_vm2, %v2210_v52, %v2211_v45  ;;  %v2016_v10 = vsel %vm331_vm0, %v2013_v62, %v2015_v17  ;;  %v2014_v15 = vsel %vm331_vm0, %v2012_v38, %v2013_v62  ;;  %v2626_v38 = vld [vmem:[%s7942_s3] sm:$0xff]  ;;  %v2627_v17 = vld [vmem:[%s7942_s3 + $0x8] sm:$0xff] }
 0x314   : > { %v1487_v61 = vpop.f32.mrb[30].mxu0  ;;  %3898 = vmatprep.mubr.msk.f32.mxu0 %vm653_vm1, %v6496_v6  ;;  %2098 = vrot.lane.b32.xlu0 %v2016_v10, %s4680_s10  ;;  %v6504_v19 = vsel %vm530_vm2, %v2211_v45, %v2213_v8  ;;  %v6506_v58 = vld [vmem:[#allocation2 + $0xa8] sm:$0xff]  ;;  %v4047_v8 = vpack.c.bf16 %v2627_v17, %v2626_v38 }
 0x315   : > { %1856 = vst.msk [vmem:[#allocation2 + $0xc1] sm:$0xff] %vm653_vm1, %v1708_v5  ;;  %v4181_v2 = vadd.f32 %v6343_v42, %v1487_v61  ;;  %2096 = vrot.lane.b32.xlu1 %v2014_v15, %s4680_s10  ;;  %v1489_v4 = vpop.f32.mrb[31].mxu0  ;;  %3899 = vmatmul.mubr.msk.f32.gmra.mrb[72].mxu0 %vm653_vm1, %v6504_v19  ;;  %v2215_v36 = vrot.slane %v6506_v58, 2  ;;  %v2017_v52 = vrot.slane %v6506_v58, 1 }
 0x316   : > { %v2629_v4 = vld [vmem:[%s7942_s3 + $0x18] sm:$0xff]  ;;  %4048 = vmatpush1.bf16.msra.mxu1 %v4047_v8 }
 0x317   : > { %v1713_v7 = vadd.f32 %v4181_v2, %v6298_v30  ;;  %v2628_v2 = vld [vmem:[%s7942_s3 + $0x10] sm:$0xff] }
 0x318   : > { %v1492_v27 = vpop.f32.mrb[32].mxu0  ;;  %v6515_v51 = vld [vmem:[#allocation2 + $0xb0] sm:$0xff]  ;;  %v1897_v33 = vld [vmem:[#allocation2 + $0xb8] sm:$0x3] }
 0x319   : > { %1857 = vst.msk [vmem:[#allocation2 + $0xc9] sm:$0xff] %vm653_vm1, %v1713_v7  ;;  %v4182_v56 = vadd.f32 %v6343_v42, %v1492_v27  ;;  %v1494_v16 = vpop.f32.mrb[33].mxu0  ;;  %v2216_v45 = vrot.slane %v6515_v51, 2  ;;  %v2018_v30 = vrot.slane %v6515_v51, 1  ;;  %v2218_v62 = vrot.slane %v1897_v33, 2 }
 0x31a   : > { %v2020_v38 = vrot.slane %v1897_v33, 1  ;;  %v2630_v16 = vld [vmem:[%s7942_s3 + $0x20] sm:$0xff] }
 0x31b   : > { %v1718_v5 = vadd.f32 %v4182_v56, %v6304_v29  ;;  %v6530_v10 = vsel %vm530_vm2, %v2215_v36, %v2216_v45  ;;  %v2019_v15 = vsel %vm331_vm0, %v2017_v52, %v2018_v30  ;;  %v6534_v61 = vsel %vm530_vm2, %v2216_v45, %v2218_v62  ;;  %v2631_v45 = vld [vmem:[%s7942_s3 + $0x28] sm:$0xff] }
 0x31c   : > { %8256 = vst [vmem:[#allocation23_spill] sm:$0xff] %v6534_v61  ;;  %v1497_v7 = vpop.f32.mrb[34].mxu0  ;;  %3901 = vmatprep.mubr.msk.f32.mxu0 %vm653_vm1, %v6530_v10  ;;  %2100 = vrot.lane.b32.xlu1 %v2019_v15, %s4680_s10  ;;  %v6549_v27 = vld [vmem:[#allocation2 + $0xc0] sm:$0xff]  ;;  %v4050_v52 = vpack.c.bf16 %v2629_v4, %v2628_v2  ;;  %v8257_v56 = vmov 0.0|0.0   ;;  %v4053_v2 = vpack.c.bf16 %v2631_v45, %v2630_v16  ;;  %v2632_v16 = vld [vmem:[%s7942_s3 + $0x30] sm:$0xff]  ;;  %v2633_v45 = vld [vmem:[%s7942_s3 + $0x38] sm:$0xff] }
 0x31d   : > { %1858 = vst.msk [vmem:[#allocation2 + $0xd9] sm:$0xff] %vm653_vm1, %v1718_v5  ;;  %v4183_v29 = vadd.f32 %v6343_v42, %v1497_v7  ;;  %v1499_v36 = vpop.f32.mrb[35].mxu0  ;;  %3902 = vmatmul.mubr.msk.f32.gmra.mrb[74].mxu0 %vm653_vm1, %v6534_v61  ;;  %4049 = vmatprep.subr.bf16.mxu1 %v8257_v56  ;;  %v2220_v15 = vrot.slane %v6549_v27, 2  ;;  %v2022_v33 = vrot.slane %v6549_v27, 1 }
 0x31e   : > { %4051 = vmatpush1.bf16.msra.mxu1 %v4050_v52 }
 0x31f   : > { %v1723_v62 = vadd.f32 %v4183_v29, %v6302_v46  ;;  %v2021_v29 = vsel %vm331_vm0, %v2018_v30, %v2020_v38  ;;  %4052 = vmatprep.subr.bf16.mxu1 %v8257_v56 }
 0x320   : > { %v1502_v17 = vpop.f32.mrb[36].mxu0  ;;  %v6559_v5 = vld [vmem:[#allocation2 + $0xc8] sm:$0xff]  ;;  %v6562_v8 = vld [vmem:[#allocation2 + $0xd0] sm:$0x3] }
 0x321   : > { %1859 = vst.msk [vmem:[#allocation2 + $0xe1] sm:$0xff] %vm653_vm1, %v1723_v62  ;;  %v4184_v4 = vadd.f32 %v6343_v42, %v1502_v17  ;;  %v1504_v7 = vpop.f32.mrb[37].mxu0  ;;  %v2221_v36 = vrot.slane %v6559_v5, 2  ;;  %v2223_v48 = vrot.slane %v6562_v8, 2  ;;  %v8046_v46 = vrot.slane %v6559_v5, 1 }
 0x322   : > { %4054 = vmatpush1.bf16.msra.mxu1 %v4053_v2 }
 0x323   : > { %v1728_v62 = vadd.f32 %v4184_v4, %v6310_v35  ;;  %v6580_v17 = vsel %vm530_vm2, %v2220_v15, %v2221_v36  ;;  %v6583_v7 = vsel %vm530_vm2, %v2221_v36, %v2223_v48  ;;  %v2024_v30 = vsel %vm331_vm0, %v2022_v33, %v8046_v46  ;;  %v2634_v15 = vld [vmem:[%s7942_s3 + $0x40] sm:$0xff]  ;;  %v2635_v33 = vld [vmem:[%s7942_s3 + $0x48] sm:$0xff]  ;;  %4055 = vmatprep.subr.bf16.mxu1 %v8257_v56 }
 0x324   : > { %8258 = vst [vmem:[#allocation56_spill] sm:$0xff] %v6580_v17  ;;  %8259 = vst [vmem:[#allocation57_spill] sm:$0xff] %v6583_v7  ;;  %v1507_v52 = vpop.f32.mrb[38].mxu0  ;;  %3904 = vmatprep.mubr.msk.f32.mxu0 %vm653_vm1, %v6580_v17  ;;  %v4508_v38 = vpack.i.bf16 %v2024_v30, %v2021_v29  ;;  %v4056_v48 = vpack.c.bf16 %v2633_v45, %v2632_v16  ;;  %v6601_v4 = vld [vmem:[#allocation2 + $0xd8] sm:$0xff]  ;;  %v4059_v16 = vpack.c.bf16 %v2635_v33, %v2634_v15 }
 0x325   : > { %1860 = vst.msk [vmem:[#allocation2 + $0xf1] sm:$0xff] %vm653_vm1, %v1728_v62  ;;  %v4185_v49 = vadd.f32 %v6343_v42, %v1507_v52  ;;  %v1509_v35 = vpop.f32.mrb[39].mxu0  ;;  %3905 = vmatmul.mubr.msk.f32.gmra.mrb[76].mxu0 %vm653_vm1, %v6583_v7  ;;  %v2225_v52 = vrot.slane %v6601_v4, 2 }
 0x326   : > { %4509 = vrot.lane.b32.xlu0 %v4508_v38, %s4680_s10  ;;  %4057 = vmatpush1.bf16.msra.mxu1 %v4056_v48 }
 0x327   : > { %v1733_v36 = vadd.f32 %v4185_v49, %v6306_v60  ;;  %4058 = vmatprep.subr.bf16.mxu1 %v8257_v56  ;;  %v2636_v49 = vld [vmem:[%s7942_s3 + $0x50] sm:$0xff]  ;;  %v2637_v60 = vld [vmem:[%s7942_s3 + $0x58] sm:$0xff] }
 0x328   : > { %v1512_v29 = vpop.f32.mrb[40].mxu0  ;;  %v6605_v62 = vld [vmem:[#allocation2 + $0xe0] sm:$0xff]  ;;  %v6607_v2 = vld [vmem:[#allocation2 + $0xe8] sm:$0x3] }
 0x329   : > { %1861 = vst.msk [vmem:[#allocation2 + $0xf9] sm:$0xff] %vm653_vm1, %v1733_v36  ;;  %v4186_v45 = vadd.f32 %v6343_v42, %v1512_v29  ;;  %v1514_v30 = vpop.f32.mrb[41].mxu0  ;;  %v2226_v38 = vrot.slane %v6605_v62, 2  ;;  %v2228_v35 = vrot.slane %v6607_v2, 2 }
 0x32a   : > { %4060 = vmatpush1.bf16.msra.mxu1 %v4059_v16 }
 0x32b   : > { %v1738_v15 = vadd.f32 %v4186_v45, %v6318_v28  ;;  %v6623_v33 = vsel %vm530_vm2, %v2225_v52, %v2226_v38  ;;  %v6626_v36 = vsel %vm530_vm2, %v2226_v38, %v2228_v35  ;;  %v4062_v28 = vpack.c.bf16 %v2637_v60, %v2636_v49  ;;  %v2638_v45 = vld [vmem:[%s7942_s3 + $0x60] sm:$0xff]  ;;  %v2639_v52 = vld [vmem:[%s7942_s3 + $0x68] sm:$0xff]  ;;  %4061 = vmatprep.subr.bf16.mxu1 %v8257_v56 }
 0x32c   : > { %8260 = vst [vmem:[#allocation53_spill] sm:$0xff] %v6623_v33  ;;  %8261 = vst [vmem:[#allocation24_spill] sm:$0xff] %v6626_v36  ;;  %v1517_v29 = vpop.f32.mrb[42].mxu0  ;;  %3907 = vmatprep.mubr.msk.f32.mxu0 %vm653_vm1, %v6623_v33  ;;  %v6640_v38 = vld [vmem:[#allocation2 + $0xf0] sm:$0xff]  ;;  %v4065_v16 = vpack.c.bf16 %v2639_v52, %v2638_v45 }
 0x32d   : > { %1862 = vst.msk [vmem:[#allocation2 + $0x109] sm:$0xff] %vm653_vm1, %v1738_v15  ;;  %v4187_v48 = vadd.f32 %v6343_v42, %v1517_v29  ;;  %v1519_v30 = vpop.f32.mrb[43].mxu0  ;;  %3908 = vmatmul.mubr.msk.f32.gmra.mrb[78].mxu0 %vm653_vm1, %v6626_v36  ;;  %v2230_v46 = vrot.slane %v6640_v38, 2 }
 0x32e   : > { %4063 = vmatpush1.bf16.msra.mxu1 %v4062_v28 }
 0x32f   : > { %v1743_v35 = vadd.f32 %v4187_v48, %v6316_v39  ;;  %4064 = vmatprep.subr.bf16.mxu1 %v8257_v56  ;;  %v2640_v39 = vld [vmem:[%s7942_s3 + $0x70] sm:$0xff]  ;;  %v2641_v48 = vld [vmem:[%s7942_s3 + $0x78] sm:$0xff] }
 0x330   : > { %v1522_v15 = vpop.f32.mrb[44].mxu0  ;;  %v6644_v29 = vld [vmem:[#allocation2 + $0xf8] sm:$0xff]  ;;  %v6646_v30 = vld [vmem:[#allocation2 + $0x100] sm:$0x3] }
 0x331   : > { %1863 = vst.msk [vmem:[#allocation2 + $0x111] sm:$0xff] %vm653_vm1, %v1743_v35  ;;  %v4188_v49 = vadd.f32 %v6343_v42, %v1522_v15  ;;  %v1524_v60 = vpop.f32.mrb[45].mxu0  ;;  %v2231_v50 = vrot.slane %v6644_v29, 2  ;;  %v2233_v36 = vrot.slane %v6646_v30, 2 }
 0x332   : > { %4066 = vmatpush1.bf16.msra.mxu1 %v4065_v16 }
 0x333   : > { %v1748_v45 = vadd.f32 %v4188_v49, %v6322_v0  ;;  %v6662_v52 = vsel %vm530_vm2, %v2230_v46, %v2231_v50  ;;  %v6665_v35 = vsel %vm530_vm2, %v2231_v50, %v2233_v36  ;;  %v4068_v0 = vpack.c.bf16 %v2641_v48, %v2640_v39  ;;  %v2642_v46 = vld [vmem:[%s7942_s3 + $0x80] sm:$0xff]  ;;  %v2643_v50 = vld [vmem:[%s7942_s3 + $0x88] sm:$0xff]  ;;  %4067 = vmatprep.subr.bf16.mxu1 %v8257_v56 }
 0x334   : > { %8262 = vst [vmem:[#allocation55_spill] sm:$0xff] %v6662_v52  ;;  %8263 = vst [vmem:[#allocation26_spill] sm:$0xff] %v6665_v35  ;;  %v1527_v15 = vpop.f32.mrb[46].mxu0  ;;  %3910 = vmatprep.mubr.msk.f32.mxu0 %vm653_vm1, %v6662_v52  ;;  %v6679_v36 = vld [vmem:[#allocation2 + $0x108] sm:$0xff]  ;;  %v4071_v16 = vpack.c.bf16 %v2643_v50, %v2642_v46 }
 0x335   : > { %1864 = vst.msk [vmem:[#allocation2 + $0x121] sm:$0xff] %vm653_vm1, %v1748_v45  ;;  %v4189_v28 = vadd.f32 %v6343_v42, %v1527_v15  ;;  %v1529_v60 = vpop.f32.mrb[47].mxu0  ;;  %3911 = vmatmul.mubr.msk.f32.gmra.mrb[80].mxu0 %vm653_vm1, %v6665_v35  ;;  %v2235_v35 = vrot.slane %v6679_v36, 2 }
 0x336   : > { %4069 = vmatpush1.bf16.msra.mxu1 %v4068_v0 }
 0x337   : > { %v1753_v49 = vadd.f32 %v4189_v28, %v6320_v24  ;;  %4070 = vmatprep.subr.bf16.mxu1 %v8257_v56  ;;  %v2644_v24 = vld [vmem:[%s7942_s3 + $0x90] sm:$0xff]  ;;  %v2645_v28 = vld [vmem:[%s7942_s3 + $0x98] sm:$0xff] }
 0x338   : > { %v1532_v45 = vpop.f32.mrb[48].mxu0  ;;  %v6683_v15 = vld [vmem:[#allocation2 + $0x110] sm:$0xff]  ;;  %v6685_v60 = vld [vmem:[#allocation2 + $0x118] sm:$0x3] }
 0x339   : > { %1865 = vst.msk [vmem:[#allocation2 + $0x129] sm:$0xff] %vm653_vm1, %v1753_v49  ;;  %v4190_v39 = vadd.f32 %v6343_v42, %v1532_v45  ;;  %v1534_v48 = vpop.f32.mrb[49].mxu0  ;;  %v2236_v52 = vrot.slane %v6683_v15, 2  ;;  %v2238_v33 = vrot.slane %v6685_v60, 2 }
 0x33a   : > { %4072 = vmatpush1.bf16.msra.mxu1 %v4071_v16 }
 0x33b   : > { %v1758_v46 = vadd.f32 %v4190_v39, %v6326_v43  ;;  %v6701_v50 = vsel %vm530_vm2, %v2235_v35, %v2236_v52  ;;  %v6704_v49 = vsel %vm530_vm2, %v2236_v52, %v2238_v33  ;;  %v4074_v43 = vpack.c.bf16 %v2645_v28, %v2644_v24  ;;  %4073 = vmatprep.subr.bf16.mxu1 %v8257_v56  ;;  %v2646_v33 = vld [vmem:[%s7942_s3 + $0xa0] sm:$0xff]  ;;  %v2647_v52 = vld [vmem:[%s7942_s3 + $0xa8] sm:$0xff]  ;;  %v2648_v24 = vld [vmem:[%s7942_s3 + $0xb0] sm:$0xff] }
 0x33c   : > { %8264 = vst [vmem:[#allocation29_spill] sm:$0xff] %v6701_v50  ;;  %8265 = vst [vmem:[#allocation36_spill] sm:$0xff] %v6704_v49  ;;  %v1537_v45 = vpop.f32.mrb[50].mxu0  ;;  %3913 = vmatprep.mubr.msk.f32.mxu0 %vm653_vm1, %v6701_v50  ;;  %v4077_v16 = vpack.c.bf16 %v2647_v52, %v2646_v33  ;;  %v2649_v28 = vld [vmem:[%s7942_s3 + $0xb8] sm:$0xff] }
 0x33d   : > { %1866 = vst.msk [vmem:[#allocation2 + $0x139] sm:$0xff] %vm653_vm1, %v1758_v46  ;;  %v4191_v0 = vadd.f32 %v6343_v42, %v1537_v45  ;;  %v1539_v48 = vpop.f32.mrb[51].mxu0  ;;  %3914 = vmatmul.mubr.msk.f32.gmra.mrb[82].mxu0 %vm653_vm1, %v6704_v49 }
 0x33e   : > { %4075 = vmatpush1.bf16.msra.mxu1 %v4074_v43  ;;  %v4080_v43 = vpack.c.bf16 %v2649_v28, %v2648_v24  ;;  %v2653_v24 = vld [vmem:[%s7942_s3 + $0xd8] sm:$0xff] }
 0x33f   : > { %v1763_v35 = vadd.f32 %v4191_v0, %v6324_v22  ;;  %4076 = vmatprep.subr.bf16.mxu1 %v8257_v56 }
 0x340   : > { %v1542_v39 = vpop.f32.mrb[52].mxu0 }
 0x341   : > { %1867 = vst.msk [vmem:[#allocation2 + $0x141] sm:$0xff] %vm653_vm1, %v1763_v35  ;;  %v4192_v46 = vadd.f32 %v6343_v42, %v1542_v39  ;;  %v1544_v45 = vpop.f32.mrb[53].mxu0  ;;  %v2650_v39 = vld [vmem:[%s7942_s3 + $0xc0] sm:$0xff] }
 0x342   : > { %4078 = vmatpush1.bf16.msra.mxu1 %v4077_v16  ;;  %v2651_v45 = vld [vmem:[%s7942_s3 + $0xc8] sm:$0xff] }
 0x343   : > { %v1768_v22 = vadd.f32 %v4192_v46, %v6330_v57  ;;  %4079 = vmatprep.subr.bf16.mxu1 %v8257_v56  ;;  %v4083_v16 = vpack.c.bf16 %v2651_v45, %v2650_v39 }
 0x344   : > { %v1547_v0 = vpop.f32.mrb[54].mxu0 }
 0x345   : > { %1868 = vst.msk [vmem:[#allocation2 + $0x151] sm:$0xff] %vm653_vm1, %v1768_v22  ;;  %v4193_v48 = vadd.f32 %v6343_v42, %v1547_v0  ;;  %v1549_v35 = vpop.f32.mrb[55].mxu0 }
 0x346   : > { %4081 = vmatpush1.bf16.msra.mxu1 %v4080_v43 }
 0x347   : > { %v1773_v33 = vadd.f32 %v4193_v48, %v6328_v25  ;;  %4082 = vmatprep.subr.bf16.mxu1 %v8257_v56  ;;  %v2652_v25 = vld [vmem:[%s7942_s3 + $0xd0] sm:$0xff] }
 0x348   : > { %v1552_v52 = vpop.f32.mrb[56].mxu0  ;;  %v4086_v35 = vpack.c.bf16 %v2653_v24, %v2652_v25  ;;  %v2657_v25 = vld [vmem:[%s7942_s3 + $0xf8] sm:$0xff] }
 0x349   : > { %1869 = vst.msk [vmem:[#allocation2 + $0x159] sm:$0xff] %vm653_vm1, %v1773_v33  ;;  %v4194_v57 = vadd.f32 %v6343_v42, %v1552_v52  ;;  %v1554_v46 = vpop.f32.mrb[57].mxu0  ;;  %v2654_v52 = vld [vmem:[%s7942_s3 + $0xe0] sm:$0xff] }
 0x34a   : > { %4084 = vmatpush1.bf16.msra.mxu1 %v4083_v16  ;;  %v2656_v16 = vld [vmem:[%s7942_s3 + $0xf0] sm:$0xff] }
 0x34b   : > { %v1778_v28 = vadd.f32 %v4194_v57, %v6334_v40  ;;  %4085 = vmatprep.subr.bf16.mxu1 %v8257_v56  ;;  %v2655_v57 = vld [vmem:[%s7942_s3 + $0xe8] sm:$0xff] }
 0x34c   : > { %v1557_v22 = vpop.f32.mrb[58].mxu0  ;;  %v4089_v46 = vpack.c.bf16 %v2655_v57, %v2654_v52 }
 0x34d   : > { %1870 = vst.msk [vmem:[#allocation2 + $0x169] sm:$0xff] %vm653_vm1, %v1778_v28  ;;  %v4195_v0 = vadd.f32 %v6343_v42, %v1557_v22  ;;  %v1559_v48 = vpop.f32.mrb[59].mxu0  ;;  %v4092_v22 = vpack.c.bf16 %v2657_v25, %v2656_v16  ;;  %v2027_v16 = vrot.slane %v6601_v4, 1 }
 0x34e   : > { %4087 = vmatpush1.bf16.msra.mxu1 %v4086_v35  ;;  %v6776_v48 = vld [vmem:[#allocation2 + $0x8] sm:$0xff] }
 0x34f   : > { %v1783_v43 = vadd.f32 %v4195_v0, %v6332_v34  ;;  %4088 = vmatprep.subr.bf16.mxu1 %v8257_v56  ;;  %v6772_v0 = vld [vmem:[#allocation2] sm:$0xff] }
 0x350   : > { %v1562_v33 = vpop.f32.mrb[60].mxu0  ;;  %v1982_v35 = vrot.slane %v6772_v0, 1 }
 0x351   : > { %1871 = vst.msk [vmem:[#allocation2 + $0x171] sm:$0xff] %vm653_vm1, %v1783_v43  ;;  %v4196_v40 = vadd.f32 %v6343_v42, %v1562_v33  ;;  %v1564_v39 = vpop.f32.mrb[61].mxu0  ;;  %v6780_v43 = vld [vmem:[#allocation2 + $0x10] sm:$0x3]  ;;  %v1983_v33 = vrot.slane %v6776_v48, 1 }
 0x352   : > { %4090 = vmatpush1.bf16.msra.mxu1 %v4089_v46  ;;  %v8266_v46 = vrot.slane %v6559_v5, 1 }
 0x353   : > { %v1788_v34 = vadd.f32 %v4196_v40, %v6338_v32  ;;  %4091 = vmatprep.subr.bf16.mxu1 %v8257_v56  ;;  %v1984_v52 = vsel %vm331_vm0, %v1982_v35, %v1983_v33  ;;  %v1985_v40 = vrot.slane %v6780_v43, 1  ;;  %v2032_v35 = vrot.slane %v6640_v38, 1 }
 0x354   : > { %v1567_v45 = vpop.f32.mrb[62].mxu0 }
 0x355   : > { %1872 = vst.msk [vmem:[#allocation2 + $0x181] sm:$0xff] %vm653_vm1, %v1788_v34  ;;  %v4197_v24 = vadd.f32 %v6343_v42, %v1567_v45  ;;  %v1569_v28 = vpop.f32.mrb[63].mxu0  ;;  %v2025_v42 = vrot.slane %v6562_v8, 1 }
 0x356   : > { %4093 = vmatpush1.bf16.msra.mxu1 %v4092_v22  ;;  %v1986_v28 = vsel %vm331_vm0, %v1983_v33, %v1985_v40 }
 0x357   : > { %v1793_v32 = vadd.f32 %v4197_v24, %v6336_v63  ;;  %4094 = vmatprep.subr.bf16.mxu1 %v8257_v56  ;;  %v2028_v63 = vrot.slane %v6605_v62, 1  ;;  %v2026_v34 = vsel %vm331_vm0, %v8266_v46, %v2025_v42 }
 0x359   : > { %1873 = vst.msk [vmem:[#allocation2 + $0x189] sm:$0xff] %vm653_vm1, %v1793_v32  ;;  %v2029_v22 = vsel %vm331_vm0, %v2027_v16, %v2028_v63  ;;  %v2037_v16 = vrot.slane %v6679_v36, 1 }
 0x35a   : > { %v4523_v32 = vpack.i.bf16 %v2029_v22, %v1986_v28 }
 0x35e   : > { %v2079_v39 = vpop.permute.xlu0 %2078  ;;  %v2077_v57 = vpop.permute.xlu1 %2076 }
 0x35f   : > { %v6793_v45 = vsel %vm653_vm1, %v6358_v55, %v2079_v39  ;;  %v6797_v8 = vsel %vm653_vm1, %v6355_v3, %v2077_v57  ;;  %v2033_v55 = vrot.slane %v6644_v29, 1  ;;  %v2030_v3 = vrot.slane %v6607_v2, 1 }
 0x360   : > { %v4518_v25 = vpack.i.bf16 %v6793_v45, %v2026_v34  ;;  %v4513_v24 = vpack.i.bf16 %v1984_v52, %v6797_v8  ;;  %v2035_v34 = vrot.slane %v6646_v30, 1 }
 0x361   : > { %v2034_v40 = vsel %vm331_vm0, %v2032_v35, %v2033_v55  ;;  %v2031_v2 = vsel %vm331_vm0, %v2028_v63, %v2030_v3  ;;  %v6838_v3 = vld [vmem:[#allocation2 + $0x128] sm:$0xff]  ;;  %v6842_v35 = vld [vmem:[#allocation2 + $0x120] sm:$0xff] }
 0x362   : > { %4519 = vrot.lane.b32.xlu0 %v4518_v25, %s4680_s10  ;;  %4514 = vrot.lane.b32.xlu1 %v4513_v24, %s4680_s10  ;;  %v2036_v22 = vsel %vm331_vm0, %v2033_v55, %v2035_v34  ;;  %v2042_v55 = vrot.slane %v6842_v35, 1 }
 0x366   : > { %v2083_v42 = vpop.permute.xlu0 %2082  ;;  %4524 = vrot.lane.b32.xlu1 %v4523_v32, %s4680_s10 }
 0x367   : > { %v6812_v52 = vsel %vm653_vm1, %v6374_v11, %v2083_v42  ;;  %v2081_v33 = vpop.permute.xlu1 %2080  ;;  %v2038_v11 = vrot.slane %v6683_v15, 1  ;;  %v2040_v42 = vrot.slane %v6685_v60, 1 }
 0x368   : > { %v6817_v39 = vsel %vm653_vm1, %v6371_v14, %v2081_v33  ;;  %v4533_v57 = vpack.i.bf16 %v2034_v40, %v6812_v52 }
 0x369   : > { %v4528_v46 = vpack.i.bf16 %v2031_v2, %v6817_v39  ;;  %v2039_v14 = vsel %vm331_vm0, %v2037_v16, %v2038_v11  ;;  %v6859_v16 = vld [vmem:[#allocation2 + $0x140] sm:$0xff] }
 0x36a   : > { %4534 = vrot.lane.b32.xlu1 %v4533_v57, %s4680_s10 }
 0x36b   : > { %4529 = vrot.lane.b32.xlu0 %v4528_v46, %s4680_s10  ;;  %v2041_v46 = vsel %vm331_vm0, %v2038_v11, %v2040_v42 }
 0x36e   : > { %v2087_v25 = vpop.permute.xlu0 %2086 }
 0x36f   : > { %v6830_v24 = vsel %vm653_vm1, %v6402_v1, %v2087_v25  ;;  %v2085_v63 = vpop.permute.xlu1 %2084  ;;  %v2043_v1 = vrot.slane %v6838_v3, 1  ;;  %v6862_v25 = vld [vmem:[#allocation2 + $0x130] sm:$0x3] }
 0x370   : > { %v4543_v28 = vpack.i.bf16 %v2039_v14, %v6830_v24  ;;  %v6836_v32 = vsel %vm653_vm1, %v6399_v13, %v2085_v63  ;;  %8267 = vst [vmem:[#allocation39_spill] sm:$0xff] %v6862_v25  ;;  %v6865_v14 = vld [vmem:[#allocation2 + $0x138] sm:$0xff]  ;;  %v2045_v11 = vrot.slane %v6862_v25, 1  ;;  %v2659_v25 = vld [vmem:[%s7942_s3 + $0x108] sm:$0xff] }
 0x371   : > { %v4538_v30 = vpack.i.bf16 %v2036_v22, %v6836_v32  ;;  %v2044_v13 = vsel %vm331_vm0, %v2042_v55, %v2043_v1  ;;  %v2047_v63 = vrot.slane %v6865_v14, 1 }
 0x372   : > { %4544 = vrot.lane.b32.xlu1 %v4543_v28, %s4680_s10  ;;  %v2046_v55 = vsel %vm331_vm0, %v2043_v1, %v2045_v11 }
 0x373   : > { %4539 = vrot.lane.b32.xlu0 %v4538_v30, %s4680_s10 }
 0x376   : > { %v2091_v33 = vpop.permute.xlu0 %2090 }
 0x377   : > { %v6851_v40 = vsel %vm653_vm1, %v6430_v9, %v2091_v33  ;;  %v2089_v57 = vpop.permute.xlu1 %2088  ;;  %v2048_v9 = vrot.slane %v6859_v16, 1 }
 0x378   : > { %v4553_v2 = vpack.i.bf16 %v2044_v13, %v6851_v40  ;;  %v6857_v34 = vsel %vm653_vm1, %v6427_v26, %v2089_v57  ;;  %v6882_v13 = vld [vmem:[#allocation2 + $0x158] sm:$0xff] }
 0x379   : > { %v4548_v60 = vpack.i.bf16 %v2041_v46, %v6857_v34  ;;  %v2049_v28 = vsel %vm331_vm0, %v2047_v63, %v2048_v9  ;;  %v6888_v46 = vld [vmem:[#allocation2 + $0x150] sm:$0xff] }
 0x37a   : > { %4554 = vrot.lane.b32.xlu1 %v4553_v2, %s4680_s10  ;;  %v6885_v2 = vld [vmem:[#allocation2 + $0x148] sm:$0x3] }
 0x37b   : > { %4549 = vrot.lane.b32.xlu0 %v4548_v60, %s4680_s10  ;;  %8269 = vst [vmem:[#allocation49_spill] sm:$0xff] %v6885_v2  ;;  %v2050_v1 = vrot.slane %v6885_v2, 1  ;;  %v2052_v60 = vrot.slane %v6888_v46, 1 }
 0x37e   : > { %v2095_v26 = vpop.permute.xlu0 %2094 }
 0x37f   : > { %v6874_v22 = vsel %vm653_vm1, %v6458_v53, %v2095_v26  ;;  %v2093_v30 = vpop.permute.xlu1 %2092  ;;  %v2053_v53 = vrot.slane %v6882_v13, 1 }
 0x380   : > { %8268 = vst [vmem:[#allocation44_spill] sm:$0xff] %v6874_v22  ;;  %v4563_v42 = vpack.i.bf16 %v2049_v28, %v6874_v22  ;;  %v6880_v33 = vsel %vm653_vm1, %v6455_v23, %v2093_v30  ;;  %v2051_v30 = vsel %vm331_vm0, %v2048_v9, %v2050_v1  ;;  %v6918_v1 = vld [vmem:[#allocation2 + $0x170] sm:$0xff] }
 0x381   : > { %v4558_v57 = vpack.i.bf16 %v2046_v55, %v6880_v33  ;;  %v2054_v11 = vsel %vm331_vm0, %v2052_v60, %v2053_v53  ;;  %v6905_v55 = vld [vmem:[#allocation2 + $0x160] sm:$0x3] }
 0x382   : > { %4564 = vrot.lane.b32.xlu1 %v4563_v42, %s4680_s10  ;;  %8272 = vst [vmem:[#allocation30_spill] sm:$0xff] %v6905_v55 }
 0x383   : > { %4559 = vrot.lane.b32.xlu0 %v4558_v57, %s4680_s10 }
 0x386   : > { %v2099_v23 = vpop.permute.xlu0 %2098 }
 0x387   : > { %v6897_v63 = vsel %vm653_vm1, %v6486_v31, %v2099_v23  ;;  %v2097_v26 = vpop.permute.xlu1 %2096  ;;  %v2055_v31 = vrot.slane %v6905_v55, 1 }
 0x388   : > { %8270 = vst [vmem:[#allocation73_spill] sm:$0xff] %v6897_v63  ;;  %v4573_v28 = vpack.i.bf16 %v2054_v11, %v6897_v63  ;;  %v6903_v42 = vsel %vm653_vm1, %v6483_v20, %v2097_v26  ;;  %v6920_v11 = vld [vmem:[#allocation2 + $0x178] sm:$0x3]  ;;  %v6922_v26 = vld [vmem:[#allocation2 + $0x168] sm:$0xff] }
 0x389   : > { %8271 = vst [vmem:[#allocation58_spill] sm:$0xff] %v6903_v42  ;;  %v4568_v57 = vpack.i.bf16 %v2051_v30, %v6903_v42  ;;  %v2056_v23 = vsel %vm331_vm0, %v2053_v53, %v2055_v31  ;;  %8274 = vst [vmem:[#allocation32_spill] sm:$0xff] %v6920_v11  ;;  %v2060_v30 = vrot.slane %v6920_v11, 1 }
 0x38a   : > { %4574 = vrot.lane.b32.xlu1 %v4573_v28, %s4680_s10  ;;  %v2058_v28 = vrot.slane %v6918_v1, 1 }
 0x38b   : > { %4569 = vrot.lane.b32.xlu0 %v4568_v57, %s4680_s10 }
 0x38c   : > { %v2061_v55 = vsel %vm331_vm0, %v2058_v28, %v2060_v30 }
 0x38e   : > { %v2101_v60 = vpop.permute.xlu1 %2100 }
 0x38f   : > { %v6914_v9 = vsel %vm653_vm1, %v6506_v58, %v2101_v60  ;;  %v2057_v58 = vrot.slane %v6922_v26, 1 }
 0x390   : > { %8273 = vst [vmem:[#allocation59_spill] sm:$0xff] %v6914_v9  ;;  %v4578_v20 = vpack.i.bf16 %v2056_v23, %v6914_v9 }
 0x392   : > { %4579 = vrot.lane.b32.xlu0 %v4578_v20, %s4680_s10  ;;  %v2059_v20 = vsel %vm331_vm0, %v2057_v58, %v2058_v28  ;;  %v2181_v28 = vrot.slane %v6776_v48, 2  ;;  %v6953_v58 = vld [vmem:[#allocation2 + $0x180] sm:$0xff] }
 0x393   : > { %8282 = vst [vmem:[#allocation68_spill] sm:$0xff] %v6953_v58 }
 0x398   : > { %v4510_v57 = vpop.permute.xlu0 %4509 }
 0x399   : > { %v4512_v53 = vunpack.i.h.bf16 %v4510_v57  ;;  %v4511_v31 = vunpack.i.l.bf16 %v4510_v57 }
 0x39b   : > { %v6929_v60 = vsel %vm653_vm1, %v6549_v27, %v4512_v53  ;;  %v6933_v23 = vsel %vm653_vm1, %v6515_v51, %v4511_v31  ;;  %v6945_v53 = vld [vmem:[#allocation2 + $0x188] sm:$0xff]  ;;  %v2180_v31 = vrot.slane %v6772_v0, 2 }
 0x39c   : > { %8275 = vst [vmem:[#allocation60_spill] sm:$0xff] %v6929_v60  ;;  %8276 = vst [vmem:[#allocation33_spill] sm:$0xff] %v6933_v23  ;;  %v4583_v2 = vpack.i.bf16 %v2059_v20, %v6933_v23  ;;  %v4588_v11 = vpack.i.bf16 %v2061_v55, %v6929_v60  ;;  %v2183_v55 = vrot.slane %v6780_v43, 2 }
 0x39d   : > { %8279 = vst [vmem:[#allocation65_spill] sm:$0xff] %v6945_v53 }
 0x39e   : > { %4584 = vrot.lane.b32.xlu1 %v4583_v2, %s4680_s10  ;;  %4589 = vrot.lane.b32.xlu0 %v4588_v11, %s4680_s10  ;;  %v2063_v2 = vrot.slane %v6945_v53, 1  ;;  %v6957_v11 = vld [vmem:[#allocation2 + $0x190] sm:$0x3]  ;;  %v2184_v60 = vsel %vm530_vm2, %v2181_v28, %v2183_v55 }
 0x39f   : > { %v2065_v17 = vrot.slane %v6957_v11, 1 }
 0x3c8   : > { %v6941_v57 = vpop.f32.mrb[64].mxu0 }
 0x3c9   : > { %8277 = vst [vmem:[#allocation63_spill] sm:$0xff] %v6941_v57  ;;  %v6943_v27 = vpop.f32.mrb[65].mxu0 }
 0x3ca   : > { %8278 = vst [vmem:[#allocation64_spill] sm:$0xff] %v6943_v27  ;;  %v2062_v27 = vrot.slane %v6953_v58, 1 }
 0x3d0   : > { %v6947_v51 = vpop.f32.mrb[66].mxu0 }
 0x3d1   : > { %8280 = vst [vmem:[#allocation66_spill] sm:$0xff] %v6947_v51  ;;  %v6951_v30 = vpop.f32.mrb[67].mxu0  ;;  %v2182_v51 = vsel %vm530_vm2, %v2180_v31, %v2181_v28  ;;  %v2064_v31 = vsel %vm331_vm0, %v2062_v27, %v2063_v2  ;;  %v2660_v28 = vld [vmem:[%s7942_s3 + $0x110] sm:$0xff] }
 0x3d2   : > { %8281 = vst [vmem:[#allocation67_spill] sm:$0xff] %v6951_v30  ;;  %v2658_v30 = vld [vmem:[%s7942_s3 + $0x100] sm:$0xff] }
 0x3d3   : > { %v4095_v61 = vpack.c.bf16 %v2659_v25, %v2658_v30  ;;  %v4613_v25 = vld [vmem:[#allocation2 + $0x20] sm:$0xff] }
 0x3d4   : > { %v6959_v20 = vpop.permute.xlu0 %4519  ;;  %v6961_v57 = vpop.permute.xlu1 %4514  ;;  %v2186_v30 = vrot.slane %v4613_v25, 2 }
 0x3d5   : > { %v4521_v49 = vunpack.i.l.bf16 %v6959_v20  ;;  %v4517_v50 = vunpack.i.h.bf16 %v6961_v57  ;;  %v8081_v7 = vunpack.i.l.bf16 %v6961_v57 }
 0x3d7   : > { %v6980_v53 = vsel %vm653_vm1, %v6559_v5, %v4521_v49  ;;  %v2594_v43 = vsel %vm653_vm1, %v2182_v51, %v8081_v7  ;;  %v2302_v23 = vsel %vm653_vm1, %v6772_v0, %v4517_v50  ;;  %v2661_v5 = vld [vmem:[%s7942_s3 + $0x118] sm:$0xff]  ;;  %v8285_v50 = vunpack.i.h.bf16 %v6959_v20 }
 0x3d8   : > { %v6987_v58 = vpop.f32.mrb[68].mxu0  ;;  %v4525_v18 = vpop.permute.xlu1 %4524  ;;  %2833 = vmatprep.mubr.f32.mxu1 %v2594_v43  ;;  %v4593_v27 = vpack.i.bf16 %v2064_v31, %v6980_v53 }
 0x3d9   : > { %8283 = vst [vmem:[#allocation69_spill] sm:$0xff] %v6987_v58  ;;  %v4527_v49 = vunpack.i.h.bf16 %v4525_v18  ;;  %v4526_v51 = vunpack.i.l.bf16 %v4525_v18  ;;  %2834 = vmatmul.mubr.f32.vlgmr.msra.gmra.mrb[32].mxu1 %v2302_v23  ;;  %v6996_v55 = vpop.f32.mrb[69].mxu0  ;;  %v2595_v0 = vsel %vm653_vm1, %v2184_v60, %v8285_v50  ;;  %v2066_v18 = vsel %vm331_vm0, %v2063_v2, %v2065_v17  ;;  %v2662_v2 = vld [vmem:[%s7942_s3 + $0x120] sm:$0xff] }
 0x3da   : > { %8284 = vst [vmem:[#allocation48_spill] sm:$0xff] %v6996_v55  ;;  %4594 = vrot.lane.b32.xlu1 %v4593_v27, %s4680_s10  ;;  %2838 = vmatprep.mubr.f32.mxu1 %v2595_v0  ;;  %v4098_v23 = vpack.c.bf16 %v2661_v5, %v2660_v28  ;;  %v4614_v27 = vld [vmem:[#allocation2 + $0x28] sm:$0x3] }
 0x3db   : > { %v7004_v43 = vsel %vm653_vm1, %v6601_v4, %v4527_v49  ;;  %v2303_v31 = vsel %vm653_vm1, %v6776_v48, %v4526_v51  ;;  %4096 = vmatpush1.bf16.msra.mxu1 %v4095_v61  ;;  %v2188_v50 = vrot.slane %v4614_v27, 2  ;;  %v4615_v49 = vld [vmem:[#allocation2 + $0x18] sm:$0xff]  ;;  %v2663_v28 = vld [vmem:[%s7942_s3 + $0x128] sm:$0xff] }
 0x3dc   : > { %v7009_v7 = vpop.permute.xlu1 %4534  ;;  %v4598_v60 = vpack.i.bf16 %v2066_v18, %v7004_v43  ;;  %4097 = vmatprep.subr.bf16.mxu1 %v8257_v56  ;;  %v2185_v25 = vrot.slane %v4615_v49, 2  ;;  %v4101_v51 = vpack.c.bf16 %v2663_v28, %v2662_v2  ;;  %v2665_v2 = vld [vmem:[%s7942_s3 + $0x138] sm:$0xff] }
 0x3dd   : > { %v7013_v0 = vpop.permute.xlu0 %4529  ;;  %v4537_v4 = vunpack.i.h.bf16 %v7009_v7  ;;  %2839 = vmatmul.mubr.f32.gmra.mrb[34].mxu1 %v2303_v31  ;;  %v8084_v17 = vunpack.i.l.bf16 %v7009_v7 }
 0x3de   : > { %v4532_v48 = vunpack.i.h.bf16 %v7013_v0  ;;  %v8085_v61 = vunpack.i.l.bf16 %v7013_v0  ;;  %4599 = vrot.lane.b32.xlu0 %v4598_v60, %s4680_s10  ;;  %v7027_v5 = vsel %vm530_vm2, %v2185_v25, %v2186_v30 }
 0x3df   : > { %4099 = vmatpush1.bf16.msra.mxu1 %v4098_v23  ;;  %v7046_v23 = vsel %vm653_vm1, %v6640_v38, %v4537_v4 }
 0x3e0   : > { %v7029_v31 = vpop.f32.mrb[70].mxu0  ;;  %v7033_v18 = vsel %vm653_vm1, %v6605_v62, %v4532_v48  ;;  %v2596_v60 = vsel %vm653_vm1, %v7027_v5, %v8085_v61  ;;  %4100 = vmatprep.subr.bf16.mxu1 %v8257_v56  ;;  %v7049_v62 = vsel %vm530_vm2, %v2186_v30, %v2188_v50  ;;  %v2664_v48 = vld [vmem:[%s7942_s3 + $0x130] sm:$0xff] }
 0x3e1   : > { %8286 = vst [vmem:[#allocation70_spill] sm:$0xff] %v7029_v31  ;;  %2438 = vrot.lane.b32.xlu1 %v7033_v18, %s4680_s10  ;;  %2843 = vmatprep.mubr.f32.mxu1 %v2596_v60  ;;  %v7042_v27 = vpop.f32.mrb[71].mxu0  ;;  %v2597_v49 = vsel %vm653_vm1, %v7049_v62, %v8084_v17 }
 0x3e2   : > { %8287 = vst [vmem:[#allocation50_spill] sm:$0xff] %v7042_v27  ;;  %2844 = vmatmul.mubr.f32.gmra.mrb[36].mxu1 %v6797_v8  ;;  %2442 = vrot.lane.b32.xlu0 %v7046_v23, %s4680_s10 }
 0x3e3   : > { %2848 = vmatprep.mubr.f32.mxu1 %v2597_v49  ;;  %4102 = vmatpush1.bf16.msra.mxu1 %v4101_v51  ;;  %v4104_v51 = vpack.c.bf16 %v2665_v2, %v2664_v48 }
 0x3e4   : > { %v7058_v25 = vpop.permute.xlu1 %4544  ;;  %4103 = vmatprep.subr.bf16.mxu1 %v8257_v56 }
 0x3e5   : > { %v7061_v38 = vpop.permute.xlu0 %4539  ;;  %v4547_v30 = vunpack.i.h.bf16 %v7058_v25  ;;  %v8083_v4 = vunpack.i.l.bf16 %v7058_v25 }
 0x3e6   : > { %v4542_v8 = vunpack.i.h.bf16 %v7061_v38  ;;  %v8082_v50 = vunpack.i.l.bf16 %v7061_v38  ;;  %2849 = vmatmul.mubr.f32.gmra.mrb[38].mxu1 %v6793_v45 }
 0x3e7   : > { %v7076_v28 = vsel %vm653_vm1, %v6679_v36, %v4547_v30  ;;  %4105 = vmatpush1.bf16.msra.mxu1 %v4104_v51  ;;  %v2666_v51 = vld [vmem:[%s7942_s3 + $0x140] sm:$0xff] }
 0x3e8   : > { %v7078_v60 = vpop.f32.mrb[72].mxu0  ;;  %v7082_v49 = vsel %vm653_vm1, %v6644_v29, %v4542_v8  ;;  %2450 = vrot.lane.b32.xlu0 %v7076_v28, %s4680_s10  ;;  %v2598_v45 = vsel %vm653_vm1, %v6384_v47, %v8082_v50  ;;  %v2599_v29 = vsel %vm653_vm1, %v6392_v59, %v8083_v4  ;;  %4106 = vmatprep.subr.bf16.mxu1 %v8257_v56 }
 0x3e9   : > { %8288 = vst [vmem:[#allocation71_spill] sm:$0xff] %v7078_v60  ;;  %2446 = vrot.lane.b32.xlu1 %v7082_v49, %s4680_s10  ;;  %2853 = vmatprep.mubr.f32.mxu1 %v2598_v45  ;;  %v7092_v36 = vpop.f32.mrb[73].mxu0 }
 0x3ea   : > { %8289 = vst [vmem:[#allocation72_spill] sm:$0xff] %v7092_v36  ;;  %2854 = vmatmul.mubr.f32.gmra.mrb[40].mxu1 %v6817_v39 }
 0x3eb   : > { %2858 = vmatprep.mubr.f32.mxu1 %v2599_v29  ;;  %v2667_v29 = vld [vmem:[%s7942_s3 + $0x148] sm:$0xff] }
 0x3ec   : > { %v7099_v30 = vpop.permute.xlu1 %4554  ;;  %v4107_v17 = vpack.c.bf16 %v2667_v29, %v2666_v51 }
 0x3ed   : > { %8290 = vst [vmem:[#allocation74_spill] sm:$0xff] %v7099_v30  ;;  %v7102_v8 = vpop.permute.xlu0 %4549  ;;  %v4557_v48 = vunpack.i.h.bf16 %v7099_v30  ;;  %v8294_v51 = vunpack.i.l.bf16 %v7099_v30 }
 0x3ee   : > { %8291 = vst [vmem:[#allocation75_spill] sm:$0xff] %v7102_v8  ;;  %v4552_v2 = vunpack.i.h.bf16 %v7102_v8  ;;  %v8086_v45 = vunpack.i.l.bf16 %v7102_v8  ;;  %2859 = vmatmul.mubr.f32.gmra.mrb[42].mxu1 %v6812_v52 }
 0x3ef   : > { %v7117_v4 = vsel %vm653_vm1, %v6842_v35, %v4557_v48  ;;  %4108 = vmatpush1.bf16.msra.mxu1 %v4107_v17  ;;  %v2668_v17 = vld [vmem:[%s7942_s3 + $0x150] sm:$0xff] }
 0x3f0   : > { %v7119_v61 = vpop.f32.mrb[74].mxu0  ;;  %v7123_v50 = vsel %vm653_vm1, %v6683_v15, %v4552_v2  ;;  %2458 = vrot.lane.b32.xlu0 %v7117_v4, %s4680_s10  ;;  %v2600_v60 = vsel %vm653_vm1, %v6412_v41, %v8086_v45  ;;  %v2601_v15 = vsel %vm653_vm1, %v6420_v44, %v8294_v51  ;;  %4109 = vmatprep.subr.bf16.mxu1 %v8257_v56  ;;  %v2669_v51 = vld [vmem:[%s7942_s3 + $0x158] sm:$0xff] }
 0x3f1   : > { %8292 = vst [vmem:[#allocation76_spill] sm:$0xff] %v7119_v61  ;;  %2454 = vrot.lane.b32.xlu1 %v7123_v50, %s4680_s10  ;;  %2863 = vmatprep.mubr.f32.mxu1 %v2600_v60  ;;  %v7133_v48 = vpop.f32.mrb[75].mxu0  ;;  %v4110_v36 = vpack.c.bf16 %v2669_v51, %v2668_v17 }
 0x3f2   : > { %8293 = vst [vmem:[#allocation41_spill] sm:$0xff] %v7133_v48  ;;  %2864 = vmatmul.mubr.f32.gmra.mrb[44].mxu1 %v6836_v32 }
 0x3f3   : > { %2868 = vmatprep.mubr.f32.mxu1 %v2601_v15  ;;  %4111 = vmatpush1.bf16.msra.mxu1 %v4110_v36  ;;  %v2670_v36 = vld [vmem:[%s7942_s3 + $0x160] sm:$0xff] }
 0x3f4   : > { %v7140_v2 = vpop.permute.xlu1 %4564  ;;  %4112 = vmatprep.subr.bf16.mxu1 %v8257_v56 }
 0x3f5   : > { %8295 = vst [vmem:[#allocation77_spill] sm:$0xff] %v7140_v2  ;;  %v7143_v29 = vpop.permute.xlu0 %4559  ;;  %v4567_v45 = vunpack.i.h.bf16 %v7140_v2  ;;  %v8299_v17 = vunpack.i.l.bf16 %v7140_v2 }
 0x3f6   : > { %8296 = vst [vmem:[#allocation78_spill] sm:$0xff] %v7143_v29  ;;  %v4562_v60 = vunpack.i.h.bf16 %v7143_v29  ;;  %v8087_v61 = vunpack.i.l.bf16 %v7143_v29  ;;  %2869 = vmatmul.mubr.f32.gmra.mrb[46].mxu1 %v6830_v24 }
 0x3f7   : > { %v7158_v15 = vsel %vm653_vm1, %v6865_v14, %v4567_v45 }
 0x3f8   : > { %v7160_v31 = vpop.f32.mrb[76].mxu0  ;;  %v7164_v48 = vsel %vm653_vm1, %v6838_v3, %v4562_v60  ;;  %2466 = vrot.lane.b32.xlu0 %v7158_v15, %s4680_s10  ;;  %v2602_v27 = vsel %vm653_vm1, %v6440_v12, %v8087_v61  ;;  %v2603_v60 = vsel %vm653_vm1, %v6448_v21, %v8299_v17  ;;  %v2671_v17 = vld [vmem:[%s7942_s3 + $0x168] sm:$0xff] }
 0x3f9   : > { %8297 = vst [vmem:[#allocation79_spill] sm:$0xff] %v7160_v31  ;;  %2462 = vrot.lane.b32.xlu1 %v7164_v48, %s4680_s10  ;;  %2873 = vmatprep.mubr.f32.mxu1 %v2602_v27  ;;  %v7174_v45 = vpop.f32.mrb[77].mxu0  ;;  %v4113_v55 = vpack.c.bf16 %v2671_v17, %v2670_v36 }
 0x3fa   : > { %8298 = vst [vmem:[#allocation80_spill] sm:$0xff] %v7174_v45  ;;  %2874 = vmatmul.mubr.f32.gmra.mrb[48].mxu1 %v6857_v34 }
 0x3fb   : > { %2878 = vmatprep.mubr.f32.mxu1 %v2603_v60  ;;  %4114 = vmatpush1.bf16.msra.mxu1 %v4113_v55 }
 0x3fc   : > { %v7181_v51 = vpop.permute.xlu1 %4574  ;;  %4115 = vmatprep.subr.bf16.mxu1 %v8257_v56 }
 0x3fd   : > { %8300 = vst [vmem:[#allocation81_spill] sm:$0xff] %v7181_v51  ;;  %v7184_v61 = vpop.permute.xlu0 %4569  ;;  %v4577_v31 = vunpack.i.h.bf16 %v7181_v51  ;;  %v8304_v36 = vunpack.i.l.bf16 %v7181_v51 }
 0x3fe   : > { %8301 = vst [vmem:[#allocation82_spill] sm:$0xff] %v7184_v61  ;;  %v4572_v27 = vunpack.i.h.bf16 %v7184_v61  ;;  %v8090_v45 = vunpack.i.l.bf16 %v7184_v61  ;;  %2879 = vmatmul.mubr.f32.gmra.mrb[50].mxu1 %v6851_v40 }
 0x3ff   : > { %v7199_v60 = vsel %vm653_vm1, %v6888_v46, %v4577_v31 }
 0x400   : > { %v7201_v2 = vpop.f32.mrb[78].mxu0  ;;  %v7205_v58 = vsel %vm653_vm1, %v6859_v16, %v4572_v27  ;;  %2474 = vrot.lane.b32.xlu0 %v7199_v60, %s4680_s10  ;;  %v2604_v29 = vsel %vm653_vm1, %v6468_v54, %v8090_v45  ;;  %v2605_v27 = vsel %vm653_vm1, %v6476_v37, %v8304_v36  ;;  %v2672_v45 = vld [vmem:[%s7942_s3 + $0x170] sm:$0xff] }
 0x401   : > { %8302 = vst [vmem:[#allocation83_spill] sm:$0xff] %v7201_v2  ;;  %2470 = vrot.lane.b32.xlu1 %v7205_v58, %s4680_s10  ;;  %2883 = vmatprep.mubr.f32.mxu1 %v2604_v29  ;;  %v7215_v31 = vpop.f32.mrb[79].mxu0  ;;  %v2673_v29 = vld [vmem:[%s7942_s3 + $0x178] sm:$0xff] }
 0x402   : > { %8303 = vst [vmem:[#allocation84_spill] sm:$0xff] %v7215_v31  ;;  %2884 = vmatmul.mubr.f32.gmra.mrb[52].mxu1 %v6880_v33  ;;  %v4116_v51 = vpack.c.bf16 %v2673_v29, %v2672_v45  ;;  %v2675_v45 = vld [vmem:[%s7942_s3 + $0x188] sm:$0xff] }
 0x403   : > { %2888 = vmatprep.mubr.f32.mxu1 %v2605_v27 }
 0x404   : > { %v7222_v17 = vpop.permute.xlu0 %4579  ;;  %4117 = vmatpush1.bf16.msra.mxu1 %v4116_v51 }
 0x405   : > { %8305 = vst [vmem:[#allocation85_spill] sm:$0xff] %v7222_v17  ;;  %v4582_v2 = vunpack.i.h.bf16 %v7222_v17  ;;  %v8093_v31 = vunpack.i.l.bf16 %v7222_v17  ;;  %4118 = vmatprep.subr.bf16.mxu1 %v8257_v56  ;;  %v2676_v17 = vld [vmem:[%s7942_s3 + $0x190] sm:$0xff] }
 0x406   : > { %2889 = vmatmul.mubr.f32.gmra.mrb[54].mxu1 %v6874_v22 }
 0x407   : > { %v7236_v55 = vsel %vm653_vm1, %v6882_v13, %v4582_v2  ;;  %v2606_v36 = vsel %vm653_vm1, %v6496_v6, %v8093_v31  ;;  %v2674_v2 = vld [vmem:[%s7942_s3 + $0x180] sm:$0xff] }
 0x408   : > { %v7242_v27 = vpop.f32.mrb[80].mxu0  ;;  %2478 = vrot.lane.b32.xlu1 %v7236_v55, %s4680_s10  ;;  %2893 = vmatprep.mubr.f32.mxu1 %v2606_v36  ;;  %v4119_v51 = vpack.c.bf16 %v2675_v45, %v2674_v2 }
 0x409   : > { %8306 = vst [vmem:[#allocation86_spill] sm:$0xff] %v7242_v27  ;;  %v7246_v61 = vpop.f32.mrb[81].mxu0 }
 0x40a   : > { %8307 = vst [vmem:[#allocation87_spill] sm:$0xff] %v7246_v61  ;;  %2894 = vmatmul.mubr.f32.gmra.mrb[56].mxu1 %v6903_v42 }
 0x40b   : > { %4120 = vmatpush1.bf16.msra.mxu1 %v4119_v51 }
 0x40c   : > { %4121 = vmatprep.subr.bf16.mxu1 %v8257_v56 }
 0x410   : > { %v7256_v29 = vpop.f32.mrb[82].mxu0  ;;  %v7258_v31 = vpop.permute.xlu0 %4589 }
 0x411   : > { %8308 = vst [vmem:[#allocation88_spill] sm:$0xff] %v7256_v29  ;;  %8309 = vst [vmem:[#allocation89_spill] sm:$0xff] %v7258_v31  ;;  %v4592_v36 = vunpack.i.h.bf16 %v7258_v31  ;;  %v7261_v27 = vpop.permute.xlu1 %4584  ;;  %v7263_v61 = vpop.f32.mrb[83].mxu0  ;;  %v2678_v29 = vld [vmem:[%s7942_s3 + $0x1a0] sm:$0xff] }
 0x412   : > { %8310 = vst [vmem:[#allocation90_spill] sm:$0xff] %v7261_v27  ;;  %8311 = vst [vmem:[#allocation91_spill] sm:$0xff] %v7263_v61  ;;  %v4587_v42 = vunpack.i.h.bf16 %v7261_v27  ;;  %v8097_v30 = vunpack.i.l.bf16 %v7261_v27  ;;  %v8312_v61 = vunpack.i.l.bf16 %v7258_v31 }
 0x413   : > { %v7271_v2 = vsel %vm653_vm1, %v6918_v1, %v4592_v36  ;;  %v2677_v36 = vld [vmem:[%s7942_s3 + $0x198] sm:$0xff] }
 0x414   : > { %2486 = vrot.lane.b32.xlu1 %v7271_v2, %s4680_s10  ;;  %v7277_v45 = vsel %vm653_vm1, %v6922_v26, %v4587_v42  ;;  %v2607_v51 = vsel %vm653_vm1, %v6504_v19, %v8097_v30  ;;  %v4122_v42 = vpack.c.bf16 %v2677_v36, %v2676_v17  ;;  %v2679_v30 = vld [vmem:[%s7942_s3 + $0x1a8] sm:$0xff]  ;;  %v2608_v27 = vsel %vm653_vm1, %v6530_v10, %v8312_v61  ;;  %v2680_v17 = vld [vmem:[%s7942_s3 + $0x1b0] sm:$0xff]  ;;  %v2682_v61 = vld [vmem:[%s7942_s3 + $0x1c0] sm:$0xff] }
 0x415   : > { %2482 = vrot.lane.b32.xlu0 %v7277_v45, %s4680_s10  ;;  %2898 = vmatprep.mubr.f32.mxu1 %v2607_v51  ;;  %v4125_v22 = vpack.c.bf16 %v2679_v30, %v2678_v29  ;;  %v2681_v51 = vld [vmem:[%s7942_s3 + $0x1b8] sm:$0xff]  ;;  %v2683_v30 = vld [vmem:[%s7942_s3 + $0x1c8] sm:$0xff]  ;;  %v2684_v29 = vld [vmem:[%s7942_s3 + $0x1d0] sm:$0xff] }
 0x416   : > { %2899 = vmatmul.mubr.f32.gmra.mrb[58].mxu1 %v6897_v63  ;;  %v4128_v36 = vpack.c.bf16 %v2681_v51, %v2680_v17  ;;  %v2686_v17 = vld [vmem:[%s7942_s3 + $0x1e0] sm:$0xff]  ;;  %v2687_v51 = vld [vmem:[%s7942_s3 + $0x1e8] sm:$0xff] }
 0x417   : > { %2903 = vmatprep.mubr.f32.mxu1 %v2608_v27  ;;  %4123 = vmatpush1.bf16.msra.mxu1 %v4122_v42  ;;  %v4131_v27 = vpack.c.bf16 %v2683_v30, %v2682_v61  ;;  %v2688_v61 = vld [vmem:[%s7942_s3 + $0x1f0] sm:$0xff]  ;;  %v2689_v30 = vld [vmem:[%s7942_s3 + $0x1f8] sm:$0xff] }
 0x418   : > { %4124 = vmatprep.subr.bf16.mxu1 %v8257_v56 }
 0x41a   : > { %2904 = vmatmul.mubr.f32.gmra.mrb[60].mxu1 %v6914_v9  ;;  %v8318_v9 = vld [vmem:[#allocation33_spill] sm:$0xff] }
 0x41b   : > { %4126 = vmatpush1.bf16.msra.mxu1 %v4125_v22  ;;  %v2685_v22 = vld [vmem:[%s7942_s3 + $0x1d8] sm:$0xff] }
 0x41c   : > { %4127 = vmatprep.subr.bf16.mxu1 %v8257_v56  ;;  %v4134_v42 = vpack.c.bf16 %v2685_v22, %v2684_v29  ;;  %v8313_v29 = vld [vmem:[#allocation43_spill] sm:$0xff] }
 0x41f   : > { %4129 = vmatpush1.bf16.msra.mxu1 %v4128_v36  ;;  %v4137_v36 = vpack.c.bf16 %v2687_v51, %v2686_v17  ;;  %v8315_v51 = vld [vmem:[#allocation68_spill] sm:$0xff] }
 0x420   : > { %4130 = vmatprep.subr.bf16.mxu1 %v8257_v56 }
 0x423   : > { %4132 = vmatpush1.bf16.msra.mxu1 %v4131_v27  ;;  %v4140_v27 = vpack.c.bf16 %v2689_v30, %v2688_v61 }
 0x424   : > { %4133 = vmatprep.subr.bf16.mxu1 %v8257_v56 }
 0x427   : > { %4135 = vmatpush1.bf16.msra.mxu1 %v4134_v42 }
 0x428   : > { %4136 = vmatprep.subr.bf16.mxu1 %v8257_v56 }
 0x42b   : > { %4138 = vmatpush1.bf16.msra.mxu1 %v4137_v36  ;;  %v8317_v36 = vld [vmem:[#allocation23_spill] sm:$0xff] }
 0x42c   : > { %4139 = vmatprep.subr.bf16.mxu1 %v8257_v56 }
 0x42f   : > { %4141 = vmatpush1.bf16.msra.mxu1 %v4140_v27 }
 0x430   : > { %4158 = vmatprep.subr.bf16.mxu1 %v8313_v29 }
 0x44c   : > { %v7340_v22 = vpop.permute.xlu1 %4594 }
 0x44d   : > { %8314 = vst [vmem:[#allocation43_spill] sm:$0xff] %v7340_v22  ;;  %v4597_v42 = vunpack.i.h.bf16 %v7340_v22  ;;  %v8104_v17 = vunpack.i.l.bf16 %v7340_v22 }
 0x44f   : > { %v7346_v56 = vsel %vm653_vm1, %v8315_v51, %v4597_v42  ;;  %v2609_v31 = vsel %vm653_vm1, %v8317_v36, %v8104_v17  ;;  %v8319_v42 = vld [vmem:[#allocation65_spill] sm:$0xff]  ;;  %v8321_v17 = vld [vmem:[#allocation56_spill] sm:$0xff] }
 0x450   : > { %8316 = vst [vmem:[#allocation68_spill] sm:$0xff] %v7346_v56  ;;  %2490 = vrot.lane.b32.xlu0 %v7346_v56, %s4680_s10  ;;  %v7354_v61 = vpop.permute.xlu0 %4599  ;;  %2908 = vmatprep.mubr.f32.mxu1 %v2609_v31  ;;  %v8322_v31 = vld [vmem:[#allocation60_spill] sm:$0xff] }
 0x451   : > { %v4602_v30 = vunpack.i.h.bf16 %v7354_v61  ;;  %v8107_v27 = vunpack.i.l.bf16 %v7354_v61  ;;  %2909 = vmatmul.mubr.f32.gmra.mrb[62].mxu1 %v8318_v9  ;;  %v8323_v9 = vld [vmem:[#allocation57_spill] sm:$0xff] }
 0x453   : > { %v7359_v63 = vpop.permute.xlu1 %2438  ;;  %v7363_v22 = vsel %vm653_vm1, %v8319_v42, %v4602_v30  ;;  %v2610_v56 = vsel %vm653_vm1, %v8321_v17, %v8107_v27 }
 0x454   : > { %8320 = vst [vmem:[#allocation23_spill] sm:$0xff] %v7363_v22  ;;  %2372 = vrot.lane.b32.xlu0 %v7027_v5, %s4680_s10  ;;  %2494 = vrot.lane.b32.xlu1 %v7363_v22, %s4680_s10  ;;  %v2611_v8 = vsel %vm653_vm1, %v8323_v9, %v7359_v63  ;;  %v7377_v30 = vpop.permute.xlu0 %2442  ;;  %v8324_v5 = vld [vmem:[#allocation53_spill] sm:$0xff] }
 0x455   : > { %2913 = vmatprep.mubr.f32.mxu1 %v2610_v56  ;;  %v2612_v56 = vsel %vm653_vm1, %v8324_v5, %v7377_v30 }
 0x456   : > { %2914 = vmatmul.mubr.f32.gmra.mrb[64].mxu1 %v8322_v31 }
 0x457   : > { %2918 = vmatprep.mubr.f32.mxu1 %v2611_v8 }
 0x458   : > { %2380 = vrot.lane.b32.xlu0 %v6384_v47, %s4680_s10  ;;  %2376 = vrot.lane.b32.xlu1 %v7049_v62, %s4680_s10  ;;  %v8325_v47 = vld [vmem:[#allocation24_spill] sm:$0xff] }
 0x45a   : > { %2919 = vmatmul.mubr.f32.gmra.mrb[66].mxu1 %v6980_v53  ;;  %v7397_v8 = vpop.permute.xlu0 %2450 }
 0x45b   : > { %v7387_v27 = vpop.permute.xlu1 %2446  ;;  %2923 = vmatprep.mubr.f32.mxu1 %v2612_v56 }
 0x45c   : > { %2388 = vrot.lane.b32.xlu0 %v6412_v41, %s4680_s10  ;;  %2384 = vrot.lane.b32.xlu1 %v6392_v59, %s4680_s10  ;;  %v2613_v62 = vsel %vm653_vm1, %v8325_v47, %v7387_v27  ;;  %v8326_v41 = vld [vmem:[#allocation55_spill] sm:$0xff] }
 0x45d   : > { %v2614_v59 = vsel %vm653_vm1, %v8326_v41, %v7397_v8 }
 0x45e   : > { %2924 = vmatmul.mubr.f32.gmra.mrb[68].mxu1 %v7004_v43 }
 0x45f   : > { %2928 = vmatprep.mubr.f32.mxu1 %v2613_v62 }
 0x460   : > { %2396 = vrot.lane.b32.xlu0 %v6440_v12, %s4680_s10  ;;  %2392 = vrot.lane.b32.xlu1 %v6420_v44, %s4680_s10  ;;  %v8327_v12 = vld [vmem:[#allocation26_spill] sm:$0xff] }
 0x462   : > { %2929 = vmatmul.mubr.f32.gmra.mrb[70].mxu1 %v7033_v18  ;;  %v7417_v62 = vpop.permute.xlu0 %2458 }
 0x463   : > { %v7407_v56 = vpop.permute.xlu1 %2454  ;;  %2933 = vmatprep.mubr.f32.mxu1 %v2614_v59  ;;  %8328 = vst [vmem:[#allocation65_spill] sm:$0xff] %v7417_v62 }
 0x464   : > { %2404 = vrot.lane.b32.xlu0 %v6468_v54, %s4680_s10  ;;  %2400 = vrot.lane.b32.xlu1 %v6448_v21, %s4680_s10  ;;  %v2615_v44 = vsel %vm653_vm1, %v8327_v12, %v7407_v56  ;;  %v8329_v54 = vld [vmem:[#allocation29_spill] sm:$0xff] }
 0x465   : > { %v2616_v21 = vsel %vm653_vm1, %v8329_v54, %v7417_v62  ;;  %v2240_v62 = vrot.slane %v6842_v35, 2 }
 0x466   : > { %2934 = vmatmul.mubr.f32.gmra.mrb[72].mxu1 %v7046_v23 }
 0x467   : > { %2938 = vmatprep.mubr.f32.mxu1 %v2615_v44 }
 0x468   : > { %2412 = vrot.lane.b32.xlu0 %v6496_v6, %s4680_s10  ;;  %2408 = vrot.lane.b32.xlu1 %v6476_v37, %s4680_s10  ;;  %v2241_v6 = vrot.slane %v6838_v3, 2  ;;  %v8330_v37 = vld [vmem:[#allocation36_spill] sm:$0xff] }
 0x46a   : > { %2939 = vmatmul.mubr.f32.gmra.mrb[74].mxu1 %v7082_v49  ;;  %v7438_v22 = vpop.permute.xlu0 %2466 }
 0x46b   : > { %v7427_v59 = vpop.permute.xlu1 %2462  ;;  %2943 = vmatprep.mubr.f32.mxu1 %v2616_v21 }
 0x46c   : > { %2420 = vrot.lane.b32.xlu0 %v6530_v10, %s4680_s10  ;;  %2416 = vrot.lane.b32.xlu1 %v6504_v19, %s4680_s10  ;;  %v2617_v44 = vsel %vm653_vm1, %v8330_v37, %v7427_v59  ;;  %v7446_v19 = vsel %vm530_vm2, %v2240_v62, %v2241_v6  ;;  %v8331_v10 = vld [vmem:[#allocation39_spill] sm:$0xff] }
 0x46d   : > { %v2243_v3 = vrot.slane %v8331_v10, 2  ;;  %v2618_v21 = vsel %vm653_vm1, %v7446_v19, %v7438_v22  ;;  %v2245_v10 = vrot.slane %v6865_v14, 2 }
 0x46e   : > { %2944 = vmatmul.mubr.f32.gmra.mrb[76].mxu1 %v7076_v28 }
 0x46f   : > { %2948 = vmatprep.mubr.f32.mxu1 %v2617_v44  ;;  %v7460_v35 = vsel %vm530_vm2, %v2241_v6, %v2243_v3 }
 0x470   : > { %2428 = vrot.lane.b32.xlu0 %v8321_v17, %s4680_s10  ;;  %2424 = vrot.lane.b32.xlu1 %v8317_v36, %s4680_s10  ;;  %8332 = vst [vmem:[#allocation56_spill] sm:$0xff] %v7460_v35  ;;  %v2246_v17 = vrot.slane %v6859_v16, 2  ;;  %v8334_v16 = vld [vmem:[#allocation49_spill] sm:$0xff] }
 0x472   : > { %2949 = vmatmul.mubr.f32.gmra.mrb[78].mxu1 %v7123_v50  ;;  %v7467_v62 = vpop.permute.xlu0 %2474 }
 0x473   : > { %v7453_v44 = vpop.permute.xlu1 %2470  ;;  %2953 = vmatprep.mubr.f32.mxu1 %v2618_v21  ;;  %v2250_v21 = vrot.slane %v6888_v46, 2 }
 0x474   : > { %2436 = vrot.lane.b32.xlu0 %v8324_v5, %s4680_s10  ;;  %2432 = vrot.lane.b32.xlu1 %v8323_v9, %s4680_s10  ;;  %v2619_v36 = vsel %vm653_vm1, %v7460_v35, %v7453_v44  ;;  %v7475_v9 = vsel %vm530_vm2, %v2245_v10, %v2246_v17  ;;  %v2248_v5 = vrot.slane %v8334_v16, 2 }
 0x475   : > { %8333 = vst [vmem:[#allocation60_spill] sm:$0xff] %v7475_v9  ;;  %v2620_v6 = vsel %vm653_vm1, %v7475_v9, %v7467_v62 }
 0x476   : > { %2954 = vmatmul.mubr.f32.gmra.mrb[80].mxu1 %v7117_v4  ;;  %v7489_v14 = vsel %vm530_vm2, %v2246_v17, %v2248_v5  ;;  %v8336_v17 = vld [vmem:[#allocation30_spill] sm:$0xff] }
 0x477   : > { %2958 = vmatprep.mubr.f32.mxu1 %v2619_v36  ;;  %8335 = vst [vmem:[#allocation57_spill] sm:$0xff] %v7489_v14  ;;  %v2253_v36 = vrot.slane %v8336_v17, 2 }
 0x478   : > { %2444 = vrot.lane.b32.xlu0 %v8326_v41, %s4680_s10  ;;  %2440 = vrot.lane.b32.xlu1 %v8325_v47, %s4680_s10  ;;  %v2251_v41 = vrot.slane %v6882_v13, 2 }
 0x47a   : > { %2959 = vmatmul.mubr.f32.gmra.mrb[82].mxu1 %v7164_v48  ;;  %v7482_v3 = vpop.permute.xlu1 %2478  ;;  %v7518_v5 = vsel %vm530_vm2, %v2250_v21, %v2251_v41  ;;  %v7532_v21 = vsel %vm530_vm2, %v2251_v41, %v2253_v36 }
 0x47b   : > { %2963 = vmatprep.mubr.f32.mxu1 %v2620_v6  ;;  %v2621_v47 = vsel %vm653_vm1, %v7489_v14, %v7482_v3  ;;  %v2256_v6 = vrot.slane %v6918_v1, 2  ;;  %v2255_v1 = vrot.slane %v6922_v26, 2  ;;  %v8337_v26 = vld [vmem:[#allocation32_spill] sm:$0xff] }
 0x47c   : > { %2452 = vrot.lane.b32.xlu0 %v8329_v54, %s4680_s10  ;;  %2448 = vrot.lane.b32.xlu1 %v8327_v12, %s4680_s10  ;;  %v7501_v12 = vld [vmem:[#allocation2 + $0x198] sm:$0xff]  ;;  %v7503_v54 = vld [vmem:[#allocation2 + $0x1a0] sm:$0xff]  ;;  %v2258_v36 = vrot.slane %v8337_v26, 2 }
 0x47d   : > { %v2068_v10 = vrot.slane %v7503_v54, 1 }
 0x47e   : > { %2964 = vmatmul.mubr.f32.gmra.mrb[84].mxu1 %v7158_v15 }
 0x47f   : > { %2968 = vmatprep.mubr.f32.mxu1 %v2621_v47  ;;  %v2261_v47 = vrot.slane %v8319_v42, 2  ;;  %v2260_v42 = vrot.slane %v8315_v51, 2  ;;  %v2263_v51 = vrot.slane %v6957_v11, 2 }
 0x480   : > { %2460 = vrot.lane.b32.xlu0 %v7446_v19, %s4680_s10  ;;  %2456 = vrot.lane.b32.xlu1 %v8330_v37, %s4680_s10  ;;  %v2067_v37 = vrot.slane %v7501_v12, 1 }
 0x481   : > { %v7546_v41 = vsel %vm530_vm2, %v2260_v42, %v2261_v47 }
 0x482   : > { %2969 = vmatmul.mubr.f32.gmra.mrb[86].mxu1 %v7205_v58 }
 0x484   : > { %2468 = vrot.lane.b32.xlu0 %v7475_v9, %s4680_s10  ;;  %2464 = vrot.lane.b32.xlu1 %v7460_v35, %s4680_s10  ;;  %v7522_v9 = vld [vmem:[#allocation2 + $0x1a8] sm:$0x3] }
 0x485   : > { %v2070_v35 = vrot.slane %v7522_v9, 1 }
 0x486   : > { %v7513_v16 = vpop.permute.xlu1 %2486 }
 0x487   : > { %v7515_v13 = vpop.permute.xlu0 %2482  ;;  %v2623_v17 = vsel %vm653_vm1, %v7532_v21, %v7513_v16  ;;  %v2071_v42 = vsel %vm331_vm0, %v2068_v10, %v2070_v35 }
 0x488   : > { %2476 = vrot.lane.b32.xlu0 %v7518_v5, %s4680_s10  ;;  %2472 = vrot.lane.b32.xlu1 %v7489_v14, %s4680_s10  ;;  %v2622_v46 = vsel %vm653_vm1, %v7518_v5, %v7515_v13  ;;  %v2069_v14 = vsel %vm331_vm0, %v2067_v37, %v2068_v10 }
 0x489   : > { %2973 = vmatprep.mubr.f32.mxu1 %v2622_v46  ;;  %v7543_v46 = vsel %vm530_vm2, %v2255_v1, %v2256_v6  ;;  %v4603_v37 = vpack.i.bf16 %v7546_v41, %v2069_v14  ;;  %v7557_v1 = vsel %vm530_vm2, %v2256_v6, %v2258_v36 }
 0x48a   : > { %2974 = vmatmul.mubr.f32.gmra.mrb[88].mxu1 %v7199_v60 }
 0x48b   : > { %2978 = vmatprep.mubr.f32.mxu1 %v2623_v17  ;;  %v7561_v17 = vsel %vm530_vm2, %v2261_v47, %v2263_v51  ;;  %v8338_v47 = vunpack.i.l.bf16 %v6961_v57  ;;  %v8342_v57 = vunpack.i.l.bf16 %v7013_v0  ;;  %v8345_v0 = vunpack.i.l.bf16 %v7061_v38  ;;  %v8349_v38 = vld [vmem:[#allocation44_spill] sm:$0xff] }
 0x48c   : > { %2484 = vrot.lane.b32.xlu0 %v7543_v46, %s4680_s10  ;;  %2480 = vrot.lane.b32.xlu1 %v7532_v21, %s4680_s10  ;;  %v4608_v11 = vpack.i.bf16 %v7561_v17, %v2071_v42  ;;  %v8340_v42 = vunpack.i.h.bf16 %v6959_v20  ;;  %v8344_v20 = vunpack.i.l.bf16 %v7009_v7 }
 0x48e   : > { %2979 = vmatmul.mubr.f32.gmra.mrb[90].mxu1 %v7236_v55 }
 0x490   : > { %4604 = vrot.lane.b32.xlu0 %v4603_v37, %s4680_s10  ;;  %2488 = vrot.lane.b32.xlu1 %v7557_v1, %s4680_s10  ;;  %v8339_v37 = vld [vmem:[#allocation45_spill] sm:$0xff] }
 0x494   : > { %4609 = vrot.lane.b32.xlu1 %v4608_v11, %s4680_s10 }
 0x4c2   : > { %v7568_v26 = vpop.permute.xlu0 %2490 }
 0x4c3   : > { %v2624_v14 = vsel %vm653_vm1, %v7543_v46, %v7568_v26 }
 0x4c4   : > { %2983 = vmatprep.mubr.f32.mxu1 %v2624_v14 }
 0x4c5   : > { %2984 = vmatmul.mubr.f32.gmra.mrb[92].mxu1 %v7277_v45 }
 0x4c6   : > { %v7574_v35 = vpop.permute.xlu1 %2494  ;;  %v2373_v6 = vpop.permute.xlu0 %2372 }
 0x4c7   : > { %v2625_v10 = vsel %vm653_vm1, %v7557_v1, %v7574_v35  ;;  %v2498_v36 = vsel %vm653_vm1, %v8338_v47, %v2373_v6 }
 0x4c8   : > { %2988 = vmatprep.mubr.f32.mxu1 %v2625_v10 }
 0x4c9   : > { %2989 = vmatmul.mubr.f32.gmra.mrb[94].mxu1 %v7271_v2 }
 0x4ca   : > { %3058 = vmatprep.mubr.f32.mxu1 %v6817_v39  ;;  %v2377_v51 = vpop.permute.xlu1 %2376  ;;  %v2381_v14 = vpop.permute.xlu0 %2380  ;;  %v8341_v39 = vld [vmem:[#allocation14_spill] sm:$0xff] }
 0x4cb   : > { %v2499_v11 = vsel %vm653_vm1, %v8340_v42, %v2377_v51 }
 0x4cd   : > { %3059 = vmatmul.mubr.f32.vlgmr.msra.gmra.mrb[32].mxu1 %v2498_v36 }
 0x4ce   : > { %4162 = vmatpush3.bf16.msra.mxu1 %v8313_v29  ;;  %3063 = vmatprep.mubr.f32.mxu1 %v6812_v52  ;;  %v2500_v29 = vsel %vm653_vm1, %v8342_v57, %v2381_v14  ;;  %v2385_v10 = vpop.permute.xlu1 %2384  ;;  %v8343_v52 = vld [vmem:[#allocation15_spill] sm:$0xff]  ;;  %v2389_v6 = vpop.permute.xlu0 %2388  ;;  %v8350_v14 = vld [vmem:[#allocation74_spill] sm:$0xff] }
 0x4cf   : > { %4159 = vmatprep.subr.bf16.mxu1 %v8339_v37  ;;  %v2502_v47 = vsel %vm653_vm1, %v8345_v0, %v2389_v6 }
 0x4d1   : > { %3064 = vmatmul.mubr.f32.gmra.mrb[34].mxu1 %v2499_v11 }
 0x4d2   : > { %3068 = vmatprep.mubr.f32.mxu1 %v6836_v32  ;;  %4163 = vmatpush3.bf16.msra.mxu1 %v8339_v37  ;;  %v2501_v32 = vsel %vm653_vm1, %v8344_v20, %v2385_v10  ;;  %v2393_v36 = vpop.permute.xlu1 %2392  ;;  %v2397_v51 = vpop.permute.xlu0 %2396  ;;  %v8347_v37 = vld [vmem:[#allocation75_spill] sm:$0xff]  ;;  %v8355_v20 = vld [vmem:[#allocation73_spill] sm:$0xff] }
 0x4d3   : > { %4160 = vmatprep.subr.bf16.mxu1 %v8341_v39 }
 0x4d5   : > { %3069 = vmatmul.mubr.f32.gmra.mrb[36].mxu1 %v2500_v29  ;;  %v8353_v29 = vld [vmem:[#allocation78_spill] sm:$0xff] }
 0x4d6   : > { %3073 = vmatprep.mubr.f32.mxu1 %v6830_v24  ;;  %4164 = vmatpush3.bf16.msra.mxu1 %v8341_v39  ;;  %v8346_v24 = vunpack.i.l.bf16 %v7058_v25  ;;  %v2401_v11 = vpop.permute.xlu1 %2400  ;;  %v8351_v39 = vunpack.i.l.bf16 %v8350_v14  ;;  %v2405_v57 = vpop.permute.xlu0 %2404  ;;  %v8352_v25 = vld [vmem:[#allocation58_spill] sm:$0xff]  ;;  %v8354_v10 = vunpack.i.l.bf16 %v8353_v29 }
 0x4d7   : > { %4161 = vmatprep.subr.bf16.mxu1 %v8343_v52  ;;  %v8366_v29 = vld [vmem:[#allocation90_spill] sm:$0xff] }
 0x4d8   : > { %v2503_v7 = vsel %vm653_vm1, %v8346_v24, %v2393_v36  ;;  %v8358_v36 = vld [vmem:[#allocation59_spill] sm:$0xff]  ;;  %v8359_v24 = vld [vmem:[#allocation82_spill] sm:$0xff] }
 0x4d9   : > { %3074 = vmatmul.mubr.f32.gmra.mrb[38].mxu1 %v2501_v32  ;;  %v8356_v32 = vld [vmem:[#allocation77_spill] sm:$0xff] }
 0x4da   : > { %3078 = vmatprep.mubr.f32.mxu1 %v6857_v34  ;;  %4165 = vmatpush3.bf16.msra.mxu1 %v8343_v52  ;;  %v8348_v34 = vunpack.i.l.bf16 %v8347_v37  ;;  %v2409_v52 = vpop.permute.xlu1 %2408  ;;  %v8357_v6 = vunpack.i.l.bf16 %v8356_v32 }
 0x4dc   : > { %v2504_v42 = vsel %vm653_vm1, %v8348_v34, %v2397_v51  ;;  %v2507_v0 = vsel %vm653_vm1, %v8357_v6, %v2409_v52  ;;  %v8361_v34 = vld [vmem:[#allocation33_spill] sm:$0xff] }
 0x4dd   : > { %3079 = vmatmul.mubr.f32.gmra.mrb[40].mxu1 %v2502_v47  ;;  %v2413_v47 = vpop.permute.xlu0 %2412 }
 0x4de   : > { %3083 = vmatprep.mubr.f32.mxu1 %v6851_v40  ;;  %v2505_v40 = vsel %vm653_vm1, %v8351_v39, %v2401_v11  ;;  %v2417_v37 = vpop.permute.xlu1 %2416  ;;  %v8364_v39 = vld [vmem:[#allocation85_spill] sm:$0xff] }
 0x4e1   : > { %3084 = vmatmul.mubr.f32.gmra.mrb[42].mxu1 %v2503_v7  ;;  %v8360_v7 = vunpack.i.l.bf16 %v8359_v24  ;;  %v2421_v14 = vpop.permute.xlu0 %2420  ;;  %v8372_v24 = vunpack.i.l.bf16 %v7354_v61 }
 0x4e2   : > { %3088 = vmatprep.mubr.f32.mxu1 %v6880_v33  ;;  %v2506_v33 = vsel %vm653_vm1, %v8354_v10, %v2405_v57  ;;  %v8367_v10 = vunpack.i.l.bf16 %v8366_v29 }
 0x4e3   : > { %v2508_v51 = vsel %vm653_vm1, %v8360_v7, %v2413_v47 }
 0x4e5   : > { %3089 = vmatmul.mubr.f32.gmra.mrb[44].mxu1 %v2504_v42  ;;  %v8362_v42 = vld [vmem:[#allocation81_spill] sm:$0xff]  ;;  %v2429_v52 = vpop.permute.xlu0 %2428 }
 0x4e6   : > { %3093 = vmatprep.mubr.f32.mxu1 %v8349_v38  ;;  %v8363_v11 = vunpack.i.l.bf16 %v8362_v42 }
 0x4e8   : > { %v2509_v38 = vsel %vm653_vm1, %v8363_v11, %v2417_v37 }
 0x4e9   : > { %3094 = vmatmul.mubr.f32.gmra.mrb[46].mxu1 %v2505_v40  ;;  %v8365_v40 = vunpack.i.l.bf16 %v8364_v39 }
 0x4ea   : > { %3098 = vmatprep.mubr.f32.mxu1 %v8352_v25  ;;  %v2425_v25 = vpop.permute.xlu1 %2424 }
 0x4eb   : > { %v2510_v57 = vsel %vm653_vm1, %v8365_v40, %v2421_v14  ;;  %v8374_v14 = vld [vmem:[#allocation68_spill] sm:$0xff]  ;;  %v8375_v40 = vld [vmem:[#allocation23_spill] sm:$0xff] }
 0x4ed   : > { %3099 = vmatmul.mubr.f32.gmra.mrb[48].mxu1 %v2506_v33  ;;  %v2511_v33 = vsel %vm653_vm1, %v8367_v10, %v2425_v25 }
 0x4ee   : > { %3103 = vmatprep.mubr.f32.mxu1 %v8355_v20  ;;  %v8368_v20 = vld [vmem:[#allocation89_spill] sm:$0xff]  ;;  %v2433_v6 = vpop.permute.xlu1 %2432 }
 0x4ef   : > { %v8369_v32 = vunpack.i.l.bf16 %v8368_v20 }
 0x4f1   : > { %3104 = vmatmul.mubr.f32.gmra.mrb[50].mxu1 %v2507_v0  ;;  %v8370_v0 = vld [vmem:[#allocation43_spill] sm:$0xff] }
 0x4f2   : > { %3108 = vmatprep.mubr.f32.mxu1 %v8358_v36  ;;  %v8371_v47 = vunpack.i.l.bf16 %v8370_v0  ;;  %v2437_v36 = vpop.permute.xlu0 %2436  ;;  %v2441_v7 = vpop.permute.xlu1 %2440 }
 0x4f5   : > { %3109 = vmatmul.mubr.f32.gmra.mrb[52].mxu1 %v2508_v51  ;;  %v2515_v51 = vsel %vm653_vm1, %v7359_v63, %v2441_v7 }
 0x4f6   : > { %3113 = vmatprep.mubr.f32.mxu1 %v8361_v34  ;;  %v2449_v34 = vpop.permute.xlu1 %2448 }
 0x4f9   : > { %3114 = vmatmul.mubr.f32.gmra.mrb[54].mxu1 %v2509_v38 }
 0x4fa   : > { %3118 = vmatprep.mubr.f32.mxu1 %v8322_v31  ;;  %v2512_v31 = vsel %vm653_vm1, %v8369_v32, %v2429_v52  ;;  %v8378_v52 = vld [vmem:[#allocation57_spill] sm:$0xff] }
 0x4fd   : > { %3119 = vmatmul.mubr.f32.gmra.mrb[56].mxu1 %v2510_v57 }
 0x4fe   : > { %3123 = vmatprep.mubr.f32.mxu1 %v6980_v53  ;;  %v2513_v53 = vsel %vm653_vm1, %v8371_v47, %v2433_v6  ;;  %v8380_v6 = vld [vmem:[#allocation6_spill] sm:$0xff]  ;;  %v8381_v47 = vld [vmem:[#allocation63_spill] sm:$0xff] }
 0x501   : > { %3124 = vmatmul.mubr.f32.gmra.mrb[58].mxu1 %v2511_v33  ;;  %v8377_v33 = vld [vmem:[#allocation60_spill] sm:$0xff] }
 0x502   : > { %3128 = vmatprep.mubr.f32.mxu1 %v7004_v43  ;;  %v2514_v43 = vsel %vm653_vm1, %v8372_v24, %v2437_v36 }
 0x505   : > { %3129 = vmatmul.mubr.f32.gmra.mrb[60].mxu1 %v2512_v31 }
 0x506   : > { %3133 = vmatprep.mubr.f32.mxu1 %v7033_v18  ;;  %v2445_v18 = vpop.permute.xlu0 %2444 }
 0x507   : > { %v2516_v37 = vsel %vm653_vm1, %v7377_v30, %v2445_v18 }
 0x509   : > { %3134 = vmatmul.mubr.f32.gmra.mrb[62].mxu1 %v2513_v53 }
 0x50a   : > { %3138 = vmatprep.mubr.f32.mxu1 %v7046_v23  ;;  %v2517_v23 = vsel %vm653_vm1, %v7387_v27, %v2449_v34  ;;  %v2453_v61 = vpop.permute.xlu0 %2452 }
 0x50b   : > { %v2518_v63 = vsel %vm653_vm1, %v7397_v8, %v2453_v61 }
 0x50d   : > { %3139 = vmatmul.mubr.f32.gmra.mrb[64].mxu1 %v2514_v43 }
 0x50e   : > { %3143 = vmatprep.mubr.f32.mxu1 %v7082_v49  ;;  %v2457_v49 = vpop.permute.xlu1 %2456  ;;  %v2461_v30 = vpop.permute.xlu0 %2460 }
 0x511   : > { %3144 = vmatmul.mubr.f32.gmra.mrb[66].mxu1 %v2515_v51  ;;  %v8382_v51 = vld [vmem:[#allocation8_spill] sm:$0xff] }
 0x512   : > { %3148 = vmatprep.mubr.f32.mxu1 %v7076_v28  ;;  %v2519_v28 = vsel %vm653_vm1, %v7407_v56, %v2457_v49  ;;  %v2465_v42 = vpop.permute.xlu1 %2464 }
 0x513   : > { %v2521_v8 = vsel %vm653_vm1, %v7427_v59, %v2465_v42 }
 0x515   : > { %3149 = vmatmul.mubr.f32.gmra.mrb[68].mxu1 %v2516_v37  ;;  %v8383_v37 = vld [vmem:[#allocation67_spill] sm:$0xff] }
 0x516   : > { %3153 = vmatprep.mubr.f32.mxu1 %v7123_v50  ;;  %v8373_v50 = vld [vmem:[#allocation65_spill] sm:$0xff] }
 0x517   : > { %v2520_v27 = vsel %vm653_vm1, %v8373_v50, %v2461_v30  ;;  %v8385_v50 = vld [vmem:[#allocation66_spill] sm:$0xff] }
 0x519   : > { %3154 = vmatmul.mubr.f32.gmra.mrb[70].mxu1 %v2517_v23 }
 0x51a   : > { %3158 = vmatprep.mubr.f32.mxu1 %v7117_v4  ;;  %v2469_v4 = vpop.permute.xlu0 %2468 }
 0x51b   : > { %v2522_v56 = vsel %vm653_vm1, %v7438_v22, %v2469_v4 }
 0x51d   : > { %3159 = vmatmul.mubr.f32.gmra.mrb[72].mxu1 %v2518_v63 }
 0x51e   : > { %3163 = vmatprep.mubr.f32.mxu1 %v7164_v48  ;;  %v2473_v48 = vpop.permute.xlu1 %2472 }
 0x51f   : > { %v2523_v11 = vsel %vm653_vm1, %v7453_v44, %v2473_v48 }
 0x521   : > { %3164 = vmatmul.mubr.f32.gmra.mrb[74].mxu1 %v2519_v28  ;;  %v8384_v28 = vld [vmem:[#allocation7_spill] sm:$0xff] }
 0x522   : > { %3168 = vmatprep.mubr.f32.mxu1 %v7158_v15  ;;  %v2477_v15 = vpop.permute.xlu0 %2476 }
 0x523   : > { %v2524_v59 = vsel %vm653_vm1, %v7467_v62, %v2477_v15 }
 0x525   : > { %3169 = vmatmul.mubr.f32.gmra.mrb[76].mxu1 %v2520_v27 }
 0x526   : > { %3173 = vmatprep.mubr.f32.mxu1 %v7205_v58  ;;  %v2481_v58 = vpop.permute.xlu1 %2480  ;;  %v2485_v38 = vpop.permute.xlu0 %2484 }
 0x527   : > { %v2525_v22 = vsel %vm653_vm1, %v7482_v3, %v2481_v58  ;;  %v2526_v44 = vsel %vm653_vm1, %v7515_v13, %v2485_v38 }
 0x529   : > { %3174 = vmatmul.mubr.f32.gmra.mrb[78].mxu1 %v2521_v8 }
 0x52a   : > { %3178 = vmatprep.mubr.f32.mxu1 %v7199_v60  ;;  %v2489_v60 = vpop.permute.xlu1 %2488 }
 0x52d   : > { %3179 = vmatmul.mubr.f32.gmra.mrb[80].mxu1 %v2522_v56  ;;  %v8386_v56 = vld [vmem:[#allocation9_spill] sm:$0xff] }
 0x52e   : > { %3183 = vmatprep.mubr.f32.mxu1 %v7236_v55  ;;  %v4605_v55 = vpop.permute.xlu0 %4604 }
 0x52f   : > { %v4606_v39 = vunpack.i.l.bf16 %v4605_v55  ;;  %v4607_v62 = vunpack.i.h.bf16 %v4605_v55  ;;  %v8388_v55 = vld [vmem:[#allocation10_spill] sm:$0xff] }
 0x531   : > { %3184 = vmatmul.mubr.f32.gmra.mrb[82].mxu1 %v2523_v11  ;;  %v2336_v3 = vsel %vm653_vm1, %v7501_v12, %v4606_v39  ;;  %v2528_v29 = vsel %vm653_vm1, %v7568_v26, %v4607_v62  ;;  %v2266_v26 = vrot.slane %v7503_v54, 2  ;;  %v8387_v11 = vld [vmem:[#allocation48_spill] sm:$0xff] }
 0x532   : > { %3188 = vmatprep.mubr.f32.mxu1 %v7277_v45  ;;  %v4610_v45 = vpop.permute.xlu1 %4609 }
 0x533   : > { %v4611_v57 = vunpack.i.l.bf16 %v4610_v45  ;;  %v4612_v25 = vunpack.i.h.bf16 %v4610_v45 }
 0x535   : > { %3189 = vmatmul.mubr.f32.gmra.mrb[84].mxu1 %v2524_v59  ;;  %v2337_v13 = vsel %vm653_vm1, %v7503_v54, %v4611_v57  ;;  %v2529_v10 = vsel %vm653_vm1, %v7574_v35, %v4612_v25  ;;  %v2268_v35 = vrot.slane %v7522_v9, 2  ;;  %v8390_v57 = vld [vmem:[#allocation11_spill] sm:$0xff]  ;;  %v8391_v25 = vld [vmem:[#allocation50_spill] sm:$0xff] }
 0x536   : > { %3193 = vmatprep.mubr.f32.mxu1 %v7271_v2  ;;  %v2527_v2 = vsel %vm653_vm1, %v7513_v16, %v2489_v60  ;;  %v8376_v16 = vld [vmem:[#allocation56_spill] sm:$0xff] }
 0x539   : > { %3194 = vmatmul.mubr.f32.gmra.mrb[86].mxu1 %v2525_v22 }
 0x53a   : > { %3198 = vmatprep.mubr.f32.mxu1 %v8374_v14 }
 0x53d   : > { %3199 = vmatmul.mubr.f32.gmra.mrb[88].mxu1 %v2526_v44  ;;  %v8389_v44 = vld [vmem:[#allocation69_spill] sm:$0xff] }
 0x53e   : > { %3203 = vmatprep.mubr.f32.mxu1 %v8375_v40 }
 0x541   : > { %3204 = vmatmul.mubr.f32.gmra.mrb[90].mxu1 %v2527_v2 }
 0x542   : > { %3208 = vmatprep.mubr.f32.mxu1 %v2336_v3 }
 0x545   : > { %3209 = vmatmul.mubr.f32.gmra.mrb[92].mxu1 %v2528_v29 }
 0x546   : > { %3213 = vmatprep.mubr.f32.mxu1 %v2337_v13 }
 0x549   : > { %3214 = vmatmul.mubr.f32.gmra.mrb[94].mxu1 %v2529_v10 }
 0x54a   : > { %3916 = vmatprep.mubr.msk.f32.mxu1 %vm653_vm1, %v7446_v19  ;;  %v2265_v19 = vrot.slane %v7501_v12, 2  ;;  %v7732_v12 = vld [vmem:[%s7943_s4] ss:$0 sm:$0xff] }
 0x54d   : > { %3917 = vmatmul.mubr.msk.f32.vlgmr.msra.gmra.mrb[96].mxu1 %vm653_vm1, %v8376_v16 }
 0x54e   : > { %3919 = vmatprep.mubr.msk.f32.mxu1 %vm653_vm1, %v8377_v33 }
 0x551   : > { %3920 = vmatmul.mubr.msk.f32.gmra.mrb[98].mxu1 %vm653_vm1, %v8378_v52  ;;  %v8392_v52 = vld [vmem:[#allocation12_spill] sm:$0xff] }
 0x552   : > { %3922 = vmatprep.mubr.msk.f32.mxu1 %vm653_vm1, %v7518_v5  ;;  %v2267_v5 = vsel %vm530_vm2, %v2265_v19, %v2266_v26 }
 0x555   : > { %3923 = vmatmul.mubr.msk.f32.gmra.mrb[100].mxu1 %vm653_vm1, %v7532_v21  ;;  %v2269_v21 = vsel %vm530_vm2, %v2266_v26, %v2268_v35  ;;  %v8393_v26 = vld [vmem:[#allocation70_spill] sm:$0xff] }
 0x556   : > { %3925 = vmatprep.mubr.msk.f32.mxu1 %vm653_vm1, %v7543_v46 }
 0x559   : > { %3926 = vmatmul.mubr.msk.f32.gmra.mrb[102].mxu1 %vm653_vm1, %v7557_v1 }
 0x55a   : > { %3928 = vmatprep.mubr.msk.f32.mxu1 %vm653_vm1, %v7546_v41  ;;  %v8379_v41 = vld [vmem:[#allocation64_spill] sm:$0xff] }
 0x55d   : > { %3929 = vmatmul.mubr.msk.f32.gmra.mrb[104].mxu1 %vm653_vm1, %v7561_v17 }
 0x55e   : > { %3931 = vmatprep.mubr.msk.f32.mxu1 %vm653_vm1, %v2267_v5 }
 0x561   : > { %3932 = vmatmul.mubr.msk.f32.gmra.mrb[106].mxu1 %vm653_vm1, %v2269_v21 }
 0x5a0   : > { %v3060_v54 = vpop.f32.mrb[32].mxu1 }
 0x5a1   : > { %v4198_v9 = vadd.f32 %v7732_v12, %v3060_v54  ;;  %v3062_v46 = vpop.f32.mrb[33].mxu1 }
 0x5a2   : > { %v8394_v46 = vld [vmem:[#allocation13_spill] sm:$0xff] }
 0x5a3   : > { %v3286_v1 = vadd.f32 %v4198_v9, %v8379_v41 }
 0x5a4   : > { %v3065_v17 = vpop.f32.mrb[34].mxu1 }
 0x5a5   : > { %v3444_v20 = vmax.f32 %v3286_v1, 0.0  ;;  %v4199_v32 = vadd.f32 %v7732_v12, %v3065_v17  ;;  %v3067_v31 = vpop.f32.mrb[35].mxu1  ;;  %v8395_v1 = vld [vmem:[#allocation72_spill] sm:$0xff] }
 0x5a7   : > { %v3508_v0 = vadd.f32 %v3444_v20, %v8380_v6  ;;  %v3291_v53 = vadd.f32 %v4199_v32, %v8381_v47 }
 0x5a8   : > { %v3070_v36 = vpop.f32.mrb[36].mxu1 }
 0x5a9   : > { %3540 = vst.msk [vmem:[%s7742_s14] sm:$0xff] %vm653_vm1, %v3508_v0  ;;  %v3445_v24 = vmax.f32 %v3291_v53, 0.0  ;;  %v4200_v43 = vadd.f32 %v7732_v12, %v3070_v36  ;;  %v3072_v7 = vpop.f32.mrb[37].mxu1  ;;  %v8396_v0 = vld [vmem:[#allocation16_spill] sm:$0xff]  ;;  %v8397_v53 = vld [vmem:[#allocation71_spill] sm:$0xff] }
 0x5ab   : > { %v3509_v18 = vadd.f32 %v3445_v24, %v8382_v51  ;;  %v3296_v34 = vadd.f32 %v4200_v43, %v8383_v37 }
 0x5ac   : > { %v3075_v23 = vpop.f32.mrb[38].mxu1 }
 0x5ad   : > { %3541 = vst.msk [vmem:[%s7742_s14 + $0x8] sm:$0xff] %vm653_vm1, %v3509_v18  ;;  %v3446_v61 = vmax.f32 %v3296_v34, 0.0  ;;  %v4201_v63 = vadd.f32 %v7732_v12, %v3075_v23  ;;  %v3077_v49 = vpop.f32.mrb[39].mxu1  ;;  %v8398_v18 = vld [vmem:[#allocation17_spill] sm:$0xff] }
 0x5ae   : > { %v8399_v34 = vld [vmem:[#allocation41_spill] sm:$0xff] }
 0x5af   : > { %v3510_v30 = vadd.f32 %v3446_v61, %v8384_v28  ;;  %v3301_v27 = vadd.f32 %v4201_v63, %v8385_v50 }
 0x5b0   : > { %v3080_v42 = vpop.f32.mrb[40].mxu1 }
 0x5b1   : > { %3542 = vst.msk [vmem:[%s7742_s14 + $0x10] sm:$0xff] %vm653_vm1, %v3510_v30  ;;  %v3447_v4 = vmax.f32 %v3301_v27, 0.0  ;;  %v4202_v8 = vadd.f32 %v7732_v12, %v3080_v42  ;;  %v3082_v48 = vpop.f32.mrb[41].mxu1  ;;  %v8400_v30 = vld [vmem:[#allocation18_spill] sm:$0xff]  ;;  %v8401_v27 = vld [vmem:[#allocation76_spill] sm:$0xff] }
 0x5b3   : > { %v3511_v15 = vadd.f32 %v3447_v4, %v8386_v56  ;;  %v3306_v58 = vadd.f32 %v4202_v8, %v8387_v11 }
 0x5b4   : > { %v3085_v38 = vpop.f32.mrb[42].mxu1 }
 0x5b5   : > { %3543 = vst.msk [vmem:[%s7742_s14 + $0x18] sm:$0xff] %vm653_vm1, %v3511_v15  ;;  %v3448_v59 = vmax.f32 %v3306_v58, 0.0  ;;  %v4203_v60 = vadd.f32 %v7732_v12, %v3085_v38  ;;  %v3087_v22 = vpop.f32.mrb[43].mxu1  ;;  %v8402_v15 = vld [vmem:[#allocation19_spill] sm:$0xff]  ;;  %v8403_v58 = vld [vmem:[#allocation80_spill] sm:$0xff] }
 0x5b7   : > { %v3512_v14 = vadd.f32 %v3448_v59, %v8388_v55  ;;  %v3311_v39 = vadd.f32 %v4203_v60, %v8389_v44 }
 0x5b8   : > { %v3090_v45 = vpop.f32.mrb[44].mxu1 }
 0x5b9   : > { %3544 = vst.msk [vmem:[%s7742_s14 + $0x20] sm:$0xff] %vm653_vm1, %v3512_v14  ;;  %v3449_v40 = vmax.f32 %v3311_v39, 0.0  ;;  %v4204_v62 = vadd.f32 %v7732_v12, %v3090_v45  ;;  %v3092_v2 = vpop.f32.mrb[45].mxu1  ;;  %v8404_v14 = vld [vmem:[#allocation22_spill] sm:$0xff]  ;;  %v8405_v39 = vld [vmem:[#allocation79_spill] sm:$0xff] }
 0x5bb   : > { %v3513_v3 = vadd.f32 %v3449_v40, %v8390_v57  ;;  %v3316_v29 = vadd.f32 %v4204_v62, %v8391_v25 }
 0x5bc   : > { %v3095_v13 = vpop.f32.mrb[46].mxu1 }
 0x5bd   : > { %3545 = vst.msk [vmem:[%s7742_s14 + $0x28] sm:$0xff] %vm653_vm1, %v3513_v3  ;;  %v3450_v10 = vmax.f32 %v3316_v29, 0.0  ;;  %v4205_v16 = vadd.f32 %v7732_v12, %v3095_v13  ;;  %v3097_v33 = vpop.f32.mrb[47].mxu1  ;;  %v8406_v3 = vld [vmem:[#allocation20_spill] sm:$0xff] }
 0x5be   : > { %v8407_v29 = vld [vmem:[#allocation84_spill] sm:$0xff] }
 0x5bf   : > { %v3514_v19 = vadd.f32 %v3450_v10, %v8392_v52  ;;  %v3321_v35 = vadd.f32 %v4205_v16, %v8393_v26 }
 0x5c0   : > { %v3100_v5 = vpop.f32.mrb[48].mxu1 }
 0x5c1   : > { %3546 = vst.msk [vmem:[%s7742_s14 + $0x30] sm:$0xff] %vm653_vm1, %v3514_v19  ;;  %v3451_v21 = vmax.f32 %v3321_v35, 0.0  ;;  %v4206_v54 = vadd.f32 %v7732_v12, %v3100_v5  ;;  %v3102_v9 = vpop.f32.mrb[49].mxu1  ;;  %v8408_v19 = vld [vmem:[#allocation21_spill] sm:$0xff]  ;;  %v8409_v35 = vld [vmem:[#allocation83_spill] sm:$0xff] }
 0x5c3   : > { %v3515_v41 = vadd.f32 %v3451_v21, %v8394_v46  ;;  %v3326_v17 = vadd.f32 %v4206_v54, %v8395_v1 }
 0x5c4   : > { %v3105_v20 = vpop.f32.mrb[50].mxu1 }
 0x5c5   : > { %3547 = vst.msk [vmem:[%s7742_s14 + $0x38] sm:$0xff] %vm653_vm1, %v3515_v41  ;;  %v3452_v32 = vmax.f32 %v3326_v17, 0.0  ;;  %v4207_v31 = vadd.f32 %v7732_v12, %v3105_v20  ;;  %v3107_v6 = vpop.f32.mrb[51].mxu1  ;;  %v8410_v41 = vld [vmem:[#allocation27_spill] sm:$0xff] }
 0x5c6   : > { %v8411_v17 = vld [vmem:[#allocation87_spill] sm:$0xff] }
 0x5c7   : > { %v3516_v47 = vadd.f32 %v3452_v32, %v8396_v0  ;;  %v3331_v36 = vadd.f32 %v4207_v31, %v8397_v53 }
 0x5c8   : > { %v3110_v24 = vpop.f32.mrb[52].mxu1 }
 0x5c9   : > { %3548 = vst.msk [vmem:[%s7742_s14 + $0x40] sm:$0xff] %vm653_vm1, %v3516_v47  ;;  %v3453_v43 = vmax.f32 %v3331_v36, 0.0  ;;  %v4208_v7 = vadd.f32 %v7732_v12, %v3110_v24  ;;  %v3112_v51 = vpop.f32.mrb[53].mxu1  ;;  %v8412_v47 = vld [vmem:[#allocation25_spill] sm:$0xff]  ;;  %v8413_v36 = vld [vmem:[#allocation86_spill] sm:$0xff] }
 0x5cb   : > { %v3517_v37 = vadd.f32 %v3453_v43, %v8398_v18  ;;  %v3336_v23 = vadd.f32 %v4208_v7, %v8399_v34 }
 0x5cc   : > { %v3115_v61 = vpop.f32.mrb[54].mxu1 }
 0x5cd   : > { %3549 = vst.msk [vmem:[%s7742_s14 + $0x48] sm:$0xff] %vm653_vm1, %v3517_v37  ;;  %v3454_v63 = vmax.f32 %v3336_v23, 0.0  ;;  %v4209_v49 = vadd.f32 %v7732_v12, %v3115_v61  ;;  %v3117_v28 = vpop.f32.mrb[55].mxu1  ;;  %v8414_v37 = vld [vmem:[#allocation28_spill] sm:$0xff]  ;;  %v8415_v23 = vld [vmem:[#allocation91_spill] sm:$0xff] }
 0x5cf   : > { %v3518_v50 = vadd.f32 %v3454_v63, %v8400_v30  ;;  %v3341_v42 = vadd.f32 %v4209_v49, %v8401_v27 }
 0x5d0   : > { %v3120_v4 = vpop.f32.mrb[56].mxu1 }
 0x5d1   : > { %3550 = vst.msk [vmem:[%s7742_s14 + $0x50] sm:$0xff] %vm653_vm1, %v3518_v50  ;;  %v3455_v8 = vmax.f32 %v3341_v42, 0.0  ;;  %v4210_v48 = vadd.f32 %v7732_v12, %v3120_v4  ;;  %v3122_v56 = vpop.f32.mrb[57].mxu1  ;;  %v8416_v50 = vld [vmem:[#allocation31_spill] sm:$0xff]  ;;  %v8417_v42 = vld [vmem:[#allocation88_spill] sm:$0xff] }
 0x5d3   : > { %v3519_v11 = vadd.f32 %v3455_v8, %v8402_v15  ;;  %v3346_v38 = vadd.f32 %v4210_v48, %v8403_v58  ;;  %v8418_v15 = vld [vmem:[#allocation34_spill] sm:$0xff] }
 0x5d4   : > { %v3125_v59 = vpop.f32.mrb[58].mxu1 }
 0x5d5   : > { %3551 = vst.msk [vmem:[%s7742_s14 + $0x58] sm:$0xff] %vm653_vm1, %v3519_v11  ;;  %v3456_v60 = vmax.f32 %v3346_v38, 0.0  ;;  %v4211_v22 = vadd.f32 %v7732_v12, %v3125_v59  ;;  %v3127_v55 = vpop.f32.mrb[59].mxu1 }
 0x5d7   : > { %v3520_v44 = vadd.f32 %v3456_v60, %v8404_v14  ;;  %v3351_v45 = vadd.f32 %v4211_v22, %v8405_v39 }
 0x5d8   : > { %v3130_v40 = vpop.f32.mrb[60].mxu1 }
 0x5d9   : > { %3552 = vst.msk [vmem:[%s7742_s14 + $0x60] sm:$0xff] %vm653_vm1, %v3520_v44  ;;  %v3457_v62 = vmax.f32 %v3351_v45, 0.0  ;;  %v4212_v2 = vadd.f32 %v7732_v12, %v3130_v40  ;;  %v3132_v57 = vpop.f32.mrb[61].mxu1 }
 0x5db   : > { %v3521_v25 = vadd.f32 %v3457_v62, %v8406_v3  ;;  %v3356_v13 = vadd.f32 %v4212_v2, %v8407_v29 }
 0x5dc   : > { %v3135_v10 = vpop.f32.mrb[62].mxu1 }
 0x5dd   : > { %3553 = vst.msk [vmem:[%s7742_s14 + $0x68] sm:$0xff] %vm653_vm1, %v3521_v25  ;;  %v3458_v16 = vmax.f32 %v3356_v13, 0.0  ;;  %v4213_v33 = vadd.f32 %v7732_v12, %v3135_v10  ;;  %v3137_v52 = vpop.f32.mrb[63].mxu1 }
 0x5df   : > { %v3522_v26 = vadd.f32 %v3458_v16, %v8408_v19  ;;  %v3361_v5 = vadd.f32 %v4213_v33, %v8409_v35 }
 0x5e0   : > { %v3140_v21 = vpop.f32.mrb[64].mxu1 }
 0x5e1   : > { %3554 = vst.msk [vmem:[%s7742_s14 + $0x70] sm:$0xff] %vm653_vm1, %v3522_v26  ;;  %v3459_v54 = vmax.f32 %v3361_v5, 0.0  ;;  %v4214_v9 = vadd.f32 %v7732_v12, %v3140_v21  ;;  %v3142_v46 = vpop.f32.mrb[65].mxu1 }
 0x5e3   : > { %v3523_v1 = vadd.f32 %v3459_v54, %v8410_v41  ;;  %v3366_v20 = vadd.f32 %v4214_v9, %v8411_v17 }
 0x5e4   : > { %v3145_v32 = vpop.f32.mrb[66].mxu1 }
 0x5e5   : > { %3555 = vst.msk [vmem:[%s7742_s14 + $0x78] sm:$0xff] %vm653_vm1, %v3523_v1  ;;  %v3460_v31 = vmax.f32 %v3366_v20, 0.0  ;;  %v4215_v6 = vadd.f32 %v7732_v12, %v3145_v32  ;;  %v3147_v0 = vpop.f32.mrb[67].mxu1  ;;  %v8419_v20 = vld [vmem:[#allocation37_spill] sm:$0xff] }
 0x5e6   : > { %v8420_v0 = vld [vmem:[#allocation35_spill] sm:$0xff] }
 0x5e7   : > { %v3524_v53 = vadd.f32 %v3460_v31, %v8412_v47  ;;  %v3371_v24 = vadd.f32 %v4215_v6, %v8413_v36 }
 0x5e8   : > { %v3150_v43 = vpop.f32.mrb[68].mxu1 }
 0x5e9   : > { %3556 = vst.msk [vmem:[%s7742_s14 + $0x80] sm:$0xff] %vm653_vm1, %v3524_v53  ;;  %v3461_v7 = vmax.f32 %v3371_v24, 0.0  ;;  %v4216_v51 = vadd.f32 %v7732_v12, %v3150_v43  ;;  %v3152_v18 = vpop.f32.mrb[69].mxu1 }
 0x5ea   : > { %v8421_v18 = vld [vmem:[#allocation40_spill] sm:$0xff] }
 0x5eb   : > { %v3525_v34 = vadd.f32 %v3461_v7, %v8414_v37  ;;  %v3376_v61 = vadd.f32 %v4216_v51, %v8415_v23 }
 0x5ec   : > { %v3155_v63 = vpop.f32.mrb[70].mxu1 }
 0x5ed   : > { %3557 = vst.msk [vmem:[%s7742_s14 + $0x88] sm:$0xff] %vm653_vm1, %v3525_v34  ;;  %v3462_v49 = vmax.f32 %v3376_v61, 0.0  ;;  %v4217_v28 = vadd.f32 %v7732_v12, %v3155_v63  ;;  %v3157_v30 = vpop.f32.mrb[71].mxu1  ;;  %v8422_v61 = vld [vmem:[#allocation38_spill] sm:$0xff] }
 0x5ef   : > { %v3526_v27 = vadd.f32 %v3462_v49, %v8416_v50  ;;  %v3381_v4 = vadd.f32 %v4217_v28, %v8417_v42 }
 0x5f0   : > { %v3160_v8 = vpop.f32.mrb[72].mxu1 }
 0x5f1   : > { %3558 = vst.msk [vmem:[%s7742_s14 + $0x90] sm:$0xff] %vm653_vm1, %v3526_v27  ;;  %v3463_v48 = vmax.f32 %v3381_v4, 0.0  ;;  %v3162_v56 = vpop.f32.mrb[73].mxu1  ;;  %v4218_v26 = vadd.f32 %v7732_v12, %v3160_v8  ;;  %v8423_v4 = vld [vmem:[#allocation46_spill] sm:$0xff] }
 0x5f3   : > { %v3527_v11 = vadd.f32 %v3463_v48, %v8418_v15  ;;  %v8424_v15 = vld [vmem:[#allocation42_spill] sm:$0xff] }
 0x5f4   : > { %v3165_v58 = vpop.f32.mrb[74].mxu1 }
 0x5f5   : > { %3559 = vst.msk [vmem:[%s7742_s14 + $0x98] sm:$0xff] %vm653_vm1, %v3527_v11  ;;  %v3167_v38 = vpop.f32.mrb[75].mxu1  ;;  %v4219_v19 = vadd.f32 %v7732_v12, %v3165_v58 }
 0x5f8   : > { %v3170_v59 = vpop.f32.mrb[76].mxu1 }
 0x5f9   : > { %v3172_v60 = vpop.f32.mrb[77].mxu1  ;;  %v4220_v41 = vadd.f32 %v7732_v12, %v3170_v59 }
 0x5fc   : > { %v3175_v22 = vpop.f32.mrb[78].mxu1 }
 0x5fd   : > { %v3177_v55 = vpop.f32.mrb[79].mxu1  ;;  %v4221_v9 = vadd.f32 %v7732_v12, %v3175_v22 }
 0x600   : > { %v3180_v14 = vpop.f32.mrb[80].mxu1 }
 0x601   : > { %v3182_v44 = vpop.f32.mrb[81].mxu1  ;;  %v4222_v43 = vadd.f32 %v7732_v12, %v3180_v14  ;;  %v8425_v14 = vld [vmem:[#allocation51_spill] sm:$0xff] }
 0x604   : > { %v3185_v39 = vpop.f32.mrb[82].mxu1 }
 0x605   : > { %v3187_v45 = vpop.f32.mrb[83].mxu1  ;;  %v4223_v36 = vadd.f32 %v7732_v12, %v3185_v39 }
 0x608   : > { %v3190_v40 = vpop.f32.mrb[84].mxu1 }
 0x609   : > { %v3192_v62 = vpop.f32.mrb[85].mxu1  ;;  %v4224_v50 = vadd.f32 %v7732_v12, %v3190_v40  ;;  %v8426_v40 = vld [vmem:[#allocation47_spill] sm:$0xff] }
 0x60c   : > { %v3195_v2 = vpop.f32.mrb[86].mxu1 }
 0x60d   : > { %v3197_v57 = vpop.f32.mrb[87].mxu1  ;;  %v4225_v28 = vadd.f32 %v7732_v12, %v3195_v2 }
 0x610   : > { %v3200_v3 = vpop.f32.mrb[88].mxu1 }
 0x611   : > { %v3202_v25 = vpop.f32.mrb[89].mxu1  ;;  %v4226_v60 = vadd.f32 %v7732_v12, %v3200_v3 }
 0x614   : > { %v3205_v29 = vpop.f32.mrb[90].mxu1 }
 0x615   : > { %v3207_v13 = vpop.f32.mrb[91].mxu1  ;;  %v4227_v38 = vadd.f32 %v7732_v12, %v3205_v29 }
 0x618   : > { %v3210_v10 = vpop.f32.mrb[92].mxu1 }
 0x619   : > { %v3212_v16 = vpop.f32.mrb[93].mxu1  ;;  %v4228_v25 = vadd.f32 %v7732_v12, %v3210_v10 }
 0x61a   : > { %v8427_v16 = vld [vmem:[#allocation54_spill] sm:$0xff] }
 0x61c   : > { %v3215_v33 = vpop.f32.mrb[94].mxu1 }
 0x61d   : > { %v3217_v52 = vpop.f32.mrb[95].mxu1  ;;  %v4229_v57 = vadd.f32 %v7732_v12, %v3215_v33 }
 0x620   : > { %v3918_v35 = vpop.f32.mrb[96].mxu1 }
 0x621   : > { %v3391_v5 = vadd.f32 %v4219_v19, %v3918_v35  ;;  %v3385_v21 = vpop.f32.mrb[97].mxu1  ;;  %v8428_v35 = vld [vmem:[#allocation52_spill] sm:$0xff] }
 0x622   : > { %v3386_v54 = vadd.f32 %v4218_v26, %v3385_v21  ;;  %v8429_v21 = vld [vmem:[#allocation62_spill] sm:$0xff] }
 0x623   : > { %v3465_v46 = vmax.f32 %v3391_v5, 0.0 }
 0x624   : > { %v3464_v1 = vmax.f32 %v3386_v54, 0.0  ;;  %v3921_v17 = vpop.f32.mrb[98].mxu1 }
 0x625   : > { %v3529_v32 = vadd.f32 %v3465_v46, %v8419_v20  ;;  %v3401_v31 = vadd.f32 %v4221_v9, %v3921_v17  ;;  %v3395_v6 = vpop.f32.mrb[99].mxu1  ;;  %v8430_v9 = vld [vmem:[#allocation61_spill] sm:$0xff] }
 0x626   : > { %v3528_v47 = vadd.f32 %v3464_v1, %v8420_v0  ;;  %v3396_v53 = vadd.f32 %v4220_v41, %v3395_v6 }
 0x627   : > { %3561 = vst.msk [vmem:[%s7742_s14 + $0xa8] sm:$0xff] %vm653_vm1, %v3529_v32  ;;  %v3467_v24 = vmax.f32 %v3401_v31, 0.0 }
 0x628   : > { %3560 = vst.msk [vmem:[%s7742_s14 + $0xa0] sm:$0xff] %vm653_vm1, %v3528_v47  ;;  %v3466_v7 = vmax.f32 %v3396_v53, 0.0  ;;  %v3924_v51 = vpop.f32.mrb[100].mxu1 }
 0x629   : > { %v3531_v37 = vadd.f32 %v3467_v24, %v8421_v18  ;;  %v3411_v34 = vadd.f32 %v4223_v36, %v3924_v51  ;;  %v3405_v23 = vpop.f32.mrb[101].mxu1 }
 0x62a   : > { %v3530_v63 = vadd.f32 %v3466_v7, %v8422_v61  ;;  %v3406_v49 = vadd.f32 %v4222_v43, %v3405_v23 }
 0x62b   : > { %3563 = vst.msk [vmem:[%s7742_s14 + $0xb8] sm:$0xff] %vm653_vm1, %v3531_v37  ;;  %v3469_v30 = vmax.f32 %v3411_v34, 0.0 }
 0x62c   : > { %3562 = vst.msk [vmem:[%s7742_s14 + $0xb0] sm:$0xff] %vm653_vm1, %v3530_v63  ;;  %v3468_v27 = vmax.f32 %v3406_v49, 0.0  ;;  %v3927_v42 = vpop.f32.mrb[102].mxu1 }
 0x62d   : > { %v3533_v8 = vadd.f32 %v3469_v30, %v8423_v4  ;;  %v3421_v48 = vadd.f32 %v4225_v28, %v3927_v42  ;;  %v3415_v56 = vpop.f32.mrb[103].mxu1 }
 0x62e   : > { %v3532_v11 = vadd.f32 %v3468_v27, %v8424_v15  ;;  %v3416_v58 = vadd.f32 %v4224_v50, %v3415_v56 }
 0x62f   : > { %3565 = vst.msk [vmem:[%s7742_s14 + $0xc8] sm:$0xff] %vm653_vm1, %v3533_v8  ;;  %v3471_v59 = vmax.f32 %v3421_v48, 0.0 }
 0x630   : > { %3564 = vst.msk [vmem:[%s7742_s14 + $0xc0] sm:$0xff] %vm653_vm1, %v3532_v11  ;;  %v3470_v22 = vmax.f32 %v3416_v58, 0.0  ;;  %v3930_v55 = vpop.f32.mrb[104].mxu1 }
 0x631   : > { %v3535_v44 = vadd.f32 %v3471_v59, %v8425_v14  ;;  %v3431_v39 = vadd.f32 %v4227_v38, %v3930_v55  ;;  %v3425_v45 = vpop.f32.mrb[105].mxu1 }
 0x632   : > { %v3534_v62 = vadd.f32 %v3470_v22, %v8426_v40  ;;  %v3426_v2 = vadd.f32 %v4226_v60, %v3425_v45 }
 0x633   : > { %3567 = vst.msk [vmem:[%s7742_s14 + $0xd8] sm:$0xff] %vm653_vm1, %v3535_v44  ;;  %v3473_v3 = vmax.f32 %v3431_v39, 0.0 }
 0x634   : > { %3566 = vst.msk [vmem:[%s7742_s14 + $0xd0] sm:$0xff] %vm653_vm1, %v3534_v62  ;;  %v3472_v29 = vmax.f32 %v3426_v2, 0.0  ;;  %v3933_v13 = vpop.f32.mrb[106].mxu1 }
 0x635   : > { %v3537_v52 = vadd.f32 %v3473_v3, %v8427_v16  ;;  %v3441_v19 = vadd.f32 %v4229_v57, %v3933_v13  ;;  %v3435_v26 = vpop.f32.mrb[107].mxu1 }
 0x636   : > { %v3536_v5 = vadd.f32 %v3472_v29, %v8428_v35  ;;  %v3436_v33 = vadd.f32 %v4228_v25, %v3435_v26 }
 0x637   : > { %3569 = vst.msk [vmem:[%s7742_s14 + $0xe8] sm:$0xff] %vm653_vm1, %v3537_v52  ;;  %v3475_v12 = vmax.f32 %v3441_v19, 0.0 }
 0x638   : > { %3568 = vst.msk [vmem:[%s7742_s14 + $0xe0] sm:$0xff] %vm653_vm1, %v3536_v5  ;;  %v3474_v10 = vmax.f32 %v3436_v33, 0.0 }
 0x639   : > { %v3539_v54 = vadd.f32 %v3475_v12, %v8429_v21 }
 0x63a   : > { %v3538_v46 = vadd.f32 %v3474_v10, %v8430_v9 }
 0x63b   : > { %3571 = vst.msk [vmem:[%s7742_s14 + $0xf8] sm:$0xff] %vm653_vm1, %v3539_v54 }
 0x63c   : > { %3570 = vst.msk [vmem:[%s7742_s14 + $0xf0] sm:$0xff] %vm653_vm1, %v3538_v46 }
 0x63d   : > { %4629 = shalt.err (!%p4626_p3)
}
 0x63e   : > { %s4630_s7 = scalar_lea.hbm %s7887_s23, 4096  ;;  %s4634_s11 = scalar_lea.hbm %s7944_s5, 8192 }
 0x63f   : > { %p4631_p4 = scmp.ne.s32.totalorder %s7887_s23, %s4630_s7  ;;  %p4635_p9 = scmp.lt.u32.totalorder %s7887_s23, %s7944_s5 }
 0x640   : > { %p4636_p10 = scmp.lt.u32.totalorder %s4634_s11, %s4630_s7  ;;  %p4638_p12 = scmp.lt.u32.totalorder %s4630_s7, %s7887_s23 }
 0x641   : > { %p4632_p7 = pnand %p4631_p4, %p4754_p5 }
 0x642   : > { %p4637_p11 = por %p4636_p10, %p4635_p9 }
 0x643   : > { %p4633_p8 = pneg %p4632_p7 }
 0x644   : > { %p4639_p13 = por %p4638_p12, %p4637_p11 }
 0x646   : > { %p4640_p0 = pnand %p4639_p13, %p4633_p8 }
 0x648   : > { %4643 = shalt.err (!%p4640_p0)
}
 0x649   : > { %s4684_s14 = smov 128   ;;  %s4685_s9 = smov 8  }
 0x64a   : > { %4359 = dma.vmem_to_hbm [thread:$0]  (%p4754_p5), %s7889_s15, 4096, %s7887_s23, %s7898_s22, %s4684_s14, %s4684_s14, %s4685_s9  }
 0x64b PF: > { %p4365_p1 = scmp.ge.s32.totalorder %s4678_s21, 2  ;;  %s3601_s16 = sand.u32 1, %s4666_s18  }
 0x64c   : > { %s3602_s17 = scalar_lea.sflag [#allocation4], %s3601_s16 }
 0x64d   : > { %p4362_p2 = pnand %p4365_p1, %p4758_p6 }
 0x64f   : > { %4661 = dma.done.wait (!%p4362_p2), %s3602_s17, 4096  }
 0x650   : > { %4663 = vsyncadd (!%p4362_p2), %s3602_s17, 4294963200  ;;  %p15_p3 = scmp.ge.s32.totalorder %s4741_s24, 4   ;;  %s8431_s18 = smov %s4670_s19 }
 0x651   : > { %s8432_s19 = smov %s4674_s20  ;;  %s8433_s20 = smov %s4752_s27 }
 0x652   : > { %s8434_s21 = smov %s4741_s24  ;;  %17 = sbr.rel (!%p15_p3) target bundleno = 3 (0x3), region = 77 }
 0x659   :  { %3607 = vsyncpa [#allocation4], 1 }
 0x65a   :  { %3609 = vsyncpa [#allocation4 + $0x1], 1 }

</bundles_post_ra>
